<compile_context>
chip_gen: v7x
topology: tpu7x:2x2x1
jax: 0.10.0
libtpu: 0.0.40
codegen_flags: <defaults>
</compile_context>

<pallas_src>
import math
import functools

import jax
import jax.numpy as jnp
from jax.experimental import pallas as pl
from jax.experimental.pallas import tpu as pltpu


# --------------------------- per-generation budgets ---------------------------

def _vmem_capacity_bytes():
    try:
        info = pltpu.get_tpu_info()
        cap = getattr(info, "vmem_capacity_bytes", None)
        if cap:
            return int(cap)
    except Exception:
        pass
    return 64 * 1024 * 1024  # conservative default (v7x-sized core)


_VMEM_CAP = _vmem_capacity_bytes()
_BIG_VMEM = _VMEM_CAP >= 100 * 1024 * 1024          # v5e / v6e: 128 MiB per core
VMEM_LIMIT = int(min((_VMEM_CAP * 3) // 4, 110 * 1024 * 1024))

if _BIG_VMEM:
    _ROW_TILES = (512, 256, 128, 64, 32, 16, 8)     # row tiles of flattened [B*T, D]
    _SEQ_TILES = (512, 256, 128, 64, 32, 16, 8)     # q / kv tiles for flash attention
    _HID_TILES = (2048, 1024, 512, 256, 128)        # MLP hidden (4D) reduction tiles
else:                                               # v7x (64 MiB/TC) / unknown
    _ROW_TILES = (256, 128, 64, 32, 16, 8)
    _SEQ_TILES = (256, 128, 64, 32, 16, 8)
    _HID_TILES = (1024, 512, 256, 128)


def _pick_tile(dim, candidates):
    for c in candidates:
        if c <= dim and dim % c == 0:
            return c
    return dim  # fall back to the full dimension (always a legal block)


def _qkv_col_tile(d):
    # 3 weight tiles x 2 pipeline buffers x 2 bytes (bf16) = 12 bytes / element.
    budget = (16 if _BIG_VMEM else 8) * 1024 * 1024
    if 12 * d * d <= budget:
        return d
    # column tiles must be multiples of 128 (lane-aligned) and divide D
    for ct in (2048, 1920, 1792, 1664, 1536, 1408, 1280, 1152, 1024,
               896, 768, 640, 512, 384, 256, 128):
        if ct < d and d % ct == 0 and 12 * d * ct <= budget:
            return ct
    return d  # cannot subdivide legally (e.g. D=1600); keep full width


# ------------------------------ in-kernel helpers -----------------------------

def _layer_norm(x, w, b, eps=1e-8):
    # x: [M, D] f32, w/b: [D] f32.  eps matches the reference (1e-08).
    mu = jnp.mean(x, axis=-1, keepdims=True)
    xc = x - mu
    var = jnp.mean(xc * xc, axis=-1, keepdims=True)
    return xc * jax.lax.rsqrt(var + eps) * w + b


def _new_gelu(x):
    c = math.sqrt(2.0 / math.pi)
    return 0.5 * x * (1.0 + jnp.tanh(c * (x + 0.044715 * x * x * x)))


# --------------------------- kernel 1: LN1 + q/k/v -----------------------------

def _ln_qkv_kernel(x_ref, lnw_ref, lnb_ref, wq_ref, wk_ref, wv_ref,
                   bq_ref, bk_ref, bv_ref, q_ref, k_ref, v_ref):
    h = _layer_norm(x_ref[...], lnw_ref[0], lnb_ref[0]).astype(jnp.bfloat16)
    q_ref[...] = (jnp.dot(h, wq_ref[...], preferred_element_type=jnp.float32)
                  + bq_ref[0]).astype(q_ref.dtype)
    k_ref[...] = (jnp.dot(h, wk_ref[...], preferred_element_type=jnp.float32)
                  + bk_ref[0]).astype(k_ref.dtype)
    v_ref[...] = (jnp.dot(h, wv_ref[...], preferred_element_type=jnp.float32)
                  + bv_ref[0]).astype(v_ref.dtype)


def ln_qkv_proj(x2, lnw, lnb, wq, wk, wv, bq, bk, bv):
    M, D = x2.shape
    MT = _pick_tile(M, _ROW_TILES)
    CT = _qkv_col_tile(D)                 # column-tile big qkv weights (v7x / XL)
    wspec = pl.BlockSpec((D, CT), lambda i, j: (0, j))
    bspec = pl.BlockSpec((1, CT), lambda i, j: (0, j))
    ospec = pl.BlockSpec((MT, CT), lambda i, j: (i, j))
    out = jax.ShapeDtypeStruct((M, D), jnp.bfloat16)
    return pl.pallas_call(
        _ln_qkv_kernel,
        out_shape=(out, out, out),
        grid=(M // MT, D // CT),
        in_specs=[
            pl.BlockSpec((MT, D), lambda i, j: (i, 0)),   # x (residual stream)
            pl.BlockSpec((1, D), lambda i, j: (0, 0)),    # ln_1.weight
            pl.BlockSpec((1, D), lambda i, j: (0, 0)),    # ln_1.bias
            wspec, wspec, wspec,                          # c_attn weight (q|k|v)
            bspec, bspec, bspec,                          # c_attn bias   (q|k|v)
        ],
        out_specs=(ospec, ospec, ospec),
        compiler_params=pltpu.CompilerParams(
            dimension_semantics=("parallel", "parallel"),
            vmem_limit_bytes=VMEM_LIMIT),
    )(x2, lnw, lnb, wq, wk, wv, bq, bk, bv)


# -------------------------- kernel 2: flash attention --------------------------

def _flash_kernel(q_ref, k_ref, v_ref, o_ref, m_sc, l_sc, acc_sc,
                  *, scale, n_head, hd, q_tile, kv_tile):
    qi = pl.program_id(1)
    ki = pl.program_id(2)

    @pl.when(ki == 0)
    def _():
        m_sc[...] = jnp.full_like(m_sc, -1e30)   # finite: masking can't make NaN
        l_sc[...] = jnp.zeros_like(l_sc)
        acc_sc[...] = jnp.zeros_like(acc_sc)

    def process(masked):
        # softmax scale applied to q (QT*D elements), not to the [QT, KT] logits
        q = (q_ref[0].astype(jnp.float32) * scale).astype(jnp.bfloat16)  # [QT, D]
        k = k_ref[0]                                                     # [KT, D]
        v = v_ref[0]
        if masked:  # only the diagonal tile builds / applies the causal mask
            rows = qi * q_tile + jax.lax.broadcasted_iota(
                jnp.int32, (q_tile, kv_tile), 0)
            cols = ki * kv_tile + jax.lax.broadcasted_iota(
                jnp.int32, (q_tile, kv_tile), 1)
            visible = rows >= cols
        # heads are static lane-slices of the token-major [rows, D] tiles; the
        # per-head matmuls are exactly what a batched head einsum lowers to.
        for h in range(n_head):
            sl = slice(h * hd, (h + 1) * hd)
            s = jax.lax.dot_general(                                   # q @ k^T
                q[:, sl], k[:, sl], (((1,), (1,)), ((), ())),
                preferred_element_type=jnp.float32)                    # [QT, KT]
            if masked:
                s = jnp.where(visible, s, -1e30)
            m_prev = m_sc[:, h:h + 1]                                  # [QT, 1]
            m_new = jnp.maximum(m_prev, jnp.max(s, axis=-1, keepdims=True))
            alpha = jnp.exp(m_prev - m_new)
            p = jnp.exp(s - m_new)                                     # f32 softmax
            l_sc[:, h:h + 1] = (alpha * l_sc[:, h:h + 1]
                                + jnp.sum(p, axis=-1, keepdims=True))
            pv = jax.lax.dot_general(                                  # p @ v
                p.astype(jnp.bfloat16), v[:, sl], (((1,), (0,)), ((), ())),
                preferred_element_type=jnp.float32)                    # [QT, hd]
            acc_sc[:, sl] = alpha * acc_sc[:, sl] + pv
            m_sc[:, h:h + 1] = m_new

    @pl.when(ki < qi)              # fully-visible tile: mask-free path
    def _():
        process(masked=False)

    @pl.when(ki == qi)             # diagonal tile: masked path
    def _():
        process(masked=True)
    # (ki > qi: nothing runs; the clamped index maps also elide the K/V DMAs)

    @pl.when(ki == pl.num_programs(2) - 1)
    def _():
        pieces = []
        for h in range(n_head):
            sl = slice(h * hd, (h + 1) * hd)
            inv = 1.0 / l_sc[:, h:h + 1]           # exact reciprocal (per-row)
            pieces.append(acc_sc[:, sl] * inv)
        # single lane-dense [QT, D] store (minor dim D, unmasked vst)
        o_ref[0] = jnp.concatenate(pieces, axis=-1).astype(o_ref.dtype)


def flash_attention(q3, k3, v3, n_head):
    B, T, D = q3.shape
    hd = D // n_head
    QT = _pick_tile(T, _SEQ_TILES)
    KT = QT
    scale = 1.0 / math.sqrt(hd)
    kernel = functools.partial(_flash_kernel, scale=scale, n_head=n_head,
                               hd=hd, q_tile=QT, kv_tile=KT)
    # K/V index maps clamp to min(ki, qi): future tiles alias the resident
    # diagonal block, so their HBM fetches are skipped entirely.
    kv_map = lambda b, qi, ki: (b, jnp.minimum(ki, qi), 0)
    return pl.pallas_call(
        kernel,
        out_shape=jax.ShapeDtypeStruct((B, T, D), jnp.bfloat16),
        grid=(B, T // QT, T // KT),
        in_specs=[
            pl.BlockSpec((1, QT, D), lambda b, qi, ki: (b, qi, 0)),
            pl.BlockSpec((1, KT, D), kv_map),
            pl.BlockSpec((1, KT, D), kv_map),
        ],
        out_specs=pl.BlockSpec((1, QT, D), lambda b, qi, ki: (b, qi, 0)),
        scratch_shapes=[
            pltpu.VMEM((QT, n_head), jnp.float32),   # running max (per head col)
            pltpu.VMEM((QT, n_head), jnp.float32),   # running denom
            pltpu.VMEM((QT, D), jnp.float32),        # running numerator
        ],
        compiler_params=pltpu.CompilerParams(
            dimension_semantics=("parallel", "parallel", "arbitrary"),
            vmem_limit_bytes=VMEM_LIMIT),
    )(q3, k3, v3)


# --------------- kernel 3: out-proj + residual + LN2 + tiled MLP ---------------

def _attn_out_mlp_kernel(x_ref, att_ref, wo_ref, bo_ref, ln2w_ref, ln2b_ref,
                         wfc_ref, bfc_ref, wfp_ref, bfp_ref, lnfw_ref, lnfb_ref,
                         out_ref, xa_sc, hln_sc, acc_sc, *, apply_final_ln):
    j = pl.program_id(1)

    @pl.when(j == 0)
    def _():
        # attention output projection + first residual, once per row tile
        y = jnp.dot(att_ref[...], wo_ref[...],
                    preferred_element_type=jnp.float32) + bo_ref[0]
        xa = x_ref[...] + y
        xa_sc[...] = xa
        hln_sc[...] = _layer_norm(xa, ln2w_ref[0], ln2b_ref[0]).astype(hln_sc.dtype)
        acc_sc[...] = jnp.zeros_like(acc_sc)

    # MLP hidden-dim (4D) reduction tile j: fc chunk -> gelu -> proj chunk
    f = jnp.dot(hln_sc[...], wfc_ref[...],
                preferred_element_type=jnp.float32) + bfc_ref[0]
    f = _new_gelu(f)                                            # f32 GELU
    acc_sc[...] += jnp.dot(f.astype(jnp.bfloat16), wfp_ref[...],
                           preferred_element_type=jnp.float32)

    @pl.when(j == pl.num_programs(1) - 1)
    def _():
        res = xa_sc[...] + acc_sc[...] + bfp_ref[0]
        if apply_final_ln:                                      # fused ln_f
            res = _layer_norm(res, lnfw_ref[0], lnfb_ref[0])
        out_ref[...] = res.astype(out_ref.dtype)


def attn_out_mlp(x2, att2, wo, bo, ln2w, ln2b, wfc, bfc, wfp, bfp,
                 lnfw, lnfb, *, apply_final_ln):
    M, D = x2.shape
    H4 = wfc.shape[1]
    MT = _pick_tile(M, _ROW_TILES)
    HT = _pick_tile(H4, _HID_TILES)
    kernel = functools.partial(_attn_out_mlp_kernel, apply_final_ln=apply_final_ln)
    return pl.pallas_call(
        kernel,
        out_shape=jax.ShapeDtypeStruct((M, D), jnp.float32),
        grid=(M // MT, H4 // HT),
        in_specs=[
            pl.BlockSpec((MT, D), lambda i, j: (i, 0)),         # x (residual)
            pl.BlockSpec((MT, D), lambda i, j: (i, 0)),         # attention output
            pl.BlockSpec((D, D), lambda i, j: (0, 0)),          # attn c_proj.weight
            pl.BlockSpec((1, D), lambda i, j: (0, 0)),          # attn c_proj.bias
            pl.BlockSpec((1, D), lambda i, j: (0, 0)),          # ln_2.weight
            pl.BlockSpec((1, D), lambda i, j: (0, 0)),          # ln_2.bias
            pl.BlockSpec((D, HT), lambda i, j: (0, j)),         # c_fc.weight tile
            pl.BlockSpec((1, HT), lambda i, j: (0, j)),         # c_fc.bias tile
            pl.BlockSpec((HT, D), lambda i, j: (j, 0)),         # mlp c_proj.weight
            pl.BlockSpec((1, D), lambda i, j: (0, 0)),          # mlp c_proj.bias
            pl.BlockSpec((1, D), lambda i, j: (0, 0)),          # ln_f.weight
            pl.BlockSpec((1, D), lambda i, j: (0, 0)),          # ln_f.bias
        ],
        out_specs=pl.BlockSpec((MT, D), lambda i, j: (i, 0)),
        scratch_shapes=[
            pltpu.VMEM((MT, D), jnp.float32),    # x + attn (residual stream)
            pltpu.VMEM((MT, D), jnp.bfloat16),   # LN2 output (matmul operand)
            pltpu.VMEM((MT, D), jnp.float32),    # MLP accumulator
        ],
        compiler_params=pltpu.CompilerParams(
            dimension_semantics=("parallel", "arbitrary"),
            vmem_limit_bytes=VMEM_LIMIT),
    )(x2, att2, wo, bo, ln2w, ln2b, wfc, bfc, wfp, bfp, lnfw, lnfb)


# ---------------------------------- model glue ---------------------------------

def run_layer(x, p, n_head, lnf_w, lnf_b, apply_final_ln):
    B, T, D = x.shape
    M = B * T
    x2 = x.reshape(M, D)

    # LN1 + qkv projection -> three token-major [M, D] bf16 arrays
    q2, k2, v2 = ln_qkv_proj(x2, p["ln1_w"], p["ln1_b"],
                             p["w_q"], p["w_k"], p["w_v"],
                             p["b_q"], p["b_k"], p["b_v"])

    # free reshapes only (no transposes, no data movement)
    att = flash_attention(q2.reshape(B, T, D), k2.reshape(B, T, D),
                          v2.reshape(B, T, D), n_head)          # [B, T, D] bf16
    att2 = att.reshape(M, D)

    out2 = attn_out_mlp(
        x2, att2, p["w_o"], p["b_o"], p["ln2_w"], p["ln2_b"],
        p["w_fc"], p["b_fc"], p["w_fp"], p["b_fp"],
        lnf_w, lnf_b, apply_final_ln=apply_final_ln)
    return out2.reshape(B, T, D)


def init_params(key, *, n_layer, n_head, n_embd, block_size):
    D = n_embd
    std = 0.02
    proj_std = 0.02 / math.sqrt(2 * n_layer)
    keys = jax.random.split(key, 1 + n_layer)
    wpe = std * jax.random.normal(keys[0], (block_size, D), jnp.float32)

    layers = []
    for l in range(n_layer):
        kq, kk, kv, k1, k2, k3 = jax.random.split(keys[1 + l], 6)
        layers.append(dict(
            ln1_w=jnp.ones((1, D), jnp.float32),
            ln1_b=jnp.zeros((1, D), jnp.float32),
            # c_attn split into q/k/v projections; Linear stored [in, out].
            w_q=(std * jax.random.normal(kq, (D, D), jnp.float32)).astype(jnp.bfloat16),
            w_k=(std * jax.random.normal(kk, (D, D), jnp.float32)).astype(jnp.bfloat16),
            w_v=(std * jax.random.normal(kv, (D, D), jnp.float32)).astype(jnp.bfloat16),
            b_q=jnp.zeros((1, D), jnp.float32),
            b_k=jnp.zeros((1, D), jnp.float32),
            b_v=jnp.zeros((1, D), jnp.float32),
            w_o=(proj_std * jax.random.normal(k1, (D, D), jnp.float32)).astype(jnp.bfloat16),
            b_o=jnp.zeros((1, D), jnp.float32),
            ln2_w=jnp.ones((1, D), jnp.float32),
            ln2_b=jnp.zeros((1, D), jnp.float32),
            w_fc=(std * jax.random.normal(k2, (D, 4 * D), jnp.float32)).astype(jnp.bfloat16),
            b_fc=jnp.zeros((1, 4 * D), jnp.float32),
            w_fp=(proj_std * jax.random.normal(k3, (4 * D, D), jnp.float32)).astype(jnp.bfloat16),
            b_fp=jnp.zeros((1, D), jnp.float32),
        ))

    ln_f_w = jnp.ones((1, D), jnp.float32)
    ln_f_b = jnp.zeros((1, D), jnp.float32)
    return wpe, layers, ln_f_w, ln_f_b


def gpt2_forward(inputs_embeds, params, n_head, rm_pos_embd=False):
    # TODO(synk): arbitrary (non-None) attn_mask is not implemented; the kernel
    # realizes the attn_mask=None / is_causal=True path of the reference.
    wpe, layers, ln_f_w, ln_f_b = params
    B, T, D = inputs_embeds.shape
    assert D % n_head == 0
    pos_emb = wpe[:T][None]                         # position_ids = arange(T)
    if rm_pos_embd:
        pos_emb = jnp.zeros_like(pos_emb)
    x = inputs_embeds + pos_emb                     # drop(p=0.0) is identity
    n_layer = len(layers)
    for li, lp in enumerate(layers):
        x = run_layer(x, lp, n_head, ln_f_w, ln_f_b,
                      apply_final_ln=(li == n_layer - 1))   # ln_f fused into last block
    return x, None


# -------------------------------------- main ------------------------------------

if __name__ == "__main__":
    # small GPT-2 style config
    n_layer, n_head, n_embd, block_size = 2, 4, 32, 16
    B, T = 2, 8

    key = jax.random.PRNGKey(0)
    k_params, k_x = jax.random.split(key)
    params = init_params(k_params, n_layer=n_layer, n_head=n_head,
                         n_embd=n_embd, block_size=block_size)
    inputs_embeds = jax.random.normal(k_x, (B, T, n_embd), jnp.float32)

    fwd = jax.jit(functools.partial(gpt2_forward, n_head=n_head))
    out, _ = fwd(inputs_embeds, params)
    out = jax.block_until_ready(out)
    assert out.shape == (B, T, n_embd)
    assert bool(jnp.all(jnp.isfinite(out)))
    print("KERNEL_OK")
</pallas_src>

<mosaic_0001>
module attributes {stable_mosaic.version = 11 : i64} {
  func.func @_ln_qkv_kernel(%arg0: i32, %arg1: i32, %arg2: memref<16x32xf32, #tpu.memory_space<vmem>>, %arg3: memref<1x32xf32, #tpu.memory_space<vmem>>, %arg4: memref<1x32xf32, #tpu.memory_space<vmem>>, %arg5: memref<32x32xbf16, #tpu.memory_space<vmem>>, %arg6: memref<32x32xbf16, #tpu.memory_space<vmem>>, %arg7: memref<32x32xbf16, #tpu.memory_space<vmem>>, %arg8: memref<1x32xf32, #tpu.memory_space<vmem>>, %arg9: memref<1x32xf32, #tpu.memory_space<vmem>>, %arg10: memref<1x32xf32, #tpu.memory_space<vmem>>, %arg11: memref<16x32xbf16, #tpu.memory_space<vmem>>, %arg12: memref<16x32xbf16, #tpu.memory_space<vmem>>, %arg13: memref<16x32xbf16, #tpu.memory_space<vmem>>) attributes {dimension_semantics = [#tpu.dimension_semantics<parallel>, #tpu.dimension_semantics<parallel>], iteration_bounds = array<i64: 1, 1>, scalar_prefetch = 0 : i64, scratch_operands = 0 : i64, tpu.core_type = #tpu.core_type<tc>, window_params = [{transform_indices = @transform_0, window_bounds = array<i64: 16, 32>}, {pipeline_mode = #tpu.pipeline_mode<synchronous>, transform_indices = @transform_1, window_bounds = array<i64: 1, 32>}, {pipeline_mode = #tpu.pipeline_mode<synchronous>, transform_indices = @transform_2, window_bounds = array<i64: 1, 32>}, {transform_indices = @transform_3, window_bounds = array<i64: 32, 32>}, {transform_indices = @transform_4, window_bounds = array<i64: 32, 32>}, {transform_indices = @transform_5, window_bounds = array<i64: 32, 32>}, {transform_indices = @transform_6, window_bounds = array<i64: 1, 32>}, {transform_indices = @transform_7, window_bounds = array<i64: 1, 32>}, {transform_indices = @transform_8, window_bounds = array<i64: 1, 32>}, {transform_indices = @transform_9, window_bounds = array<i64: 16, 32>}, {transform_indices = @transform_10, window_bounds = array<i64: 16, 32>}, {transform_indices = @transform_11, window_bounds = array<i64: 16, 32>}]} {
    %c0 = arith.constant 0 : index
    %c0_0 = arith.constant 0 : index
    %0 = vector.load %arg2[%c0, %c0_0] : memref<16x32xf32, #tpu.memory_space<vmem>>, vector<16x32xf32>
    %c0_1 = arith.constant 0 : index
    %c0_2 = arith.constant 0 : index
    %1 = vector.load %arg3[%c0_1, %c0_2] : memref<1x32xf32, #tpu.memory_space<vmem>>, vector<1x32xf32>
    %2 = vector.shape_cast %1 : vector<1x32xf32> to vector<32xf32>
    %c0_3 = arith.constant 0 : index
    %c0_4 = arith.constant 0 : index
    %3 = vector.load %arg4[%c0_3, %c0_4] : memref<1x32xf32, #tpu.memory_space<vmem>>, vector<1x32xf32>
    %4 = vector.shape_cast %3 : vector<1x32xf32> to vector<32xf32>
    %cst = arith.constant dense<0.000000e+00> : vector<16xf32>
    %5 = vector.multi_reduction <add>, %0, %cst [1] : vector<16x32xf32> to vector<16xf32>
    %6 = vector.shape_cast %5 : vector<16xf32> to vector<16x1xf32>
    %cst_5 = arith.constant 3.200000e+01 : f32
    %7 = vector.broadcast %cst_5 : f32 to vector<16x1xf32>
    %8 = arith.divf %6, %7 : vector<16x1xf32>
    %9 = vector.broadcast %8 : vector<16x1xf32> to vector<16x32xf32>
    %10 = arith.subf %0, %9 : vector<16x32xf32>
    %11 = arith.mulf %10, %10 : vector<16x32xf32>
    %cst_6 = arith.constant dense<0.000000e+00> : vector<16xf32>
    %12 = vector.multi_reduction <add>, %11, %cst_6 [1] : vector<16x32xf32> to vector<16xf32>
    %13 = vector.shape_cast %12 : vector<16xf32> to vector<16x1xf32>
    %cst_7 = arith.constant 3.200000e+01 : f32
    %14 = vector.broadcast %cst_7 : f32 to vector<16x1xf32>
    %15 = arith.divf %13, %14 : vector<16x1xf32>
    %cst_8 = arith.constant 9.99999993E-9 : f32
    %16 = vector.broadcast %cst_8 : f32 to vector<16x1xf32>
    %17 = arith.addf %15, %16 : vector<16x1xf32>
    %18 = math.rsqrt %17 : vector<16x1xf32>
    %19 = vector.broadcast %18 : vector<16x1xf32> to vector<16x32xf32>
    %20 = arith.mulf %10, %19 : vector<16x32xf32>
    %21 = vector.shape_cast %2 : vector<32xf32> to vector<1x32xf32>
    %22 = vector.broadcast %21 : vector<1x32xf32> to vector<16x32xf32>
    %23 = arith.mulf %20, %22 : vector<16x32xf32>
    %24 = vector.shape_cast %4 : vector<32xf32> to vector<1x32xf32>
    %25 = vector.broadcast %24 : vector<1x32xf32> to vector<16x32xf32>
    %26 = arith.addf %23, %25 : vector<16x32xf32>
    %27 = arith.truncf %26 : vector<16x32xf32> to vector<16x32xbf16>
    %c0_9 = arith.constant 0 : index
    %c0_10 = arith.constant 0 : index
    %28 = vector.load %arg5[%c0_9, %c0_10] : memref<32x32xbf16, #tpu.memory_space<vmem>>, vector<32x32xbf16>
    %cst_11 = arith.constant dense<0.000000e+00> : vector<16x32xf32>
    %29 = tpu.matmul %27, %28, %cst_11 {dimension_numbers = #tpu.dot_dimension_numbers<[1], [0], [0], [1], [0, 0, 1, 1], [], []>} : vector<16x32xbf16>, vector<32x32xbf16>, vector<16x32xf32> -> vector<16x32xf32>
    %c0_12 = arith.constant 0 : index
    %c0_13 = arith.constant 0 : index
    %30 = vector.load %arg8[%c0_12, %c0_13] : memref<1x32xf32, #tpu.memory_space<vmem>>, vector<1x32xf32>
    %31 = vector.shape_cast %30 : vector<1x32xf32> to vector<32xf32>
    %32 = vector.shape_cast %31 : vector<32xf32> to vector<1x32xf32>
    %33 = vector.broadcast %32 : vector<1x32xf32> to vector<16x32xf32>
    %34 = arith.addf %29, %33 : vector<16x32xf32>
    %35 = arith.truncf %34 : vector<16x32xf32> to vector<16x32xbf16>
    %c0_14 = arith.constant 0 : index
    %c0_15 = arith.constant 0 : index
    %36 = vector.load %arg11[%c0_14, %c0_15] : memref<16x32xbf16, #tpu.memory_space<vmem>>, vector<16x32xbf16>
    tpu.vector_store %arg11[%c0_14, %c0_15], %35 {strides = array<i32>} : memref<16x32xbf16, #tpu.memory_space<vmem>>, vector<16x32xbf16>,
    %c0_16 = arith.constant 0 : index
    %c0_17 = arith.constant 0 : index
    %37 = vector.load %arg6[%c0_16, %c0_17] : memref<32x32xbf16, #tpu.memory_space<vmem>>, vector<32x32xbf16>
    %cst_18 = arith.constant dense<0.000000e+00> : vector<16x32xf32>
    %38 = tpu.matmul %27, %37, %cst_18 {dimension_numbers = #tpu.dot_dimension_numbers<[1], [0], [0], [1], [0, 0, 1, 1], [], []>} : vector<16x32xbf16>, vector<32x32xbf16>, vector<16x32xf32> -> vector<16x32xf32>
    %c0_19 = arith.constant 0 : index
    %c0_20 = arith.constant 0 : index
    %39 = vector.load %arg9[%c0_19, %c0_20] : memref<1x32xf32, #tpu.memory_space<vmem>>, vector<1x32xf32>
    %40 = vector.shape_cast %39 : vector<1x32xf32> to vector<32xf32>
    %41 = vector.shape_cast %40 : vector<32xf32> to vector<1x32xf32>
    %42 = vector.broadcast %41 : vector<1x32xf32> to vector<16x32xf32>
    %43 = arith.addf %38, %42 : vector<16x32xf32>
    %44 = arith.truncf %43 : vector<16x32xf32> to vector<16x32xbf16>
    %c0_21 = arith.constant 0 : index
    %c0_22 = arith.constant 0 : index
    %45 = vector.load %arg12[%c0_21, %c0_22] : memref<16x32xbf16, #tpu.memory_space<vmem>>, vector<16x32xbf16>
    tpu.vector_store %arg12[%c0_21, %c0_22], %44 {strides = array<i32>} : memref<16x32xbf16, #tpu.memory_space<vmem>>, vector<16x32xbf16>,
    %c0_23 = arith.constant 0 : index
    %c0_24 = arith.constant 0 : index
    %46 = vector.load %arg7[%c0_23, %c0_24] : memref<32x32xbf16, #tpu.memory_space<vmem>>, vector<32x32xbf16>
    %cst_25 = arith.constant dense<0.000000e+00> : vector<16x32xf32>
    %47 = tpu.matmul %27, %46, %cst_25 {dimension_numbers = #tpu.dot_dimension_numbers<[1], [0], [0], [1], [0, 0, 1, 1], [], []>} : vector<16x32xbf16>, vector<32x32xbf16>, vector<16x32xf32> -> vector<16x32xf32>
    %c0_26 = arith.constant 0 : index
    %c0_27 = arith.constant 0 : index
    %48 = vector.load %arg10[%c0_26, %c0_27] : memref<1x32xf32, #tpu.memory_space<vmem>>, vector<1x32xf32>
    %49 = vector.shape_cast %48 : vector<1x32xf32> to vector<32xf32>
    %50 = vector.shape_cast %49 : vector<32xf32> to vector<1x32xf32>
    %51 = vector.broadcast %50 : vector<1x32xf32> to vector<16x32xf32>
    %52 = arith.addf %47, %51 : vector<16x32xf32>
    %53 = arith.truncf %52 : vector<16x32xf32> to vector<16x32xbf16>
    %c0_28 = arith.constant 0 : index
    %c0_29 = arith.constant 0 : index
    %54 = vector.load %arg13[%c0_28, %c0_29] : memref<16x32xbf16, #tpu.memory_space<vmem>>, vector<16x32xbf16>
    tpu.vector_store %arg13[%c0_28, %c0_29], %53 {strides = array<i32>} : memref<16x32xbf16, #tpu.memory_space<vmem>>, vector<16x32xbf16>,
    return
  }
  func.func @transform_0(%arg0: i32, %arg1: i32) -> (i32, i32) {
    %c0_i32 = arith.constant 0 : i32
    %c0_i32_0 = arith.constant 0 : i32
    return %arg0, %c0_i32 : i32, i32
  }
  func.func @transform_1(%arg0: i32, %arg1: i32) -> (i32, i32) {
    %c0_i32 = arith.constant 0 : i32
    %c0_i32_0 = arith.constant 0 : i32
    %c0_i32_1 = arith.constant 0 : i32
    return %c0_i32, %c0_i32_0 : i32, i32
  }
  func.func @transform_2(%arg0: i32, %arg1: i32) -> (i32, i32) {
    %c0_i32 = arith.constant 0 : i32
    %c0_i32_0 = arith.constant 0 : i32
    %c0_i32_1 = arith.constant 0 : i32
    return %c0_i32, %c0_i32_0 : i32, i32
  }
  func.func @transform_3(%arg0: i32, %arg1: i32) -> (i32, i32) {
    %c0_i32 = arith.constant 0 : i32
    %c0_i32_0 = arith.constant 0 : i32
    return %c0_i32, %arg1 : i32, i32
  }
  func.func @transform_4(%arg0: i32, %arg1: i32) -> (i32, i32) {
    %c0_i32 = arith.constant 0 : i32
    %c0_i32_0 = arith.constant 0 : i32
    return %c0_i32, %arg1 : i32, i32
  }
  func.func @transform_5(%arg0: i32, %arg1: i32) -> (i32, i32) {
    %c0_i32 = arith.constant 0 : i32
    %c0_i32_0 = arith.constant 0 : i32
    return %c0_i32, %arg1 : i32, i32
  }
  func.func @transform_6(%arg0: i32, %arg1: i32) -> (i32, i32) {
    %c0_i32 = arith.constant 0 : i32
    %c0_i32_0 = arith.constant 0 : i32
    return %c0_i32, %arg1 : i32, i32
  }
  func.func @transform_7(%arg0: i32, %arg1: i32) -> (i32, i32) {
    %c0_i32 = arith.constant 0 : i32
    %c0_i32_0 = arith.constant 0 : i32
    return %c0_i32, %arg1 : i32, i32
  }
  func.func @transform_8(%arg0: i32, %arg1: i32) -> (i32, i32) {
    %c0_i32 = arith.constant 0 : i32
    %c0_i32_0 = arith.constant 0 : i32
    return %c0_i32, %arg1 : i32, i32
  }
  func.func @transform_9(%arg0: i32, %arg1: i32) -> (i32, i32) {
    %c0_i32 = arith.constant 0 : i32
    return %arg0, %arg1 : i32, i32
  }
  func.func @transform_10(%arg0: i32, %arg1: i32) -> (i32, i32) {
    %c0_i32 = arith.constant 0 : i32
    return %arg0, %arg1 : i32, i32
  }
  func.func @transform_11(%arg0: i32, %arg1: i32) -> (i32, i32) {
    %c0_i32 = arith.constant 0 : i32
    return %arg0, %arg1 : i32, i32
  }
}

module attributes {stable_mosaic.version = 11 : i64} {
  func.func @_flash_kernel(%arg0: i32, %arg1: i32, %arg2: i32, %arg3: memref<1x8x32xbf16, #tpu.memory_space<vmem>>, %arg4: memref<1x8x32xbf16, #tpu.memory_space<vmem>>, %arg5: memref<1x8x32xbf16, #tpu.memory_space<vmem>>, %arg6: memref<1x8x32xbf16, #tpu.memory_space<vmem>>, %arg7: memref<8x4xf32, #tpu.memory_space<vmem>>, %arg8: memref<8x4xf32, #tpu.memory_space<vmem>>, %arg9: memref<8x32xf32, #tpu.memory_space<vmem>>) attributes {dimension_semantics = [#tpu.dimension_semantics<parallel>, #tpu.dimension_semantics<parallel>, #tpu.dimension_semantics<arbitrary>], iteration_bounds = array<i64: 2, 1, 1>, scalar_prefetch = 0 : i64, scratch_operands = 3 : i64, tpu.core_type = #tpu.core_type<tc>, window_params = [{transform_indices = @transform_0, window_bounds = array<i64: 1, 8, 32>}, {transform_indices = @transform_1, window_bounds = array<i64: 1, 8, 32>}, {transform_indices = @transform_2, window_bounds = array<i64: 1, 8, 32>}, {transform_indices = @transform_3, window_bounds = array<i64: 1, 8, 32>}]} {
    %c0_i32 = arith.constant 0 : i32
    %0 = arith.cmpi eq, %arg2, %c0_i32 : i32
    %1 = arith.extui %0 : i1 to i32
    %c0_i32_0 = arith.constant 0 : i32
    %2 = arith.cmpi ne, %1, %c0_i32_0 : i32
    scf.if %2 {
      %cst = arith.constant -1.000000e+30 : f32
      %12 = vector.broadcast %cst : f32 to vector<8x4xf32>
      %c0 = arith.constant 0 : index
      %c0_5 = arith.constant 0 : index
      %13 = vector.load %arg7[%c0, %c0_5] : memref<8x4xf32, #tpu.memory_space<vmem>>, vector<8x4xf32>
      tpu.vector_store %arg7[%c0, %c0_5], %12 {strides = array<i32>} : memref<8x4xf32, #tpu.memory_space<vmem>>, vector<8x4xf32>,
      %cst_6 = arith.constant 0.000000e+00 : f32
      %14 = vector.broadcast %cst_6 : f32 to vector<8x4xf32>
      %c0_7 = arith.constant 0 : index
      %c0_8 = arith.constant 0 : index
      %15 = vector.load %arg8[%c0_7, %c0_8] : memref<8x4xf32, #tpu.memory_space<vmem>>, vector<8x4xf32>
      tpu.vector_store %arg8[%c0_7, %c0_8], %14 {strides = array<i32>} : memref<8x4xf32, #tpu.memory_space<vmem>>, vector<8x4xf32>,
      %cst_9 = arith.constant 0.000000e+00 : f32
      %16 = vector.broadcast %cst_9 : f32 to vector<8x32xf32>
      %c0_10 = arith.constant 0 : index
      %c0_11 = arith.constant 0 : index
      %17 = vector.load %arg9[%c0_10, %c0_11] : memref<8x32xf32, #tpu.memory_space<vmem>>, vector<8x32xf32>
      tpu.vector_store %arg9[%c0_10, %c0_11], %16 {strides = array<i32>} : memref<8x32xf32, #tpu.memory_space<vmem>>, vector<8x32xf32>,
    } else {
    }
    %3 = arith.cmpi slt, %arg2, %arg1 : i32
    %4 = arith.extui %3 : i1 to i32
    %c0_i32_1 = arith.constant 0 : i32
    %5 = arith.cmpi ne, %4, %c0_i32_1 : i32
    scf.if %5 {
      %c0 = arith.constant 0 : index
      %c0_5 = arith.constant 0 : index
      %c0_6 = arith.constant 0 : index
      %12 = vector.load %arg3[%c0, %c0_5, %c0_6] : memref<1x8x32xbf16, #tpu.memory_space<vmem>>, vector<1x8x32xbf16>
      %13 = vector.shape_cast %12 : vector<1x8x32xbf16> to vector<8x32xbf16>
      %14 = arith.extf %13 : vector<8x32xbf16> to vector<8x32xf32>
      %cst = arith.constant 0.353553385 : f32
      %15 = vector.broadcast %cst : f32 to vector<8x32xf32>
      %16 = arith.mulf %14, %15 : vector<8x32xf32>
      %17 = arith.truncf %16 : vector<8x32xf32> to vector<8x32xbf16>
      %c0_7 = arith.constant 0 : index
      %c0_8 = arith.constant 0 : index
      %c0_9 = arith.constant 0 : index
      %18 = vector.load %arg4[%c0_7, %c0_8, %c0_9] : memref<1x8x32xbf16, #tpu.memory_space<vmem>>, vector<1x8x32xbf16>
      %19 = vector.shape_cast %18 : vector<1x8x32xbf16> to vector<8x32xbf16>
      %c0_10 = arith.constant 0 : index
      %c0_11 = arith.constant 0 : index
      %c0_12 = arith.constant 0 : index
      %20 = vector.load %arg5[%c0_10, %c0_11, %c0_12] : memref<1x8x32xbf16, #tpu.memory_space<vmem>>, vector<1x8x32xbf16>
      %21 = vector.shape_cast %20 : vector<1x8x32xbf16> to vector<8x32xbf16>
      %22 = vector.extract_strided_slice %17 {offsets = [0, 0], sizes = [8, 8], strides = [1, 1]} : vector<8x32xbf16> to vector<8x8xbf16>
      %23 = vector.extract_strided_slice %19 {offsets = [0, 0], sizes = [8, 8], strides = [1, 1]} : vector<8x32xbf16> to vector<8x8xbf16>
      %cst_13 = arith.constant dense<0.000000e+00> : vector<8x8xf32>
      %24 = tpu.matmul %22, %23, %cst_13 {dimension_numbers = #tpu.dot_dimension_numbers<[1], [1], [0], [0], [0, 0, 1, 0], [], []>} : vector<8x8xbf16>, vector<8x8xbf16>, vector<8x8xf32> -> vector<8x8xf32>
      %c0_14 = arith.constant 0 : index
      %c0_15 = arith.constant 0 : index
      %25 = vector.load %arg7[%c0_14, %c0_15] : memref<8x4xf32, #tpu.memory_space<vmem>>, vector<8x1xf32>
      %cst_16 = arith.constant dense<0xFF800000> : vector<8xf32>
      %26 = vector.multi_reduction <maximumf>, %24, %cst_16 [1] : vector<8x8xf32> to vector<8xf32>
      %27 = vector.shape_cast %26 : vector<8xf32> to vector<8x1xf32>
      %28 = arith.maximumf %25, %27 : vector<8x1xf32>
      %29 = arith.subf %25, %28 : vector<8x1xf32>
      %30 = math.exp %29 : vector<8x1xf32>
      %31 = vector.broadcast %28 : vector<8x1xf32> to vector<8x8xf32>
      %32 = arith.subf %24, %31 : vector<8x8xf32>
      %33 = math.exp %32 : vector<8x8xf32>
      %c0_17 = arith.constant 0 : index
      %c0_18 = arith.constant 0 : index
      %34 = vector.load %arg8[%c0_17, %c0_18] : memref<8x4xf32, #tpu.memory_space<vmem>>, vector<8x1xf32>
      %35 = arith.mulf %30, %34 : vector<8x1xf32>
      %cst_19 = arith.constant dense<0.000000e+00> : vector<8xf32>
      %36 = vector.multi_reduction <add>, %33, %cst_19 [1] : vector<8x8xf32> to vector<8xf32>
      %37 = vector.shape_cast %36 : vector<8xf32> to vector<8x1xf32>
      %38 = arith.addf %35, %37 : vector<8x1xf32>
      %c0_20 = arith.constant 0 : index
      %c0_21 = arith.constant 0 : index
      %39 = vector.load %arg8[%c0_20, %c0_21] : memref<8x4xf32, #tpu.memory_space<vmem>>, vector<8x1xf32>
      tpu.vector_store %arg8[%c0_20, %c0_21], %38 {strides = array<i32>} : memref<8x4xf32, #tpu.memory_space<vmem>>, vector<8x1xf32>,
      %40 = arith.truncf %33 : vector<8x8xf32> to vector<8x8xbf16>
      %41 = vector.extract_strided_slice %21 {offsets = [0, 0], sizes = [8, 8], strides = [1, 1]} : vector<8x32xbf16> to vector<8x8xbf16>
      %cst_22 = arith.constant dense<0.000000e+00> : vector<8x8xf32>
      %42 = tpu.matmul %40, %41, %cst_22 {dimension_numbers = #tpu.dot_dimension_numbers<[1], [0], [0], [1], [0, 0, 1, 1], [], []>} : vector<8x8xbf16>, vector<8x8xbf16>, vector<8x8xf32> -> vector<8x8xf32>
      %c0_23 = arith.constant 0 : index
      %c0_24 = arith.constant 0 : index
      %43 = vector.load %arg9[%c0_23, %c0_24] : memref<8x32xf32, #tpu.memory_space<vmem>>, vector<8x8xf32>
      %44 = vector.broadcast %30 : vector<8x1xf32> to vector<8x8xf32>
      %45 = arith.mulf %44, %43 : vector<8x8xf32>
      %46 = arith.addf %45, %42 : vector<8x8xf32>
      %c0_25 = arith.constant 0 : index
      %c0_26 = arith.constant 0 : index
      %47 = vector.load %arg9[%c0_25, %c0_26] : memref<8x32xf32, #tpu.memory_space<vmem>>, vector<8x8xf32>
      tpu.vector_store %arg9[%c0_25, %c0_26], %46 {strides = array<i32>} : memref<8x32xf32, #tpu.memory_space<vmem>>, vector<8x8xf32>,
      %c0_27 = arith.constant 0 : index
      %c0_28 = arith.constant 0 : index
      %48 = vector.load %arg7[%c0_27, %c0_28] : memref<8x4xf32, #tpu.memory_space<vmem>>, vector<8x1xf32>
      tpu.vector_store %arg7[%c0_27, %c0_28], %28 {strides = array<i32>} : memref<8x4xf32, #tpu.memory_space<vmem>>, vector<8x1xf32>,
      %49 = vector.extract_strided_slice %17 {offsets = [0, 8], sizes = [8, 8], strides = [1, 1]} : vector<8x32xbf16> to vector<8x8xbf16>
      %50 = vector.extract_strided_slice %19 {offsets = [0, 8], sizes = [8, 8], strides = [1, 1]} : vector<8x32xbf16> to vector<8x8xbf16>
      %cst_29 = arith.constant dense<0.000000e+00> : vector<8x8xf32>
      %51 = tpu.matmul %49, %50, %cst_29 {dimension_numbers = #tpu.dot_dimension_numbers<[1], [1], [0], [0], [0, 0, 1, 0], [], []>} : vector<8x8xbf16>, vector<8x8xbf16>, vector<8x8xf32> -> vector<8x8xf32>
      %c0_30 = arith.constant 0 : index
      %c1 = arith.constant 1 : index
      %52 = vector.load %arg7[%c0_30, %c1] : memref<8x4xf32, #tpu.memory_space<vmem>>, vector<8x1xf32>
      %cst_31 = arith.constant dense<0xFF800000> : vector<8xf32>
      %53 = vector.multi_reduction <maximumf>, %51, %cst_31 [1] : vector<8x8xf32> to vector<8xf32>
      %54 = vector.shape_cast %53 : vector<8xf32> to vector<8x1xf32>
      %55 = arith.maximumf %52, %54 : vector<8x1xf32>
      %56 = arith.subf %52, %55 : vector<8x1xf32>
      %57 = math.exp %56 : vector<8x1xf32>
      %58 = vector.broadcast %55 : vector<8x1xf32> to vector<8x8xf32>
      %59 = arith.subf %51, %58 : vector<8x8xf32>
      %60 = math.exp %59 : vector<8x8xf32>
      %c0_32 = arith.constant 0 : index
      %c1_33 = arith.constant 1 : index
      %61 = vector.load %arg8[%c0_32, %c1_33] : memref<8x4xf32, #tpu.memory_space<vmem>>, vector<8x1xf32>
      %62 = arith.mulf %57, %61 : vector<8x1xf32>
      %cst_34 = arith.constant dense<0.000000e+00> : vector<8xf32>
      %63 = vector.multi_reduction <add>, %60, %cst_34 [1] : vector<8x8xf32> to vector<8xf32>
      %64 = vector.shape_cast %63 : vector<8xf32> to vector<8x1xf32>
      %65 = arith.addf %62, %64 : vector<8x1xf32>
      %c0_35 = arith.constant 0 : index
      %c1_36 = arith.constant 1 : index
      %66 = vector.load %arg8[%c0_35, %c1_36] : memref<8x4xf32, #tpu.memory_space<vmem>>, vector<8x1xf32>
      tpu.vector_store %arg8[%c0_35, %c1_36], %65 {strides = array<i32>} : memref<8x4xf32, #tpu.memory_space<vmem>>, vector<8x1xf32>,
      %67 = arith.truncf %60 : vector<8x8xf32> to vector<8x8xbf16>
      %68 = vector.extract_strided_slice %21 {offsets = [0, 8], sizes = [8, 8], strides = [1, 1]} : vector<8x32xbf16> to vector<8x8xbf16>
      %cst_37 = arith.constant dense<0.000000e+00> : vector<8x8xf32>
      %69 = tpu.matmul %67, %68, %cst_37 {dimension_numbers = #tpu.dot_dimension_numbers<[1], [0], [0], [1], [0, 0, 1, 1], [], []>} : vector<8x8xbf16>, vector<8x8xbf16>, vector<8x8xf32> -> vector<8x8xf32>
      %c0_38 = arith.constant 0 : index
      %c8 = arith.constant 8 : index
      %70 = vector.load %arg9[%c0_38, %c8] : memref<8x32xf32, #tpu.memory_space<vmem>>, vector<8x8xf32>
      %71 = vector.broadcast %57 : vector<8x1xf32> to vector<8x8xf32>
      %72 = arith.mulf %71, %70 : vector<8x8xf32>
      %73 = arith.addf %72, %69 : vector<8x8xf32>
      %c0_39 = arith.constant 0 : index
      %c8_40 = arith.constant 8 : index
      %74 = vector.load %arg9[%c0_39, %c8_40] : memref<8x32xf32, #tpu.memory_space<vmem>>, vector<8x8xf32>
      tpu.vector_store %arg9[%c0_39, %c8_40], %73 {strides = array<i32>} : memref<8x32xf32, #tpu.memory_space<vmem>>, vector<8x8xf32>,
      %c0_41 = arith.constant 0 : index
      %c1_42 = arith.constant 1 : index
      %75 = vector.load %arg7[%c0_41, %c1_42] : memref<8x4xf32, #tpu.memory_space<vmem>>, vector<8x1xf32>
      tpu.vector_store %arg7[%c0_41, %c1_42], %55 {strides = array<i32>} : memref<8x4xf32, #tpu.memory_space<vmem>>, vector<8x1xf32>,
      %76 = vector.extract_strided_slice %17 {offsets = [0, 16], sizes = [8, 8], strides = [1, 1]} : vector<8x32xbf16> to vector<8x8xbf16>
      %77 = vector.extract_strided_slice %19 {offsets = [0, 16], sizes = [8, 8], strides = [1, 1]} : vector<8x32xbf16> to vector<8x8xbf16>
      %cst_43 = arith.constant dense<0.000000e+00> : vector<8x8xf32>
      %78 = tpu.matmul %76, %77, %cst_43 {dimension_numbers = #tpu.dot_dimension_numbers<[1], [1], [0], [0], [0, 0, 1, 0], [], []>} : vector<8x8xbf16>, vector<8x8xbf16>, vector<8x8xf32> -> vector<8x8xf32>
      %c0_44 = arith.constant 0 : index
      %c2 = arith.constant 2 : index
      %79 = vector.load %arg7[%c0_44, %c2] : memref<8x4xf32, #tpu.memory_space<vmem>>, vector<8x1xf32>
      %cst_45 = arith.constant dense<0xFF800000> : vector<8xf32>
      %80 = vector.multi_reduction <maximumf>, %78, %cst_45 [1] : vector<8x8xf32> to vector<8xf32>
      %81 = vector.shape_cast %80 : vector<8xf32> to vector<8x1xf32>
      %82 = arith.maximumf %79, %81 : vector<8x1xf32>
      %83 = arith.subf %79, %82 : vector<8x1xf32>
      %84 = math.exp %83 : vector<8x1xf32>
      %85 = vector.broadcast %82 : vector<8x1xf32> to vector<8x8xf32>
      %86 = arith.subf %78, %85 : vector<8x8xf32>
      %87 = math.exp %86 : vector<8x8xf32>
      %c0_46 = arith.constant 0 : index
      %c2_47 = arith.constant 2 : index
      %88 = vector.load %arg8[%c0_46, %c2_47] : memref<8x4xf32, #tpu.memory_space<vmem>>, vector<8x1xf32>
      %89 = arith.mulf %84, %88 : vector<8x1xf32>
      %cst_48 = arith.constant dense<0.000000e+00> : vector<8xf32>
      %90 = vector.multi_reduction <add>, %87, %cst_48 [1] : vector<8x8xf32> to vector<8xf32>
      %91 = vector.shape_cast %90 : vector<8xf32> to vector<8x1xf32>
      %92 = arith.addf %89, %91 : vector<8x1xf32>
      %c0_49 = arith.constant 0 : index
      %c2_50 = arith.constant 2 : index
      %93 = vector.load %arg8[%c0_49, %c2_50] : memref<8x4xf32, #tpu.memory_space<vmem>>, vector<8x1xf32>
      tpu.vector_store %arg8[%c0_49, %c2_50], %92 {strides = array<i32>} : memref<8x4xf32, #tpu.memory_space<vmem>>, vector<8x1xf32>,
      %94 = arith.truncf %87 : vector<8x8xf32> to vector<8x8xbf16>
      %95 = vector.extract_strided_slice %21 {offsets = [0, 16], sizes = [8, 8], strides = [1, 1]} : vector<8x32xbf16> to vector<8x8xbf16>
      %cst_51 = arith.constant dense<0.000000e+00> : vector<8x8xf32>
      %96 = tpu.matmul %94, %95, %cst_51 {dimension_numbers = #tpu.dot_dimension_numbers<[1], [0], [0], [1], [0, 0, 1, 1], [], []>} : vector<8x8xbf16>, vector<8x8xbf16>, vector<8x8xf32> -> vector<8x8xf32>
      %c0_52 = arith.constant 0 : index
      %c16 = arith.constant 16 : index
      %97 = vector.load %arg9[%c0_52, %c16] : memref<8x32xf32, #tpu.memory_space<vmem>>, vector<8x8xf32>
      %98 = vector.broadcast %84 : vector<8x1xf32> to vector<8x8xf32>
      %99 = arith.mulf %98, %97 : vector<8x8xf32>
      %100 = arith.addf %99, %96 : vector<8x8xf32>
      %c0_53 = arith.constant 0 : index
      %c16_54 = arith.constant 16 : index
      %101 = vector.load %arg9[%c0_53, %c16_54] : memref<8x32xf32, #tpu.memory_space<vmem>>, vector<8x8xf32>
      tpu.vector_store %arg9[%c0_53, %c16_54], %100 {strides = array<i32>} : memref<8x32xf32, #tpu.memory_space<vmem>>, vector<8x8xf32>,
      %c0_55 = arith.constant 0 : index
      %c2_56 = arith.constant 2 : index
      %102 = vector.load %arg7[%c0_55, %c2_56] : memref<8x4xf32, #tpu.memory_space<vmem>>, vector<8x1xf32>
      tpu.vector_store %arg7[%c0_55, %c2_56], %82 {strides = array<i32>} : memref<8x4xf32, #tpu.memory_space<vmem>>, vector<8x1xf32>,
      %103 = vector.extract_strided_slice %17 {offsets = [0, 24], sizes = [8, 8], strides = [1, 1]} : vector<8x32xbf16> to vector<8x8xbf16>
      %104 = vector.extract_strided_slice %19 {offsets = [0, 24], sizes = [8, 8], strides = [1, 1]} : vector<8x32xbf16> to vector<8x8xbf16>
      %cst_57 = arith.constant dense<0.000000e+00> : vector<8x8xf32>
      %105 = tpu.matmul %103, %104, %cst_57 {dimension_numbers = #tpu.dot_dimension_numbers<[1], [1], [0], [0], [0, 0, 1, 0], [], []>} : vector<8x8xbf16>, vector<8x8xbf16>, vector<8x8xf32> -> vector<8x8xf32>
      %c0_58 = arith.constant 0 : index
      %c3 = arith.constant 3 : index
      %106 = vector.load %arg7[%c0_58, %c3] : memref<8x4xf32, #tpu.memory_space<vmem>>, vector<8x1xf32>
      %cst_59 = arith.constant dense<0xFF800000> : vector<8xf32>
      %107 = vector.multi_reduction <maximumf>, %105, %cst_59 [1] : vector<8x8xf32> to vector<8xf32>
      %108 = vector.shape_cast %107 : vector<8xf32> to vector<8x1xf32>
      %109 = arith.maximumf %106, %108 : vector<8x1xf32>
      %110 = arith.subf %106, %109 : vector<8x1xf32>
      %111 = math.exp %110 : vector<8x1xf32>
      %112 = vector.broadcast %109 : vector<8x1xf32> to vector<8x8xf32>
      %113 = arith.subf %105, %112 : vector<8x8xf32>
      %114 = math.exp %113 : vector<8x8xf32>
      %c0_60 = arith.constant 0 : index
      %c3_61 = arith.constant 3 : index
      %115 = vector.load %arg8[%c0_60, %c3_61] : memref<8x4xf32, #tpu.memory_space<vmem>>, vector<8x1xf32>
      %116 = arith.mulf %111, %115 : vector<8x1xf32>
      %cst_62 = arith.constant dense<0.000000e+00> : vector<8xf32>
      %117 = vector.multi_reduction <add>, %114, %cst_62 [1] : vector<8x8xf32> to vector<8xf32>
      %118 = vector.shape_cast %117 : vector<8xf32> to vector<8x1xf32>
      %119 = arith.addf %116, %118 : vector<8x1xf32>
      %c0_63 = arith.constant 0 : index
      %c3_64 = arith.constant 3 : index
      %120 = vector.load %arg8[%c0_63, %c3_64] : memref<8x4xf32, #tpu.memory_space<vmem>>, vector<8x1xf32>
      tpu.vector_store %arg8[%c0_63, %c3_64], %119 {strides = array<i32>} : memref<8x4xf32, #tpu.memory_space<vmem>>, vector<8x1xf32>,
      %121 = arith.truncf %114 : vector<8x8xf32> to vector<8x8xbf16>
      %122 = vector.extract_strided_slice %21 {offsets = [0, 24], sizes = [8, 8], strides = [1, 1]} : vector<8x32xbf16> to vector<8x8xbf16>
      %cst_65 = arith.constant dense<0.000000e+00> : vector<8x8xf32>
      %123 = tpu.matmul %121, %122, %cst_65 {dimension_numbers = #tpu.dot_dimension_numbers<[1], [0], [0], [1], [0, 0, 1, 1], [], []>} : vector<8x8xbf16>, vector<8x8xbf16>, vector<8x8xf32> -> vector<8x8xf32>
      %c0_66 = arith.constant 0 : index
      %c24 = arith.constant 24 : index
      %124 = vector.load %arg9[%c0_66, %c24] : memref<8x32xf32, #tpu.memory_space<vmem>>, vector<8x8xf32>
      %125 = vector.broadcast %111 : vector<8x1xf32> to vector<8x8xf32>
      %126 = arith.mulf %125, %124 : vector<8x8xf32>
      %127 = arith.addf %126, %123 : vector<8x8xf32>
      %c0_67 = arith.constant 0 : index
      %c24_68 = arith.constant 24 : index
      %128 = vector.load %arg9[%c0_67, %c24_68] : memref<8x32xf32, #tpu.memory_space<vmem>>, vector<8x8xf32>
      tpu.vector_store %arg9[%c0_67, %c24_68], %127 {strides = array<i32>} : memref<8x32xf32, #tpu.memory_space<vmem>>, vector<8x8xf32>,
      %c0_69 = arith.constant 0 : index
      %c3_70 = arith.constant 3 : index
      %129 = vector.load %arg7[%c0_69, %c3_70] : memref<8x4xf32, #tpu.memory_space<vmem>>, vector<8x1xf32>
      tpu.vector_store %arg7[%c0_69, %c3_70], %109 {strides = array<i32>} : memref<8x4xf32, #tpu.memory_space<vmem>>, vector<8x1xf32>,
    } else {
    }
    %6 = arith.cmpi eq, %arg2, %arg1 : i32
    %7 = arith.extui %6 : i1 to i32
    %c0_i32_2 = arith.constant 0 : i32
    %8 = arith.cmpi ne, %7, %c0_i32_2 : i32
    scf.if %8 {
      %c0 = arith.constant 0 : index
      %c0_5 = arith.constant 0 : index
      %c0_6 = arith.constant 0 : index
      %12 = vector.load %arg3[%c0, %c0_5, %c0_6] : memref<1x8x32xbf16, #tpu.memory_space<vmem>>, vector<1x8x32xbf16>
      %13 = vector.shape_cast %12 : vector<1x8x32xbf16> to vector<8x32xbf16>
      %14 = arith.extf %13 : vector<8x32xbf16> to vector<8x32xf32>
      %cst = arith.constant 0.353553385 : f32
      %15 = vector.broadcast %cst : f32 to vector<8x32xf32>
      %16 = arith.mulf %14, %15 : vector<8x32xf32>
      %17 = arith.truncf %16 : vector<8x32xf32> to vector<8x32xbf16>
      %c0_7 = arith.constant 0 : index
      %c0_8 = arith.constant 0 : index
      %c0_9 = arith.constant 0 : index
      %18 = vector.load %arg4[%c0_7, %c0_8, %c0_9] : memref<1x8x32xbf16, #tpu.memory_space<vmem>>, vector<1x8x32xbf16>
      %19 = vector.shape_cast %18 : vector<1x8x32xbf16> to vector<8x32xbf16>
      %c0_10 = arith.constant 0 : index
      %c0_11 = arith.constant 0 : index
      %c0_12 = arith.constant 0 : index
      %20 = vector.load %arg5[%c0_10, %c0_11, %c0_12] : memref<1x8x32xbf16, #tpu.memory_space<vmem>>, vector<1x8x32xbf16>
      %21 = vector.shape_cast %20 : vector<1x8x32xbf16> to vector<8x32xbf16>
      %c8_i32 = arith.constant 8 : i32
      %22 = arith.muli %arg1, %c8_i32 : i32
      %23 = tpu.iota {dimensions = array<i32: 0>} : vector<8x8xi32>
      %24 = vector.broadcast %22 : i32 to vector<8x8xi32>
      %25 = arith.addi %24, %23 : vector<8x8xi32>
      %c8_i32_13 = arith.constant 8 : i32
      %26 = arith.muli %arg2, %c8_i32_13 : i32
      %27 = tpu.iota {dimensions = array<i32: 1>} : vector<8x8xi32>
      %28 = vector.broadcast %26 : i32 to vector<8x8xi32>
      %29 = arith.addi %28, %27 : vector<8x8xi32>
      %30 = arith.cmpi sge, %25, %29 : vector<8x8xi32>
      %31 = vector.extract_strided_slice %17 {offsets = [0, 0], sizes = [8, 8], strides = [1, 1]} : vector<8x32xbf16> to vector<8x8xbf16>
      %32 = vector.extract_strided_slice %19 {offsets = [0, 0], sizes = [8, 8], strides = [1, 1]} : vector<8x32xbf16> to vector<8x8xbf16>
      %cst_14 = arith.constant dense<0.000000e+00> : vector<8x8xf32>
      %33 = tpu.matmul %31, %32, %cst_14 {dimension_numbers = #tpu.dot_dimension_numbers<[1], [1], [0], [0], [0, 0, 1, 0], [], []>} : vector<8x8xbf16>, vector<8x8xbf16>, vector<8x8xf32> -> vector<8x8xf32>
      %cst_15 = arith.constant -1.000000e+30 : f32
      %34 = vector.broadcast %cst_15 : f32 to vector<8x8xf32>
      %35 = arith.select %30, %33, %34 : vector<8x8xi1>, vector<8x8xf32>
      %c0_16 = arith.constant 0 : index
      %c0_17 = arith.constant 0 : index
      %36 = vector.load %arg7[%c0_16, %c0_17] : memref<8x4xf32, #tpu.memory_space<vmem>>, vector<8x1xf32>
      %cst_18 = arith.constant dense<0xFF800000> : vector<8xf32>
      %37 = vector.multi_reduction <maximumf>, %35, %cst_18 [1] : vector<8x8xf32> to vector<8xf32>
      %38 = vector.shape_cast %37 : vector<8xf32> to vector<8x1xf32>
      %39 = arith.maximumf %36, %38 : vector<8x1xf32>
      %40 = arith.subf %36, %39 : vector<8x1xf32>
      %41 = math.exp %40 : vector<8x1xf32>
      %42 = vector.broadcast %39 : vector<8x1xf32> to vector<8x8xf32>
      %43 = arith.subf %35, %42 : vector<8x8xf32>
      %44 = math.exp %43 : vector<8x8xf32>
      %c0_19 = arith.constant 0 : index
      %c0_20 = arith.constant 0 : index
      %45 = vector.load %arg8[%c0_19, %c0_20] : memref<8x4xf32, #tpu.memory_space<vmem>>, vector<8x1xf32>
      %46 = arith.mulf %41, %45 : vector<8x1xf32>
      %cst_21 = arith.constant dense<0.000000e+00> : vector<8xf32>
      %47 = vector.multi_reduction <add>, %44, %cst_21 [1] : vector<8x8xf32> to vector<8xf32>
      %48 = vector.shape_cast %47 : vector<8xf32> to vector<8x1xf32>
      %49 = arith.addf %46, %48 : vector<8x1xf32>
      %c0_22 = arith.constant 0 : index
      %c0_23 = arith.constant 0 : index
      %50 = vector.load %arg8[%c0_22, %c0_23] : memref<8x4xf32, #tpu.memory_space<vmem>>, vector<8x1xf32>
      tpu.vector_store %arg8[%c0_22, %c0_23], %49 {strides = array<i32>} : memref<8x4xf32, #tpu.memory_space<vmem>>, vector<8x1xf32>,
      %51 = arith.truncf %44 : vector<8x8xf32> to vector<8x8xbf16>
      %52 = vector.extract_strided_slice %21 {offsets = [0, 0], sizes = [8, 8], strides = [1, 1]} : vector<8x32xbf16> to vector<8x8xbf16>
      %cst_24 = arith.constant dense<0.000000e+00> : vector<8x8xf32>
      %53 = tpu.matmul %51, %52, %cst_24 {dimension_numbers = #tpu.dot_dimension_numbers<[1], [0], [0], [1], [0, 0, 1, 1], [], []>} : vector<8x8xbf16>, vector<8x8xbf16>, vector<8x8xf32> -> vector<8x8xf32>
      %c0_25 = arith.constant 0 : index
      %c0_26 = arith.constant 0 : index
      %54 = vector.load %arg9[%c0_25, %c0_26] : memref<8x32xf32, #tpu.memory_space<vmem>>, vector<8x8xf32>
      %55 = vector.broadcast %41 : vector<8x1xf32> to vector<8x8xf32>
      %56 = arith.mulf %55, %54 : vector<8x8xf32>
      %57 = arith.addf %56, %53 : vector<8x8xf32>
      %c0_27 = arith.constant 0 : index
      %c0_28 = arith.constant 0 : index
      %58 = vector.load %arg9[%c0_27, %c0_28] : memref<8x32xf32, #tpu.memory_space<vmem>>, vector<8x8xf32>
      tpu.vector_store %arg9[%c0_27, %c0_28], %57 {strides = array<i32>} : memref<8x32xf32, #tpu.memory_space<vmem>>, vector<8x8xf32>,
      %c0_29 = arith.constant 0 : index
      %c0_30 = arith.constant 0 : index
      %59 = vector.load %arg7[%c0_29, %c0_30] : memref<8x4xf32, #tpu.memory_space<vmem>>, vector<8x1xf32>
      tpu.vector_store %arg7[%c0_29, %c0_30], %39 {strides = array<i32>} : memref<8x4xf32, #tpu.memory_space<vmem>>, vector<8x1xf32>,
      %60 = vector.extract_strided_slice %17 {offsets = [0, 8], sizes = [8, 8], strides = [1, 1]} : vector<8x32xbf16> to vector<8x8xbf16>
      %61 = vector.extract_strided_slice %19 {offsets = [0, 8], sizes = [8, 8], strides = [1, 1]} : vector<8x32xbf16> to vector<8x8xbf16>
      %cst_31 = arith.constant dense<0.000000e+00> : vector<8x8xf32>
      %62 = tpu.matmul %60, %61, %cst_31 {dimension_numbers = #tpu.dot_dimension_numbers<[1], [1], [0], [0], [0, 0, 1, 0], [], []>} : vector<8x8xbf16>, vector<8x8xbf16>, vector<8x8xf32> -> vector<8x8xf32>
      %cst_32 = arith.constant -1.000000e+30 : f32
      %63 = vector.broadcast %cst_32 : f32 to vector<8x8xf32>
      %64 = arith.select %30, %62, %63 : vector<8x8xi1>, vector<8x8xf32>
      %c0_33 = arith.constant 0 : index
      %c1 = arith.constant 1 : index
      %65 = vector.load %arg7[%c0_33, %c1] : memref<8x4xf32, #tpu.memory_space<vmem>>, vector<8x1xf32>
      %cst_34 = arith.constant dense<0xFF800000> : vector<8xf32>
      %66 = vector.multi_reduction <maximumf>, %64, %cst_34 [1] : vector<8x8xf32> to vector<8xf32>
      %67 = vector.shape_cast %66 : vector<8xf32> to vector<8x1xf32>
      %68 = arith.maximumf %65, %67 : vector<8x1xf32>
      %69 = arith.subf %65, %68 : vector<8x1xf32>
      %70 = math.exp %69 : vector<8x1xf32>
      %71 = vector.broadcast %68 : vector<8x1xf32> to vector<8x8xf32>
      %72 = arith.subf %64, %71 : vector<8x8xf32>
      %73 = math.exp %72 : vector<8x8xf32>
      %c0_35 = arith.constant 0 : index
      %c1_36 = arith.constant 1 : index
      %74 = vector.load %arg8[%c0_35, %c1_36] : memref<8x4xf32, #tpu.memory_space<vmem>>, vector<8x1xf32>
      %75 = arith.mulf %70, %74 : vector<8x1xf32>
      %cst_37 = arith.constant dense<0.000000e+00> : vector<8xf32>
      %76 = vector.multi_reduction <add>, %73, %cst_37 [1] : vector<8x8xf32> to vector<8xf32>
      %77 = vector.shape_cast %76 : vector<8xf32> to vector<8x1xf32>
      %78 = arith.addf %75, %77 : vector<8x1xf32>
      %c0_38 = arith.constant 0 : index
      %c1_39 = arith.constant 1 : index
      %79 = vector.load %arg8[%c0_38, %c1_39] : memref<8x4xf32, #tpu.memory_space<vmem>>, vector<8x1xf32>
      tpu.vector_store %arg8[%c0_38, %c1_39], %78 {strides = array<i32>} : memref<8x4xf32, #tpu.memory_space<vmem>>, vector<8x1xf32>,
      %80 = arith.truncf %73 : vector<8x8xf32> to vector<8x8xbf16>
      %81 = vector.extract_strided_slice %21 {offsets = [0, 8], sizes = [8, 8], strides = [1, 1]} : vector<8x32xbf16> to vector<8x8xbf16>
      %cst_40 = arith.constant dense<0.000000e+00> : vector<8x8xf32>
      %82 = tpu.matmul %80, %81, %cst_40 {dimension_numbers = #tpu.dot_dimension_numbers<[1], [0], [0], [1], [0, 0, 1, 1], [], []>} : vector<8x8xbf16>, vector<8x8xbf16>, vector<8x8xf32> -> vector<8x8xf32>
      %c0_41 = arith.constant 0 : index
      %c8 = arith.constant 8 : index
      %83 = vector.load %arg9[%c0_41, %c8] : memref<8x32xf32, #tpu.memory_space<vmem>>, vector<8x8xf32>
      %84 = vector.broadcast %70 : vector<8x1xf32> to vector<8x8xf32>
      %85 = arith.mulf %84, %83 : vector<8x8xf32>
      %86 = arith.addf %85, %82 : vector<8x8xf32>
      %c0_42 = arith.constant 0 : index
      %c8_43 = arith.constant 8 : index
      %87 = vector.load %arg9[%c0_42, %c8_43] : memref<8x32xf32, #tpu.memory_space<vmem>>, vector<8x8xf32>
      tpu.vector_store %arg9[%c0_42, %c8_43], %86 {strides = array<i32>} : memref<8x32xf32, #tpu.memory_space<vmem>>, vector<8x8xf32>,
      %c0_44 = arith.constant 0 : index
      %c1_45 = arith.constant 1 : index
      %88 = vector.load %arg7[%c0_44, %c1_45] : memref<8x4xf32, #tpu.memory_space<vmem>>, vector<8x1xf32>
      tpu.vector_store %arg7[%c0_44, %c1_45], %68 {strides = array<i32>} : memref<8x4xf32, #tpu.memory_space<vmem>>, vector<8x1xf32>,
      %89 = vector.extract_strided_slice %17 {offsets = [0, 16], sizes = [8, 8], strides = [1, 1]} : vector<8x32xbf16> to vector<8x8xbf16>
      %90 = vector.extract_strided_slice %19 {offsets = [0, 16], sizes = [8, 8], strides = [1, 1]} : vector<8x32xbf16> to vector<8x8xbf16>
      %cst_46 = arith.constant dense<0.000000e+00> : vector<8x8xf32>
      %91 = tpu.matmul %89, %90, %cst_46 {dimension_numbers = #tpu.dot_dimension_numbers<[1], [1], [0], [0], [0, 0, 1, 0], [], []>} : vector<8x8xbf16>, vector<8x8xbf16>, vector<8x8xf32> -> vector<8x8xf32>
      %cst_47 = arith.constant -1.000000e+30 : f32
      %92 = vector.broadcast %cst_47 : f32 to vector<8x8xf32>
      %93 = arith.select %30, %91, %92 : vector<8x8xi1>, vector<8x8xf32>
      %c0_48 = arith.constant 0 : index
      %c2 = arith.constant 2 : index
      %94 = vector.load %arg7[%c0_48, %c2] : memref<8x4xf32, #tpu.memory_space<vmem>>, vector<8x1xf32>
      %cst_49 = arith.constant dense<0xFF800000> : vector<8xf32>
      %95 = vector.multi_reduction <maximumf>, %93, %cst_49 [1] : vector<8x8xf32> to vector<8xf32>
      %96 = vector.shape_cast %95 : vector<8xf32> to vector<8x1xf32>
      %97 = arith.maximumf %94, %96 : vector<8x1xf32>
      %98 = arith.subf %94, %97 : vector<8x1xf32>
      %99 = math.exp %98 : vector<8x1xf32>
      %100 = vector.broadcast %97 : vector<8x1xf32> to vector<8x8xf32>
      %101 = arith.subf %93, %100 : vector<8x8xf32>
      %102 = math.exp %101 : vector<8x8xf32>
      %c0_50 = arith.constant 0 : index
      %c2_51 = arith.constant 2 : index
      %103 = vector.load %arg8[%c0_50, %c2_51] : memref<8x4xf32, #tpu.memory_space<vmem>>, vector<8x1xf32>
      %104 = arith.mulf %99, %103 : vector<8x1xf32>
      %cst_52 = arith.constant dense<0.000000e+00> : vector<8xf32>
      %105 = vector.multi_reduction <add>, %102, %cst_52 [1] : vector<8x8xf32> to vector<8xf32>
      %106 = vector.shape_cast %105 : vector<8xf32> to vector<8x1xf32>
      %107 = arith.addf %104, %106 : vector<8x1xf32>
      %c0_53 = arith.constant 0 : index
      %c2_54 = arith.constant 2 : index
      %108 = vector.load %arg8[%c0_53, %c2_54] : memref<8x4xf32, #tpu.memory_space<vmem>>, vector<8x1xf32>
      tpu.vector_store %arg8[%c0_53, %c2_54], %107 {strides = array<i32>} : memref<8x4xf32, #tpu.memory_space<vmem>>, vector<8x1xf32>,
      %109 = arith.truncf %102 : vector<8x8xf32> to vector<8x8xbf16>
      %110 = vector.extract_strided_slice %21 {offsets = [0, 16], sizes = [8, 8], strides = [1, 1]} : vector<8x32xbf16> to vector<8x8xbf16>
      %cst_55 = arith.constant dense<0.000000e+00> : vector<8x8xf32>
      %111 = tpu.matmul %109, %110, %cst_55 {dimension_numbers = #tpu.dot_dimension_numbers<[1], [0], [0], [1], [0, 0, 1, 1], [], []>} : vector<8x8xbf16>, vector<8x8xbf16>, vector<8x8xf32> -> vector<8x8xf32>
      %c0_56 = arith.constant 0 : index
      %c16 = arith.constant 16 : index
      %112 = vector.load %arg9[%c0_56, %c16] : memref<8x32xf32, #tpu.memory_space<vmem>>, vector<8x8xf32>
      %113 = vector.broadcast %99 : vector<8x1xf32> to vector<8x8xf32>
      %114 = arith.mulf %113, %112 : vector<8x8xf32>
      %115 = arith.addf %114, %111 : vector<8x8xf32>
      %c0_57 = arith.constant 0 : index
      %c16_58 = arith.constant 16 : index
      %116 = vector.load %arg9[%c0_57, %c16_58] : memref<8x32xf32, #tpu.memory_space<vmem>>, vector<8x8xf32>
      tpu.vector_store %arg9[%c0_57, %c16_58], %115 {strides = array<i32>} : memref<8x32xf32, #tpu.memory_space<vmem>>, vector<8x8xf32>,
      %c0_59 = arith.constant 0 : index
      %c2_60 = arith.constant 2 : index
      %117 = vector.load %arg7[%c0_59, %c2_60] : memref<8x4xf32, #tpu.memory_space<vmem>>, vector<8x1xf32>
      tpu.vector_store %arg7[%c0_59, %c2_60], %97 {strides = array<i32>} : memref<8x4xf32, #tpu.memory_space<vmem>>, vector<8x1xf32>,
      %118 = vector.extract_strided_slice %17 {offsets = [0, 24], sizes = [8, 8], strides = [1, 1]} : vector<8x32xbf16> to vector<8x8xbf16>
      %119 = vector.extract_strided_slice %19 {offsets = [0, 24], sizes = [8, 8], strides = [1, 1]} : vector<8x32xbf16> to vector<8x8xbf16>
      %cst_61 = arith.constant dense<0.000000e+00> : vector<8x8xf32>
      %120 = tpu.matmul %118, %119, %cst_61 {dimension_numbers = #tpu.dot_dimension_numbers<[1], [1], [0], [0], [0, 0, 1, 0], [], []>} : vector<8x8xbf16>, vector<8x8xbf16>, vector<8x8xf32> -> vector<8x8xf32>
      %cst_62 = arith.constant -1.000000e+30 : f32
      %121 = vector.broadcast %cst_62 : f32 to vector<8x8xf32>
      %122 = arith.select %30, %120, %121 : vector<8x8xi1>, vector<8x8xf32>
      %c0_63 = arith.constant 0 : index
      %c3 = arith.constant 3 : index
      %123 = vector.load %arg7[%c0_63, %c3] : memref<8x4xf32, #tpu.memory_space<vmem>>, vector<8x1xf32>
      %cst_64 = arith.constant dense<0xFF800000> : vector<8xf32>
      %124 = vector.multi_reduction <maximumf>, %122, %cst_64 [1] : vector<8x8xf32> to vector<8xf32>
      %125 = vector.shape_cast %124 : vector<8xf32> to vector<8x1xf32>
      %126 = arith.maximumf %123, %125 : vector<8x1xf32>
      %127 = arith.subf %123, %126 : vector<8x1xf32>
      %128 = math.exp %127 : vector<8x1xf32>
      %129 = vector.broadcast %126 : vector<8x1xf32> to vector<8x8xf32>
      %130 = arith.subf %122, %129 : vector<8x8xf32>
      %131 = math.exp %130 : vector<8x8xf32>
      %c0_65 = arith.constant 0 : index
      %c3_66 = arith.constant 3 : index
      %132 = vector.load %arg8[%c0_65, %c3_66] : memref<8x4xf32, #tpu.memory_space<vmem>>, vector<8x1xf32>
      %133 = arith.mulf %128, %132 : vector<8x1xf32>
      %cst_67 = arith.constant dense<0.000000e+00> : vector<8xf32>
      %134 = vector.multi_reduction <add>, %131, %cst_67 [1] : vector<8x8xf32> to vector<8xf32>
      %135 = vector.shape_cast %134 : vector<8xf32> to vector<8x1xf32>
      %136 = arith.addf %133, %135 : vector<8x1xf32>
      %c0_68 = arith.constant 0 : index
      %c3_69 = arith.constant 3 : index
      %137 = vector.load %arg8[%c0_68, %c3_69] : memref<8x4xf32, #tpu.memory_space<vmem>>, vector<8x1xf32>
      tpu.vector_store %arg8[%c0_68, %c3_69], %136 {strides = array<i32>} : memref<8x4xf32, #tpu.memory_space<vmem>>, vector<8x1xf32>,
      %138 = arith.truncf %131 : vector<8x8xf32> to vector<8x8xbf16>
      %139 = vector.extract_strided_slice %21 {offsets = [0, 24], sizes = [8, 8], strides = [1, 1]} : vector<8x32xbf16> to vector<8x8xbf16>
      %cst_70 = arith.constant dense<0.000000e+00> : vector<8x8xf32>
      %140 = tpu.matmul %138, %139, %cst_70 {dimension_numbers = #tpu.dot_dimension_numbers<[1], [0], [0], [1], [0, 0, 1, 1], [], []>} : vector<8x8xbf16>, vector<8x8xbf16>, vector<8x8xf32> -> vector<8x8xf32>
      %c0_71 = arith.constant 0 : index
      %c24 = arith.constant 24 : index
      %141 = vector.load %arg9[%c0_71, %c24] : memref<8x32xf32, #tpu.memory_space<vmem>>, vector<8x8xf32>
      %142 = vector.broadcast %128 : vector<8x1xf32> to vector<8x8xf32>
      %143 = arith.mulf %142, %141 : vector<8x8xf32>
      %144 = arith.addf %143, %140 : vector<8x8xf32>
      %c0_72 = arith.constant 0 : index
      %c24_73 = arith.constant 24 : index
      %145 = vector.load %arg9[%c0_72, %c24_73] : memref<8x32xf32, #tpu.memory_space<vmem>>, vector<8x8xf32>
      tpu.vector_store %arg9[%c0_72, %c24_73], %144 {strides = array<i32>} : memref<8x32xf32, #tpu.memory_space<vmem>>, vector<8x8xf32>,
      %c0_74 = arith.constant 0 : index
      %c3_75 = arith.constant 3 : index
      %146 = vector.load %arg7[%c0_74, %c3_75] : memref<8x4xf32, #tpu.memory_space<vmem>>, vector<8x1xf32>
      tpu.vector_store %arg7[%c0_74, %c3_75], %126 {strides = array<i32>} : memref<8x4xf32, #tpu.memory_space<vmem>>, vector<8x1xf32>,
    } else {
    }
    %c0_i32_3 = arith.constant 0 : i32
    %9 = arith.cmpi eq, %arg2, %c0_i32_3 : i32
    %10 = arith.extui %9 : i1 to i32
    %c0_i32_4 = arith.constant 0 : i32
    %11 = arith.cmpi ne, %10, %c0_i32_4 : i32
    scf.if %11 {
      %c0 = arith.constant 0 : index
      %c0_5 = arith.constant 0 : index
      %12 = vector.load %arg8[%c0, %c0_5] : memref<8x4xf32, #tpu.memory_space<vmem>>, vector<8x1xf32>
      %cst = arith.constant 1.000000e+00 : f32
      %13 = vector.broadcast %cst : f32 to vector<8x1xf32>
      %14 = arith.divf %13, %12 : vector<8x1xf32>
      %c0_6 = arith.constant 0 : index
      %c0_7 = arith.constant 0 : index
      %15 = vector.load %arg9[%c0_6, %c0_7] : memref<8x32xf32, #tpu.memory_space<vmem>>, vector<8x8xf32>
      %16 = vector.broadcast %14 : vector<8x1xf32> to vector<8x8xf32>
      %17 = arith.mulf %15, %16 : vector<8x8xf32>
      %c0_8 = arith.constant 0 : index
      %c1 = arith.constant 1 : index
      %18 = vector.load %arg8[%c0_8, %c1] : memref<8x4xf32, #tpu.memory_space<vmem>>, vector<8x1xf32>
      %cst_9 = arith.constant 1.000000e+00 : f32
      %19 = vector.broadcast %cst_9 : f32 to vector<8x1xf32>
      %20 = arith.divf %19, %18 : vector<8x1xf32>
      %c0_10 = arith.constant 0 : index
      %c8 = arith.constant 8 : index
      %21 = vector.load %arg9[%c0_10, %c8] : memref<8x32xf32, #tpu.memory_space<vmem>>, vector<8x8xf32>
      %22 = vector.broadcast %20 : vector<8x1xf32> to vector<8x8xf32>
      %23 = arith.mulf %21, %22 : vector<8x8xf32>
      %c0_11 = arith.constant 0 : index
      %c2 = arith.constant 2 : index
      %24 = vector.load %arg8[%c0_11, %c2] : memref<8x4xf32, #tpu.memory_space<vmem>>, vector<8x1xf32>
      %cst_12 = arith.constant 1.000000e+00 : f32
      %25 = vector.broadcast %cst_12 : f32 to vector<8x1xf32>
      %26 = arith.divf %25, %24 : vector<8x1xf32>
      %c0_13 = arith.constant 0 : index
      %c16 = arith.constant 16 : index
      %27 = vector.load %arg9[%c0_13, %c16] : memref<8x32xf32, #tpu.memory_space<vmem>>, vector<8x8xf32>
      %28 = vector.broadcast %26 : vector<8x1xf32> to vector<8x8xf32>
      %29 = arith.mulf %27, %28 : vector<8x8xf32>
      %c0_14 = arith.constant 0 : index
      %c3 = arith.constant 3 : index
      %30 = vector.load %arg8[%c0_14, %c3] : memref<8x4xf32, #tpu.memory_space<vmem>>, vector<8x1xf32>
      %cst_15 = arith.constant 1.000000e+00 : f32
      %31 = vector.broadcast %cst_15 : f32 to vector<8x1xf32>
      %32 = arith.divf %31, %30 : vector<8x1xf32>
      %c0_16 = arith.constant 0 : index
      %c24 = arith.constant 24 : index
      %33 = vector.load %arg9[%c0_16, %c24] : memref<8x32xf32, #tpu.memory_space<vmem>>, vector<8x8xf32>
      %34 = vector.broadcast %32 : vector<8x1xf32> to vector<8x8xf32>
      %35 = arith.mulf %33, %34 : vector<8x8xf32>
      %36 = tpu.concatenate %17, %23, %29, %35 in 1 : vector<8x8xf32>, vector<8x8xf32>, vector<8x8xf32>, vector<8x8xf32> -> vector<8x32xf32>
      %37 = arith.truncf %36 : vector<8x32xf32> to vector<8x32xbf16>
      %c0_17 = arith.constant 0 : index
      %c0_18 = arith.constant 0 : index
      %c0_19 = arith.constant 0 : index
      %38 = vector.load %arg6[%c0_17, %c0_18, %c0_19] : memref<1x8x32xbf16, #tpu.memory_space<vmem>>, vector<1x8x32xbf16>
      %39 = vector.shape_cast %38 : vector<1x8x32xbf16> to vector<8x32xbf16>
      %40 = vector.shape_cast %37 : vector<8x32xbf16> to vector<1x8x32xbf16>
      tpu.vector_store %arg6[%c0_17, %c0_18, %c0_19], %40 {strides = array<i32>} : memref<1x8x32xbf16, #tpu.memory_space<vmem>>, vector<1x8x32xbf16>,
    } else {
    }
    return
  }
  func.func @transform_0(%arg0: i32, %arg1: i32, %arg2: i32) -> (i32, i32, i32) {
    %c0_i32 = arith.constant 0 : i32
    %c0_i32_0 = arith.constant 0 : i32
    return %arg0, %arg1, %c0_i32 : i32, i32, i32
  }
  func.func @transform_1(%arg0: i32, %arg1: i32, %arg2: i32) -> (i32, i32, i32) {
    %0 = arith.minsi %arg2, %arg1 : i32
    %c0_i32 = arith.constant 0 : i32
    %c0_i32_0 = arith.constant 0 : i32
    return %arg0, %0, %c0_i32 : i32, i32, i32
  }
  func.func @transform_2(%arg0: i32, %arg1: i32, %arg2: i32) -> (i32, i32, i32) {
    %0 = arith.minsi %arg2, %arg1 : i32
    %c0_i32 = arith.constant 0 : i32
    %c0_i32_0 = arith.constant 0 : i32
    return %arg0, %0, %c0_i32 : i32, i32, i32
  }
  func.func @transform_3(%arg0: i32, %arg1: i32, %arg2: i32) -> (i32, i32, i32) {
    %c0_i32 = arith.constant 0 : i32
    %c0_i32_0 = arith.constant 0 : i32
    return %arg0, %arg1, %c0_i32 : i32, i32, i32
  }
}

module attributes {stable_mosaic.version = 11 : i64} {
  func.func @_attn_out_mlp_kernel(%arg0: i32, %arg1: i32, %arg2: memref<16x32xf32, #tpu.memory_space<vmem>>, %arg3: memref<16x32xbf16, #tpu.memory_space<vmem>>, %arg4: memref<32x32xbf16, #tpu.memory_space<vmem>>, %arg5: memref<1x32xf32, #tpu.memory_space<vmem>>, %arg6: memref<1x32xf32, #tpu.memory_space<vmem>>, %arg7: memref<1x32xf32, #tpu.memory_space<vmem>>, %arg8: memref<32x128xbf16, #tpu.memory_space<vmem>>, %arg9: memref<1x128xf32, #tpu.memory_space<vmem>>, %arg10: memref<128x32xbf16, #tpu.memory_space<vmem>>, %arg11: memref<1x32xf32, #tpu.memory_space<vmem>>, %arg12: memref<1x32xf32, #tpu.memory_space<vmem>>, %arg13: memref<1x32xf32, #tpu.memory_space<vmem>>, %arg14: memref<16x32xf32, #tpu.memory_space<vmem>>, %arg15: memref<16x32xf32, #tpu.memory_space<vmem>>, %arg16: memref<16x32xbf16, #tpu.memory_space<vmem>>, %arg17: memref<16x32xf32, #tpu.memory_space<vmem>>) attributes {dimension_semantics = [#tpu.dimension_semantics<parallel>, #tpu.dimension_semantics<arbitrary>], iteration_bounds = array<i64: 1, 1>, scalar_prefetch = 0 : i64, scratch_operands = 3 : i64, tpu.core_type = #tpu.core_type<tc>, window_params = [{transform_indices = @transform_0, window_bounds = array<i64: 16, 32>}, {transform_indices = @transform_1, window_bounds = array<i64: 16, 32>}, {pipeline_mode = #tpu.pipeline_mode<synchronous>, transform_indices = @transform_2, window_bounds = array<i64: 32, 32>}, {pipeline_mode = #tpu.pipeline_mode<synchronous>, transform_indices = @transform_3, window_bounds = array<i64: 1, 32>}, {pipeline_mode = #tpu.pipeline_mode<synchronous>, transform_indices = @transform_4, window_bounds = array<i64: 1, 32>}, {pipeline_mode = #tpu.pipeline_mode<synchronous>, transform_indices = @transform_5, window_bounds = array<i64: 1, 32>}, {transform_indices = @transform_6, window_bounds = array<i64: 32, 128>}, {transform_indices = @transform_7, window_bounds = array<i64: 1, 128>}, {transform_indices = @transform_8, window_bounds = array<i64: 128, 32>}, {pipeline_mode = #tpu.pipeline_mode<synchronous>, transform_indices = @transform_9, window_bounds = array<i64: 1, 32>}, {pipeline_mode = #tpu.pipeline_mode<synchronous>, transform_indices = @transform_10, window_bounds = array<i64: 1, 32>}, {pipeline_mode = #tpu.pipeline_mode<synchronous>, transform_indices = @transform_11, window_bounds = array<i64: 1, 32>}, {transform_indices = @transform_12, window_bounds = array<i64: 16, 32>}]} {
    %c0_i32 = arith.constant 0 : i32
    %0 = arith.cmpi eq, %arg1, %c0_i32 : i32
    %1 = arith.extui %0 : i1 to i32
    %c0_i32_0 = arith.constant 0 : i32
    %2 = arith.cmpi ne, %1, %c0_i32_0 : i32
    scf.if %2 {
      %c0_19 = arith.constant 0 : index
      %c0_20 = arith.constant 0 : index
      %33 = vector.load %arg3[%c0_19, %c0_20] : memref<16x32xbf16, #tpu.memory_space<vmem>>, vector<16x32xbf16>
      %c0_21 = arith.constant 0 : index
      %c0_22 = arith.constant 0 : index
      %34 = vector.load %arg4[%c0_21, %c0_22] : memref<32x32xbf16, #tpu.memory_space<vmem>>, vector<32x32xbf16>
      %cst_23 = arith.constant dense<0.000000e+00> : vector<16x32xf32>
      %35 = tpu.matmul %33, %34, %cst_23 {dimension_numbers = #tpu.dot_dimension_numbers<[1], [0], [0], [1], [0, 0, 1, 1], [], []>} : vector<16x32xbf16>, vector<32x32xbf16>, vector<16x32xf32> -> vector<16x32xf32>
      %c0_24 = arith.constant 0 : index
      %c0_25 = arith.constant 0 : index
      %36 = vector.load %arg5[%c0_24, %c0_25] : memref<1x32xf32, #tpu.memory_space<vmem>>, vector<1x32xf32>
      %37 = vector.shape_cast %36 : vector<1x32xf32> to vector<32xf32>
      %38 = vector.shape_cast %37 : vector<32xf32> to vector<1x32xf32>
      %39 = vector.broadcast %38 : vector<1x32xf32> to vector<16x32xf32>
      %40 = arith.addf %35, %39 : vector<16x32xf32>
      %c0_26 = arith.constant 0 : index
      %c0_27 = arith.constant 0 : index
      %41 = vector.load %arg2[%c0_26, %c0_27] : memref<16x32xf32, #tpu.memory_space<vmem>>, vector<16x32xf32>
      %42 = arith.addf %41, %40 : vector<16x32xf32>
      %c0_28 = arith.constant 0 : index
      %c0_29 = arith.constant 0 : index
      %43 = vector.load %arg15[%c0_28, %c0_29] : memref<16x32xf32, #tpu.memory_space<vmem>>, vector<16x32xf32>
      tpu.vector_store %arg15[%c0_28, %c0_29], %42 {strides = array<i32>} : memref<16x32xf32, #tpu.memory_space<vmem>>, vector<16x32xf32>,
      %c0_30 = arith.constant 0 : index
      %c0_31 = arith.constant 0 : index
      %44 = vector.load %arg6[%c0_30, %c0_31] : memref<1x32xf32, #tpu.memory_space<vmem>>, vector<1x32xf32>
      %45 = vector.shape_cast %44 : vector<1x32xf32> to vector<32xf32>
      %c0_32 = arith.constant 0 : index
      %c0_33 = arith.constant 0 : index
      %46 = vector.load %arg7[%c0_32, %c0_33] : memref<1x32xf32, #tpu.memory_space<vmem>>, vector<1x32xf32>
      %47 = vector.shape_cast %46 : vector<1x32xf32> to vector<32xf32>
      %cst_34 = arith.constant dense<0.000000e+00> : vector<16xf32>
      %48 = vector.multi_reduction <add>, %42, %cst_34 [1] : vector<16x32xf32> to vector<16xf32>
      %49 = vector.shape_cast %48 : vector<16xf32> to vector<16x1xf32>
      %cst_35 = arith.constant 3.200000e+01 : f32
      %50 = vector.broadcast %cst_35 : f32 to vector<16x1xf32>
      %51 = arith.divf %49, %50 : vector<16x1xf32>
      %52 = vector.broadcast %51 : vector<16x1xf32> to vector<16x32xf32>
      %53 = arith.subf %42, %52 : vector<16x32xf32>
      %54 = arith.mulf %53, %53 : vector<16x32xf32>
      %cst_36 = arith.constant dense<0.000000e+00> : vector<16xf32>
      %55 = vector.multi_reduction <add>, %54, %cst_36 [1] : vector<16x32xf32> to vector<16xf32>
      %56 = vector.shape_cast %55 : vector<16xf32> to vector<16x1xf32>
      %cst_37 = arith.constant 3.200000e+01 : f32
      %57 = vector.broadcast %cst_37 : f32 to vector<16x1xf32>
      %58 = arith.divf %56, %57 : vector<16x1xf32>
      %cst_38 = arith.constant 9.99999993E-9 : f32
      %59 = vector.broadcast %cst_38 : f32 to vector<16x1xf32>
      %60 = arith.addf %58, %59 : vector<16x1xf32>
      %61 = math.rsqrt %60 : vector<16x1xf32>
      %62 = vector.broadcast %61 : vector<16x1xf32> to vector<16x32xf32>
      %63 = arith.mulf %53, %62 : vector<16x32xf32>
      %64 = vector.shape_cast %45 : vector<32xf32> to vector<1x32xf32>
      %65 = vector.broadcast %64 : vector<1x32xf32> to vector<16x32xf32>
      %66 = arith.mulf %63, %65 : vector<16x32xf32>
      %67 = vector.shape_cast %47 : vector<32xf32> to vector<1x32xf32>
      %68 = vector.broadcast %67 : vector<1x32xf32> to vector<16x32xf32>
      %69 = arith.addf %66, %68 : vector<16x32xf32>
      %70 = arith.truncf %69 : vector<16x32xf32> to vector<16x32xbf16>
      %c0_39 = arith.constant 0 : index
      %c0_40 = arith.constant 0 : index
      %71 = vector.load %arg16[%c0_39, %c0_40] : memref<16x32xbf16, #tpu.memory_space<vmem>>, vector<16x32xbf16>
      tpu.vector_store %arg16[%c0_39, %c0_40], %70 {strides = array<i32>} : memref<16x32xbf16, #tpu.memory_space<vmem>>, vector<16x32xbf16>,
      %cst_41 = arith.constant 0.000000e+00 : f32
      %72 = vector.broadcast %cst_41 : f32 to vector<16x32xf32>
      %c0_42 = arith.constant 0 : index
      %c0_43 = arith.constant 0 : index
      %73 = vector.load %arg17[%c0_42, %c0_43] : memref<16x32xf32, #tpu.memory_space<vmem>>, vector<16x32xf32>
      tpu.vector_store %arg17[%c0_42, %c0_43], %72 {strides = array<i32>} : memref<16x32xf32, #tpu.memory_space<vmem>>, vector<16x32xf32>,
    } else {
    }
    %c0 = arith.constant 0 : index
    %c0_1 = arith.constant 0 : index
    %3 = vector.load %arg16[%c0, %c0_1] : memref<16x32xbf16, #tpu.memory_space<vmem>>, vector<16x32xbf16>
    %c0_2 = arith.constant 0 : index
    %c0_3 = arith.constant 0 : index
    %4 = vector.load %arg8[%c0_2, %c0_3] : memref<32x128xbf16, #tpu.memory_space<vmem>>, vector<32x128xbf16>
    %cst = arith.constant dense<0.000000e+00> : vector<16x128xf32>
    %5 = tpu.matmul %3, %4, %cst {dimension_numbers = #tpu.dot_dimension_numbers<[1], [0], [0], [1], [0, 0, 1, 1], [], []>} : vector<16x32xbf16>, vector<32x128xbf16>, vector<16x128xf32> -> vector<16x128xf32>
    %c0_4 = arith.constant 0 : index
    %c0_5 = arith.constant 0 : index
    %6 = vector.load %arg9[%c0_4, %c0_5] : memref<1x128xf32, #tpu.memory_space<vmem>>, vector<1x128xf32>
    %7 = vector.shape_cast %6 : vector<1x128xf32> to vector<128xf32>
    %8 = vector.shape_cast %7 : vector<128xf32> to vector<1x128xf32>
    %9 = vector.broadcast %8 : vector<1x128xf32> to vector<16x128xf32>
    %10 = arith.addf %5, %9 : vector<16x128xf32>
    %cst_6 = arith.constant 5.000000e-01 : f32
    %11 = vector.broadcast %cst_6 : f32 to vector<16x128xf32>
    %12 = arith.mulf %11, %10 : vector<16x128xf32>
    %cst_7 = arith.constant 4.471500e-02 : f32
    %13 = vector.broadcast %cst_7 : f32 to vector<16x128xf32>
    %14 = arith.mulf %13, %10 : vector<16x128xf32>
    %15 = arith.mulf %14, %10 : vector<16x128xf32>
    %16 = arith.mulf %15, %10 : vector<16x128xf32>
    %17 = arith.addf %10, %16 : vector<16x128xf32>
    %cst_8 = arith.constant 0.797884583 : f32
    %18 = vector.broadcast %cst_8 : f32 to vector<16x128xf32>
    %19 = arith.mulf %18, %17 : vector<16x128xf32>
    %20 = math.tanh %19 : vector<16x128xf32>
    %cst_9 = arith.constant 1.000000e+00 : f32
    %21 = vector.broadcast %cst_9 : f32 to vector<16x128xf32>
    %22 = arith.addf %21, %20 : vector<16x128xf32>
    %23 = arith.mulf %12, %22 : vector<16x128xf32>
    %c0_10 = arith.constant 0 : index
    %c0_11 = arith.constant 0 : index
    %24 = vector.load %arg17[%c0_10, %c0_11] : memref<16x32xf32, #tpu.memory_space<vmem>>, vector<16x32xf32>
    %25 = arith.truncf %23 : vector<16x128xf32> to vector<16x128xbf16>
    %c0_12 = arith.constant 0 : index
    %c0_13 = arith.constant 0 : index
    %26 = vector.load %arg10[%c0_12, %c0_13] : memref<128x32xbf16, #tpu.memory_space<vmem>>, vector<128x32xbf16>
    %cst_14 = arith.constant dense<0.000000e+00> : vector<16x32xf32>
    %27 = tpu.matmul %25, %26, %cst_14 {dimension_numbers = #tpu.dot_dimension_numbers<[1], [0], [0], [1], [0, 0, 1, 1], [], []>} : vector<16x128xbf16>, vector<128x32xbf16>, vector<16x32xf32> -> vector<16x32xf32>
    %28 = arith.addf %24, %27 : vector<16x32xf32>
    %c0_15 = arith.constant 0 : index
    %c0_16 = arith.constant 0 : index
    %29 = vector.load %arg17[%c0_15, %c0_16] : memref<16x32xf32, #tpu.memory_space<vmem>>, vector<16x32xf32>
    tpu.vector_store %arg17[%c0_15, %c0_16], %28 {strides = array<i32>} : memref<16x32xf32, #tpu.memory_space<vmem>>, vector<16x32xf32>,
    %c0_i32_17 = arith.constant 0 : i32
    %30 = arith.cmpi eq, %arg1, %c0_i32_17 : i32
    %31 = arith.extui %30 : i1 to i32
    %c0_i32_18 = arith.constant 0 : i32
    %32 = arith.cmpi ne, %31, %c0_i32_18 : i32
    scf.if %32 {
      %c0_19 = arith.constant 0 : index
      %c0_20 = arith.constant 0 : index
      %33 = vector.load %arg15[%c0_19, %c0_20] : memref<16x32xf32, #tpu.memory_space<vmem>>, vector<16x32xf32>
      %c0_21 = arith.constant 0 : index
      %c0_22 = arith.constant 0 : index
      %34 = vector.load %arg17[%c0_21, %c0_22] : memref<16x32xf32, #tpu.memory_space<vmem>>, vector<16x32xf32>
      %35 = arith.addf %33, %34 : vector<16x32xf32>
      %c0_23 = arith.constant 0 : index
      %c0_24 = arith.constant 0 : index
      %36 = vector.load %arg11[%c0_23, %c0_24] : memref<1x32xf32, #tpu.memory_space<vmem>>, vector<1x32xf32>
      %37 = vector.shape_cast %36 : vector<1x32xf32> to vector<32xf32>
      %38 = vector.shape_cast %37 : vector<32xf32> to vector<1x32xf32>
      %39 = vector.broadcast %38 : vector<1x32xf32> to vector<16x32xf32>
      %40 = arith.addf %35, %39 : vector<16x32xf32>
      %c0_25 = arith.constant 0 : index
      %c0_26 = arith.constant 0 : index
      %41 = vector.load %arg12[%c0_25, %c0_26] : memref<1x32xf32, #tpu.memory_space<vmem>>, vector<1x32xf32>
      %42 = vector.shape_cast %41 : vector<1x32xf32> to vector<32xf32>
      %c0_27 = arith.constant 0 : index
      %c0_28 = arith.constant 0 : index
      %43 = vector.load %arg13[%c0_27, %c0_28] : memref<1x32xf32, #tpu.memory_space<vmem>>, vector<1x32xf32>
      %44 = vector.shape_cast %43 : vector<1x32xf32> to vector<32xf32>
      %cst_29 = arith.constant dense<0.000000e+00> : vector<16xf32>
      %45 = vector.multi_reduction <add>, %40, %cst_29 [1] : vector<16x32xf32> to vector<16xf32>
      %46 = vector.shape_cast %45 : vector<16xf32> to vector<16x1xf32>
      %cst_30 = arith.constant 3.200000e+01 : f32
      %47 = vector.broadcast %cst_30 : f32 to vector<16x1xf32>
      %48 = arith.divf %46, %47 : vector<16x1xf32>
      %49 = vector.broadcast %48 : vector<16x1xf32> to vector<16x32xf32>
      %50 = arith.subf %40, %49 : vector<16x32xf32>
      %51 = arith.mulf %50, %50 : vector<16x32xf32>
      %cst_31 = arith.constant dense<0.000000e+00> : vector<16xf32>
      %52 = vector.multi_reduction <add>, %51, %cst_31 [1] : vector<16x32xf32> to vector<16xf32>
      %53 = vector.shape_cast %52 : vector<16xf32> to vector<16x1xf32>
      %cst_32 = arith.constant 3.200000e+01 : f32
      %54 = vector.broadcast %cst_32 : f32 to vector<16x1xf32>
      %55 = arith.divf %53, %54 : vector<16x1xf32>
      %cst_33 = arith.constant 9.99999993E-9 : f32
      %56 = vector.broadcast %cst_33 : f32 to vector<16x1xf32>
      %57 = arith.addf %55, %56 : vector<16x1xf32>
      %58 = math.rsqrt %57 : vector<16x1xf32>
      %59 = vector.broadcast %58 : vector<16x1xf32> to vector<16x32xf32>
      %60 = arith.mulf %50, %59 : vector<16x32xf32>
      %61 = vector.shape_cast %42 : vector<32xf32> to vector<1x32xf32>
      %62 = vector.broadcast %61 : vector<1x32xf32> to vector<16x32xf32>
      %63 = arith.mulf %60, %62 : vector<16x32xf32>
      %64 = vector.shape_cast %44 : vector<32xf32> to vector<1x32xf32>
      %65 = vector.broadcast %64 : vector<1x32xf32> to vector<16x32xf32>
      %66 = arith.addf %63, %65 : vector<16x32xf32>
      %c0_34 = arith.constant 0 : index
      %c0_35 = arith.constant 0 : index
      %67 = vector.load %arg14[%c0_34, %c0_35] : memref<16x32xf32, #tpu.memory_space<vmem>>, vector<16x32xf32>
      tpu.vector_store %arg14[%c0_34, %c0_35], %66 {strides = array<i32>} : memref<16x32xf32, #tpu.memory_space<vmem>>, vector<16x32xf32>,
    } else {
    }
    return
  }
  func.func @transform_0(%arg0: i32, %arg1: i32) -> (i32, i32) {
    %c0_i32 = arith.constant 0 : i32
    %c0_i32_0 = arith.constant 0 : i32
    return %arg0, %c0_i32 : i32, i32
  }
  func.func @transform_1(%arg0: i32, %arg1: i32) -> (i32, i32) {
    %c0_i32 = arith.constant 0 : i32
    %c0_i32_0 = arith.constant 0 : i32
    return %arg0, %c0_i32 : i32, i32
  }
  func.func @transform_2(%arg0: i32, %arg1: i32) -> (i32, i32) {
    %c0_i32 = arith.constant 0 : i32
    %c0_i32_0 = arith.constant 0 : i32
    %c0_i32_1 = arith.constant 0 : i32
    return %c0_i32, %c0_i32_0 : i32, i32
  }
  func.func @transform_3(%arg0: i32, %arg1: i32) -> (i32, i32) {
    %c0_i32 = arith.constant 0 : i32
    %c0_i32_0 = arith.constant 0 : i32
    %c0_i32_1 = arith.constant 0 : i32
    return %c0_i32, %c0_i32_0 : i32, i32
  }
  func.func @transform_4(%arg0: i32, %arg1: i32) -> (i32, i32) {
    %c0_i32 = arith.constant 0 : i32
    %c0_i32_0 = arith.constant 0 : i32
    %c0_i32_1 = arith.constant 0 : i32
    return %c0_i32, %c0_i32_0 : i32, i32
  }
  func.func @transform_5(%arg0: i32, %arg1: i32) -> (i32, i32) {
    %c0_i32 = arith.constant 0 : i32
    %c0_i32_0 = arith.constant 0 : i32
    %c0_i32_1 = arith.constant 0 : i32
    return %c0_i32, %c0_i32_0 : i32, i32
  }
  func.func @transform_6(%arg0: i32, %arg1: i32) -> (i32, i32) {
    %c0_i32 = arith.constant 0 : i32
    %c0_i32_0 = arith.constant 0 : i32
    return %c0_i32, %arg1 : i32, i32
  }
  func.func @transform_7(%arg0: i32, %arg1: i32) -> (i32, i32) {
    %c0_i32 = arith.constant 0 : i32
    %c0_i32_0 = arith.constant 0 : i32
    return %c0_i32, %arg1 : i32, i32
  }
  func.func @transform_8(%arg0: i32, %arg1: i32) -> (i32, i32) {
    %c0_i32 = arith.constant 0 : i32
    %c0_i32_0 = arith.constant 0 : i32
    return %arg1, %c0_i32 : i32, i32
  }
  func.func @transform_9(%arg0: i32, %arg1: i32) -> (i32, i32) {
    %c0_i32 = arith.constant 0 : i32
    %c0_i32_0 = arith.constant 0 : i32
    %c0_i32_1 = arith.constant 0 : i32
    return %c0_i32, %c0_i32_0 : i32, i32
  }
  func.func @transform_10(%arg0: i32, %arg1: i32) -> (i32, i32) {
    %c0_i32 = arith.constant 0 : i32
    %c0_i32_0 = arith.constant 0 : i32
    %c0_i32_1 = arith.constant 0 : i32
    return %c0_i32, %c0_i32_0 : i32, i32
  }
  func.func @transform_11(%arg0: i32, %arg1: i32) -> (i32, i32) {
    %c0_i32 = arith.constant 0 : i32
    %c0_i32_0 = arith.constant 0 : i32
    %c0_i32_1 = arith.constant 0 : i32
    return %c0_i32, %c0_i32_0 : i32, i32
  }
  func.func @transform_12(%arg0: i32, %arg1: i32) -> (i32, i32) {
    %c0_i32 = arith.constant 0 : i32
    %c0_i32_0 = arith.constant 0 : i32
    return %arg0, %c0_i32 : i32, i32
  }
}

module attributes {stable_mosaic.version = 11 : i64} {
  func.func @_attn_out_mlp_kernel(%arg0: i32, %arg1: i32, %arg2: memref<16x32xf32, #tpu.memory_space<vmem>>, %arg3: memref<16x32xbf16, #tpu.memory_space<vmem>>, %arg4: memref<32x32xbf16, #tpu.memory_space<vmem>>, %arg5: memref<1x32xf32, #tpu.memory_space<vmem>>, %arg6: memref<1x32xf32, #tpu.memory_space<vmem>>, %arg7: memref<1x32xf32, #tpu.memory_space<vmem>>, %arg8: memref<32x128xbf16, #tpu.memory_space<vmem>>, %arg9: memref<1x128xf32, #tpu.memory_space<vmem>>, %arg10: memref<128x32xbf16, #tpu.memory_space<vmem>>, %arg11: memref<1x32xf32, #tpu.memory_space<vmem>>, %arg12: memref<1x32xf32, #tpu.memory_space<vmem>>, %arg13: memref<1x32xf32, #tpu.memory_space<vmem>>, %arg14: memref<16x32xf32, #tpu.memory_space<vmem>>, %arg15: memref<16x32xf32, #tpu.memory_space<vmem>>, %arg16: memref<16x32xbf16, #tpu.memory_space<vmem>>, %arg17: memref<16x32xf32, #tpu.memory_space<vmem>>) attributes {dimension_semantics = [#tpu.dimension_semantics<parallel>, #tpu.dimension_semantics<arbitrary>], iteration_bounds = array<i64: 1, 1>, scalar_prefetch = 0 : i64, scratch_operands = 3 : i64, tpu.core_type = #tpu.core_type<tc>, window_params = [{transform_indices = @transform_0, window_bounds = array<i64: 16, 32>}, {transform_indices = @transform_1, window_bounds = array<i64: 16, 32>}, {pipeline_mode = #tpu.pipeline_mode<synchronous>, transform_indices = @transform_2, window_bounds = array<i64: 32, 32>}, {pipeline_mode = #tpu.pipeline_mode<synchronous>, transform_indices = @transform_3, window_bounds = array<i64: 1, 32>}, {pipeline_mode = #tpu.pipeline_mode<synchronous>, transform_indices = @transform_4, window_bounds = array<i64: 1, 32>}, {pipeline_mode = #tpu.pipeline_mode<synchronous>, transform_indices = @transform_5, window_bounds = array<i64: 1, 32>}, {transform_indices = @transform_6, window_bounds = array<i64: 32, 128>}, {transform_indices = @transform_7, window_bounds = array<i64: 1, 128>}, {transform_indices = @transform_8, window_bounds = array<i64: 128, 32>}, {pipeline_mode = #tpu.pipeline_mode<synchronous>, transform_indices = @transform_9, window_bounds = array<i64: 1, 32>}, {pipeline_mode = #tpu.pipeline_mode<synchronous>, transform_indices = @transform_10, window_bounds = array<i64: 1, 32>}, {pipeline_mode = #tpu.pipeline_mode<synchronous>, transform_indices = @transform_11, window_bounds = array<i64: 1, 32>}, {transform_indices = @transform_12, window_bounds = array<i64: 16, 32>}]} {
    %c0_i32 = arith.constant 0 : i32
    %0 = arith.cmpi eq, %arg1, %c0_i32 : i32
    %1 = arith.extui %0 : i1 to i32
    %c0_i32_0 = arith.constant 0 : i32
    %2 = arith.cmpi ne, %1, %c0_i32_0 : i32
    scf.if %2 {
      %c0_19 = arith.constant 0 : index
      %c0_20 = arith.constant 0 : index
      %33 = vector.load %arg3[%c0_19, %c0_20] : memref<16x32xbf16, #tpu.memory_space<vmem>>, vector<16x32xbf16>
      %c0_21 = arith.constant 0 : index
      %c0_22 = arith.constant 0 : index
      %34 = vector.load %arg4[%c0_21, %c0_22] : memref<32x32xbf16, #tpu.memory_space<vmem>>, vector<32x32xbf16>
      %cst_23 = arith.constant dense<0.000000e+00> : vector<16x32xf32>
      %35 = tpu.matmul %33, %34, %cst_23 {dimension_numbers = #tpu.dot_dimension_numbers<[1], [0], [0], [1], [0, 0, 1, 1], [], []>} : vector<16x32xbf16>, vector<32x32xbf16>, vector<16x32xf32> -> vector<16x32xf32>
      %c0_24 = arith.constant 0 : index
      %c0_25 = arith.constant 0 : index
      %36 = vector.load %arg5[%c0_24, %c0_25] : memref<1x32xf32, #tpu.memory_space<vmem>>, vector<1x32xf32>
      %37 = vector.shape_cast %36 : vector<1x32xf32> to vector<32xf32>
      %38 = vector.shape_cast %37 : vector<32xf32> to vector<1x32xf32>
      %39 = vector.broadcast %38 : vector<1x32xf32> to vector<16x32xf32>
      %40 = arith.addf %35, %39 : vector<16x32xf32>
      %c0_26 = arith.constant 0 : index
      %c0_27 = arith.constant 0 : index
      %41 = vector.load %arg2[%c0_26, %c0_27] : memref<16x32xf32, #tpu.memory_space<vmem>>, vector<16x32xf32>
      %42 = arith.addf %41, %40 : vector<16x32xf32>
      %c0_28 = arith.constant 0 : index
      %c0_29 = arith.constant 0 : index
      %43 = vector.load %arg15[%c0_28, %c0_29] : memref<16x32xf32, #tpu.memory_space<vmem>>, vector<16x32xf32>
      tpu.vector_store %arg15[%c0_28, %c0_29], %42 {strides = array<i32>} : memref<16x32xf32, #tpu.memory_space<vmem>>, vector<16x32xf32>,
      %c0_30 = arith.constant 0 : index
      %c0_31 = arith.constant 0 : index
      %44 = vector.load %arg6[%c0_30, %c0_31] : memref<1x32xf32, #tpu.memory_space<vmem>>, vector<1x32xf32>
      %45 = vector.shape_cast %44 : vector<1x32xf32> to vector<32xf32>
      %c0_32 = arith.constant 0 : index
      %c0_33 = arith.constant 0 : index
      %46 = vector.load %arg7[%c0_32, %c0_33] : memref<1x32xf32, #tpu.memory_space<vmem>>, vector<1x32xf32>
      %47 = vector.shape_cast %46 : vector<1x32xf32> to vector<32xf32>
      %cst_34 = arith.constant dense<0.000000e+00> : vector<16xf32>
      %48 = vector.multi_reduction <add>, %42, %cst_34 [1] : vector<16x32xf32> to vector<16xf32>
      %49 = vector.shape_cast %48 : vector<16xf32> to vector<16x1xf32>
      %cst_35 = arith.constant 3.200000e+01 : f32
      %50 = vector.broadcast %cst_35 : f32 to vector<16x1xf32>
      %51 = arith.divf %49, %50 : vector<16x1xf32>
      %52 = vector.broadcast %51 : vector<16x1xf32> to vector<16x32xf32>
      %53 = arith.subf %42, %52 : vector<16x32xf32>
      %54 = arith.mulf %53, %53 : vector<16x32xf32>
      %cst_36 = arith.constant dense<0.000000e+00> : vector<16xf32>
      %55 = vector.multi_reduction <add>, %54, %cst_36 [1] : vector<16x32xf32> to vector<16xf32>
      %56 = vector.shape_cast %55 : vector<16xf32> to vector<16x1xf32>
      %cst_37 = arith.constant 3.200000e+01 : f32
      %57 = vector.broadcast %cst_37 : f32 to vector<16x1xf32>
      %58 = arith.divf %56, %57 : vector<16x1xf32>
      %cst_38 = arith.constant 9.99999993E-9 : f32
      %59 = vector.broadcast %cst_38 : f32 to vector<16x1xf32>
      %60 = arith.addf %58, %59 : vector<16x1xf32>
      %61 = math.rsqrt %60 : vector<16x1xf32>
      %62 = vector.broadcast %61 : vector<16x1xf32> to vector<16x32xf32>
      %63 = arith.mulf %53, %62 : vector<16x32xf32>
      %64 = vector.shape_cast %45 : vector<32xf32> to vector<1x32xf32>
      %65 = vector.broadcast %64 : vector<1x32xf32> to vector<16x32xf32>
      %66 = arith.mulf %63, %65 : vector<16x32xf32>
      %67 = vector.shape_cast %47 : vector<32xf32> to vector<1x32xf32>
      %68 = vector.broadcast %67 : vector<1x32xf32> to vector<16x32xf32>
      %69 = arith.addf %66, %68 : vector<16x32xf32>
      %70 = arith.truncf %69 : vector<16x32xf32> to vector<16x32xbf16>
      %c0_39 = arith.constant 0 : index
      %c0_40 = arith.constant 0 : index
      %71 = vector.load %arg16[%c0_39, %c0_40] : memref<16x32xbf16, #tpu.memory_space<vmem>>, vector<16x32xbf16>
      tpu.vector_store %arg16[%c0_39, %c0_40], %70 {strides = array<i32>} : memref<16x32xbf16, #tpu.memory_space<vmem>>, vector<16x32xbf16>,
      %cst_41 = arith.constant 0.000000e+00 : f32
      %72 = vector.broadcast %cst_41 : f32 to vector<16x32xf32>
      %c0_42 = arith.constant 0 : index
      %c0_43 = arith.constant 0 : index
      %73 = vector.load %arg17[%c0_42, %c0_43] : memref<16x32xf32, #tpu.memory_space<vmem>>, vector<16x32xf32>
      tpu.vector_store %arg17[%c0_42, %c0_43], %72 {strides = array<i32>} : memref<16x32xf32, #tpu.memory_space<vmem>>, vector<16x32xf32>,
    } else {
    }
    %c0 = arith.constant 0 : index
    %c0_1 = arith.constant 0 : index
    %3 = vector.load %arg16[%c0, %c0_1] : memref<16x32xbf16, #tpu.memory_space<vmem>>, vector<16x32xbf16>
    %c0_2 = arith.constant 0 : index
    %c0_3 = arith.constant 0 : index
    %4 = vector.load %arg8[%c0_2, %c0_3] : memref<32x128xbf16, #tpu.memory_space<vmem>>, vector<32x128xbf16>
    %cst = arith.constant dense<0.000000e+00> : vector<16x128xf32>
    %5 = tpu.matmul %3, %4, %cst {dimension_numbers = #tpu.dot_dimension_numbers<[1], [0], [0], [1], [0, 0, 1, 1], [], []>} : vector<16x32xbf16>, vector<32x128xbf16>, vector<16x128xf32> -> vector<16x128xf32>
    %c0_4 = arith.constant 0 : index
    %c0_5 = arith.constant 0 : index
    %6 = vector.load %arg9[%c0_4, %c0_5] : memref<1x128xf32, #tpu.memory_space<vmem>>, vector<1x128xf32>
    %7 = vector.shape_cast %6 : vector<1x128xf32> to vector<128xf32>
    %8 = vector.shape_cast %7 : vector<128xf32> to vector<1x128xf32>
    %9 = vector.broadcast %8 : vector<1x128xf32> to vector<16x128xf32>
    %10 = arith.addf %5, %9 : vector<16x128xf32>
    %cst_6 = arith.constant 5.000000e-01 : f32
    %11 = vector.broadcast %cst_6 : f32 to vector<16x128xf32>
    %12 = arith.mulf %11, %10 : vector<16x128xf32>
    %cst_7 = arith.constant 4.471500e-02 : f32
    %13 = vector.broadcast %cst_7 : f32 to vector<16x128xf32>
    %14 = arith.mulf %13, %10 : vector<16x128xf32>
    %15 = arith.mulf %14, %10 : vector<16x128xf32>
    %16 = arith.mulf %15, %10 : vector<16x128xf32>
    %17 = arith.addf %10, %16 : vector<16x128xf32>
    %cst_8 = arith.constant 0.797884583 : f32
    %18 = vector.broadcast %cst_8 : f32 to vector<16x128xf32>
    %19 = arith.mulf %18, %17 : vector<16x128xf32>
    %20 = math.tanh %19 : vector<16x128xf32>
    %cst_9 = arith.constant 1.000000e+00 : f32
    %21 = vector.broadcast %cst_9 : f32 to vector<16x128xf32>
    %22 = arith.addf %21, %20 : vector<16x128xf32>
    %23 = arith.mulf %12, %22 : vector<16x128xf32>
    %c0_10 = arith.constant 0 : index
    %c0_11 = arith.constant 0 : index
    %24 = vector.load %arg17[%c0_10, %c0_11] : memref<16x32xf32, #tpu.memory_space<vmem>>, vector<16x32xf32>
    %25 = arith.truncf %23 : vector<16x128xf32> to vector<16x128xbf16>
    %c0_12 = arith.constant 0 : index
    %c0_13 = arith.constant 0 : index
    %26 = vector.load %arg10[%c0_12, %c0_13] : memref<128x32xbf16, #tpu.memory_space<vmem>>, vector<128x32xbf16>
    %cst_14 = arith.constant dense<0.000000e+00> : vector<16x32xf32>
    %27 = tpu.matmul %25, %26, %cst_14 {dimension_numbers = #tpu.dot_dimension_numbers<[1], [0], [0], [1], [0, 0, 1, 1], [], []>} : vector<16x128xbf16>, vector<128x32xbf16>, vector<16x32xf32> -> vector<16x32xf32>
    %28 = arith.addf %24, %27 : vector<16x32xf32>
    %c0_15 = arith.constant 0 : index
    %c0_16 = arith.constant 0 : index
    %29 = vector.load %arg17[%c0_15, %c0_16] : memref<16x32xf32, #tpu.memory_space<vmem>>, vector<16x32xf32>
    tpu.vector_store %arg17[%c0_15, %c0_16], %28 {strides = array<i32>} : memref<16x32xf32, #tpu.memory_space<vmem>>, vector<16x32xf32>,
    %c0_i32_17 = arith.constant 0 : i32
    %30 = arith.cmpi eq, %arg1, %c0_i32_17 : i32
    %31 = arith.extui %30 : i1 to i32
    %c0_i32_18 = arith.constant 0 : i32
    %32 = arith.cmpi ne, %31, %c0_i32_18 : i32
    scf.if %32 {
      %c0_19 = arith.constant 0 : index
      %c0_20 = arith.constant 0 : index
      %33 = vector.load %arg15[%c0_19, %c0_20] : memref<16x32xf32, #tpu.memory_space<vmem>>, vector<16x32xf32>
      %c0_21 = arith.constant 0 : index
      %c0_22 = arith.constant 0 : index
      %34 = vector.load %arg17[%c0_21, %c0_22] : memref<16x32xf32, #tpu.memory_space<vmem>>, vector<16x32xf32>
      %35 = arith.addf %33, %34 : vector<16x32xf32>
      %c0_23 = arith.constant 0 : index
      %c0_24 = arith.constant 0 : index
      %36 = vector.load %arg11[%c0_23, %c0_24] : memref<1x32xf32, #tpu.memory_space<vmem>>, vector<1x32xf32>
      %37 = vector.shape_cast %36 : vector<1x32xf32> to vector<32xf32>
      %38 = vector.shape_cast %37 : vector<32xf32> to vector<1x32xf32>
      %39 = vector.broadcast %38 : vector<1x32xf32> to vector<16x32xf32>
      %40 = arith.addf %35, %39 : vector<16x32xf32>
      %c0_25 = arith.constant 0 : index
      %c0_26 = arith.constant 0 : index
      %41 = vector.load %arg14[%c0_25, %c0_26] : memref<16x32xf32, #tpu.memory_space<vmem>>, vector<16x32xf32>
      tpu.vector_store %arg14[%c0_25, %c0_26], %40 {strides = array<i32>} : memref<16x32xf32, #tpu.memory_space<vmem>>, vector<16x32xf32>,
    } else {
    }
    return
  }
  func.func @transform_0(%arg0: i32, %arg1: i32) -> (i32, i32) {
    %c0_i32 = arith.constant 0 : i32
    %c0_i32_0 = arith.constant 0 : i32
    return %arg0, %c0_i32 : i32, i32
  }
  func.func @transform_1(%arg0: i32, %arg1: i32) -> (i32, i32) {
    %c0_i32 = arith.constant 0 : i32
    %c0_i32_0 = arith.constant 0 : i32
    return %arg0, %c0_i32 : i32, i32
  }
  func.func @transform_2(%arg0: i32, %arg1: i32) -> (i32, i32) {
    %c0_i32 = arith.constant 0 : i32
    %c0_i32_0 = arith.constant 0 : i32
    %c0_i32_1 = arith.constant 0 : i32
    return %c0_i32, %c0_i32_0 : i32, i32
  }
  func.func @transform_3(%arg0: i32, %arg1: i32) -> (i32, i32) {
    %c0_i32 = arith.constant 0 : i32
    %c0_i32_0 = arith.constant 0 : i32
    %c0_i32_1 = arith.constant 0 : i32
    return %c0_i32, %c0_i32_0 : i32, i32
  }
  func.func @transform_4(%arg0: i32, %arg1: i32) -> (i32, i32) {
    %c0_i32 = arith.constant 0 : i32
    %c0_i32_0 = arith.constant 0 : i32
    %c0_i32_1 = arith.constant 0 : i32
    return %c0_i32, %c0_i32_0 : i32, i32
  }
  func.func @transform_5(%arg0: i32, %arg1: i32) -> (i32, i32) {
    %c0_i32 = arith.constant 0 : i32
    %c0_i32_0 = arith.constant 0 : i32
    %c0_i32_1 = arith.constant 0 : i32
    return %c0_i32, %c0_i32_0 : i32, i32
  }
  func.func @transform_6(%arg0: i32, %arg1: i32) -> (i32, i32) {
    %c0_i32 = arith.constant 0 : i32
    %c0_i32_0 = arith.constant 0 : i32
    return %c0_i32, %arg1 : i32, i32
  }
  func.func @transform_7(%arg0: i32, %arg1: i32) -> (i32, i32) {
    %c0_i32 = arith.constant 0 : i32
    %c0_i32_0 = arith.constant 0 : i32
    return %c0_i32, %arg1 : i32, i32
  }
  func.func @transform_8(%arg0: i32, %arg1: i32) -> (i32, i32) {
    %c0_i32 = arith.constant 0 : i32
    %c0_i32_0 = arith.constant 0 : i32
    return %arg1, %c0_i32 : i32, i32
  }
  func.func @transform_9(%arg0: i32, %arg1: i32) -> (i32, i32) {
    %c0_i32 = arith.constant 0 : i32
    %c0_i32_0 = arith.constant 0 : i32
    %c0_i32_1 = arith.constant 0 : i32
    return %c0_i32, %c0_i32_0 : i32, i32
  }
  func.func @transform_10(%arg0: i32, %arg1: i32) -> (i32, i32) {
    %c0_i32 = arith.constant 0 : i32
    %c0_i32_0 = arith.constant 0 : i32
    %c0_i32_1 = arith.constant 0 : i32
    return %c0_i32, %c0_i32_0 : i32, i32
  }
  func.func @transform_11(%arg0: i32, %arg1: i32) -> (i32, i32) {
    %c0_i32 = arith.constant 0 : i32
    %c0_i32_0 = arith.constant 0 : i32
    %c0_i32_1 = arith.constant 0 : i32
    return %c0_i32, %c0_i32_0 : i32, i32
  }
  func.func @transform_12(%arg0: i32, %arg1: i32) -> (i32, i32) {
    %c0_i32 = arith.constant 0 : i32
    %c0_i32_0 = arith.constant 0 : i32
    return %arg0, %c0_i32 : i32, i32
  }
}

</mosaic_0001>

<bundles_post_ra>
// kernel: gpt2_forward.6
= control target key start
LH: loop header
LB: loop body
LE: loop exit
PB: predicated region body
PF: predicated region fallthrough
CT: control target
= control target key end

     0   :  { %vm40_vm0 = vcmask 261120   ;;  %v394_v15 = vmov 0.0   ;;  %vm395_vm1 = vmmov 0   ;;  %vm160_vm2 = vcmask 257024   ;;  %s529_s0 = inlined_call_operand.vmem [shape: f32[16,32], index: 0, kind: input, shape index: {}]   ;;  %s530_s3 = inlined_call_operand.vmem [shape: bf16[32,32], index: 3, kind: input, shape index: {}]   ;;  %s531_s4 = inlined_call_operand.vmem [shape: bf16[32,32], index: 4, kind: input, shape index: {}]   ;;  %s532_s5 = inlined_call_operand.vmem [shape: bf16[32,32], index: 5, kind: input, shape index: {}]   ;;  %s533_s1 = inlined_call_operand.vmem [shape: f32[1,32], index: 1, kind: input, shape index: {}]   ;;  %s534_s2 = inlined_call_operand.vmem [shape: f32[1,32], index: 2, kind: input, shape index: {}]   ;;  %s535_s6 = inlined_call_operand.vmem [shape: f32[1,32], index: 6, kind: input, shape index: {}]   ;;  %s536_s7 = inlined_call_operand.vmem [shape: f32[1,32], index: 7, kind: input, shape index: {}]   ;;  %s537_s9 = inlined_call_operand.vmem [shape: bf16[16,32], index: 9, kind: output, shape index: {0}]   ;;  %s538_s10 = inlined_call_operand.vmem [shape: bf16[16,32], index: 10, kind: output, shape index: {1}]   ;;  %s539_s8 = inlined_call_operand.vmem [shape: f32[1,32], index: 8, kind: input, shape index: {}]   ;;  %s540_s11 = inlined_call_operand.vmem [shape: bf16[16,32], index: 11, kind: output, shape index: {2}]  }
   0x1   :  { %v36_v0 = vld [vmem:[%s529_s0] sm:$0xff]  ;;  %v37_v1 = vld [vmem:[%s529_s0 + $0x8] sm:$0xff]  ;;  %358 = vmatprep.subr.bf16.mxu0 %v394_v15  ;;  %366 = vmatprep.subr.bf16.mxu1 %v394_v15 }
   0x2   :  { %v41_v2 = vsel %vm40_vm0, %v36_v0, 0.0  ;;  %v44_v3 = vsel %vm40_vm0, %v37_v1, 0.0  ;;  %v384_v14 = vld [vmem:[%s530_s3] sm:$0xff]   ;;  %v386_v17 = vld [vmem:[%s530_s3 + $0x8] sm:$0xff]   ;;  %362 = vmatprep.mubr.msk.bf16.mxu0 %vm395_vm1, %v394_v15  ;;  %370 = vmatprep.mubr.msk.bf16.mxu1 %vm395_vm1, %v394_v15 }
   0x3   :  { %42 = vadd.xlane.f32.xlu0 %v41_v2  ;;  %v385_v16 = vld [vmem:[%s531_s4] sm:$0xff]   ;;  %359 = vmatpush3.bf16.msra.mxu0 %v384_v14  ;;  %v387_v18 = vld [vmem:[%s531_s4 + $0x8] sm:$0xff]  }
   0x4   :  { %367 = vmatpush3.bf16.msra.mxu1 %v385_v16  ;;  %360 = vmatprep.subr.bf16.mxu0 %v394_v15  ;;  %v323_v27 = vld [vmem:[%s533_s1] ss:$0 sm:$0xff]  ;;  %v389_v37 = vld [vmem:[%s532_s5 + $0x8] sm:$0xff]  }
   0x5   :  { %368 = vmatprep.subr.bf16.mxu1 %v394_v15  ;;  %v324_v31 = vld [vmem:[%s534_s2] ss:$0 sm:$0xff] }
   0x6   :  { %v388_v35 = vld [vmem:[%s532_s5] sm:$0xff]  }
   0x7   :  { %45 = vadd.xlane.f32.xlu0 %v44_v3  ;;  %361 = vmatpush3.bf16.msra.mxu0 %v386_v17  ;;  %v325_v38 = vld [vmem:[%s535_s6] ss:$0 sm:$0xff] }
   0x8   :  { %369 = vmatpush3.bf16.msra.mxu1 %v387_v18  ;;  %374 = vmatprep.subr.bf16.mxu0 %v394_v15  ;;  %v331_v39 = vld [vmem:[%s536_s7] ss:$0 sm:$0xff] }
   0x9   :  { %v337_v56 = vld [vmem:[%s539_s8] ss:$0 sm:$0xff] }
  0x90   :  { %v43_v4 = vpop.xlane.xlu0 %42 }
  0x91   :  { %v48_v5 = vmul.f32 0.03125, %v43_v4 }
  0x93   :  { %v50_v6 = vsub.f32 %v36_v0, %v48_v5 }
  0x94   :  { %v46_v7 = vpop.xlane.xlu0 %45 }
  0x95   :  { %v49_v8 = vmul.f32 0.03125, %v46_v7  ;;  %v52_v9 = vmul.f32 %v50_v6, %v50_v6 }
  0x97   :  { %v51_v10 = vsub.f32 %v37_v1, %v49_v8  ;;  %v54_v11 = vsel %vm40_vm0, %v52_v9, 0.0 }
  0x98   :  { %55 = vadd.xlane.f32.xlu1 %v54_v11 }
  0x99   :  { %v53_v12 = vmul.f32 %v51_v10, %v51_v10 }
  0x9b   :  { %v57_v13 = vsel %vm40_vm0, %v53_v12, 0.0 }
  0x9c   :  { %58 = vadd.xlane.f32.xlu1 %v57_v13 }
 0x125   :  { %v56_v19 = vpop.xlane.xlu1 %55 }
 0x126   :  { %v60_v20 = vmul.f32 0.03125, %v56_v19 }
 0x128   :  { %v62_v21 = vadd.f32 1e-08, %v60_v20 }
 0x129   :  { %v59_v22 = vpop.xlane.xlu1 %58 }
 0x12a   :  { %390 = vrsqrt.f32 %v62_v21  ;;  %v61_v23 = vmul.f32 0.03125, %v59_v22 }
 0x12c   :  { %v63_v24 = vadd.f32 1e-08, %v61_v23 }
 0x12e   :  { %392 = vrsqrt.f32 %v63_v24 }
 0x134   :  { %v391_v25 = vpop.eup %390 }
 0x135   :  { %v66_v26 = vmul.f32 %v391_v25, %v50_v6 }
 0x137   :  { %v74_v30 = vmul.f32 %v323_v27, %v66_v26 }
 0x138   :  { %v393_v28 = vpop.eup %392 }
 0x139   :  { %v67_v29 = vmul.f32 %v393_v28, %v51_v10  ;;  %v82_v33 = vadd.f32 %v324_v31, %v74_v30 }
 0x13b   :  { %v75_v32 = vmul.f32 %v323_v27, %v67_v29 }
 0x13d   :  { %v83_v34 = vadd.f32 %v324_v31, %v75_v32 }
 0x13f   :  { %v84_v36 = vpack.c.bf16 %v83_v34, %v82_v33 }
 0x141   :  { %363 = vmatmul.mubr.msk.bf16.vlgmr.msra.gmra.mrb[0].mxu0 %vm40_vm0, %v84_v36  ;;  %371 = vmatmul.mubr.msk.bf16.vlgmr.msra.gmra.mrb[0].mxu1 %vm40_vm0, %v84_v36 }
 0x142   :  { %375 = vmatpush3.bf16.msra.mxu0 %v388_v35  ;;  %378 = vmatprep.mubr.msk.bf16.mxu0 %vm395_vm1, %v394_v15 }
 0x143   :  { %376 = vmatprep.subr.bf16.mxu0 %v394_v15 }
 0x146   :  { %377 = vmatpush3.bf16.msra.mxu0 %v389_v37 }
 0x149   :  { %379 = vmatmul.mubr.msk.bf16.vlgmr.msra.gmra.mrb[4].mxu0 %vm40_vm0, %v84_v36 }
 0x214   :  { %v145_v40 = vpop.f32.mrb[0].mxu0  ;;  %v220_v41 = vpop.f32.mrb[0].mxu1 }
 0x215   :  { %v146_v42 = vadd.f32 %v325_v38, %v145_v40  ;;  %v221_v43 = vadd.f32 %v331_v39, %v220_v41  ;;  %v364_v44 = vpop.f32.mrb[1].mxu0  ;;  %v372_v45 = vpop.f32.mrb[1].mxu1 }
 0x216   :  { %v148_v46 = vpop.f32.mrb[2].mxu0  ;;  %v223_v47 = vpop.f32.mrb[2].mxu1 }
 0x217   :  { %v343_v48 = vpack.c.bf16 %v146_v42, %v146_v42  ;;  %v345_v49 = vpack.c.bf16 %v221_v43, %v221_v43  ;;  %v149_v50 = vadd.f32 %v325_v38, %v148_v46  ;;  %v224_v51 = vadd.f32 %v331_v39, %v223_v47  ;;  %v365_v52 = vpop.f32.mrb[3].mxu0  ;;  %v373_v53 = vpop.f32.mrb[3].mxu1 }
 0x219   :  { %161 = vst.msk [vmem:[%s537_s9] sm:$0xf] %vm160_vm2, %v343_v48  ;;  %235 = vst.msk [vmem:[%s538_s10] sm:$0xf] %vm160_vm2, %v345_v49  ;;  %v344_v54 = vpack.c.bf16 %v149_v50, %v149_v50  ;;  %v346_v55 = vpack.c.bf16 %v224_v51, %v224_v51 }
 0x21b   :  { %162 = vst.msk [vmem:[%s537_s9 + $0x4] sm:$0xf] %vm160_vm2, %v344_v54  ;;  %236 = vst.msk [vmem:[%s538_s10 + $0x4] sm:$0xf] %vm160_vm2, %v346_v55 }
 0x21c   :  { %v294_v57 = vpop.f32.mrb[4].mxu0 }
 0x21d   :  { %v295_v58 = vadd.f32 %v337_v56, %v294_v57  ;;  %v380_v59 = vpop.f32.mrb[5].mxu0 }
 0x21e   :  { %v297_v60 = vpop.f32.mrb[6].mxu0 }
 0x21f   :  { %v347_v61 = vpack.c.bf16 %v295_v58, %v295_v58  ;;  %v298_v62 = vadd.f32 %v337_v56, %v297_v60  ;;  %v381_v63 = vpop.f32.mrb[7].mxu0 }
 0x221   :  { %309 = vst.msk [vmem:[%s540_s11] sm:$0xf] %vm160_vm2, %v347_v61  ;;  %v348_v0 = vpack.c.bf16 %v298_v62, %v298_v62 }
 0x223   :  { %310 = vst.msk [vmem:[%s540_s11 + $0x4] sm:$0xf] %vm160_vm2, %v348_v0 }

// kernel: gpt2_forward.8
= control target key start
LH: loop header
LB: loop body
LE: loop exit
PB: predicated region body
PF: predicated region fallthrough
CT: control target
= control target key end

     0   :  { %vm76_vm0 = vcmask 261120   ;;  %v493_v0 = vmov 0.0   ;;  %vm494_vm1 = vmmov 0   ;;  %s658_s10 = inlined_call_operand.vmem [shape: f32[1,32], index: 10, kind: input, shape index: {}]   ;;  %s659_s11 = inlined_call_operand.vmem [shape: f32[1,32], index: 11, kind: input, shape index: {}]   ;;  %s660_s2 = inlined_call_operand.vmem [shape: bf16[32,32], index: 2, kind: input, shape index: {}]   ;;  %s661_s1 = inlined_call_operand.vmem [shape: bf16[16,32], index: 1, kind: input, shape index: {}]   ;;  %s662_s3 = inlined_call_operand.vmem [shape: f32[1,32], index: 3, kind: input, shape index: {}]   ;;  %s663_s0 = inlined_call_operand.vmem [shape: f32[16,32], index: 0, kind: input, shape index: {}]   ;;  %s664_s6 = inlined_call_operand.vmem [shape: bf16[32,128], index: 6, kind: input, shape index: {}]   ;;  %s665_s4 = inlined_call_operand.vmem [shape: f32[1,32], index: 4, kind: input, shape index: {}]   ;;  %s666_s5 = inlined_call_operand.vmem [shape: f32[1,32], index: 5, kind: input, shape index: {}]   ;;  %s667_s8 = inlined_call_operand.vmem [shape: bf16[128,32], index: 8, kind: input, shape index: {}]   ;;  %s668_s7 = inlined_call_operand.vmem [shape: f32[1,128], index: 7, kind: input, shape index: {}]   ;;  %s669_s9 = inlined_call_operand.vmem [shape: f32[1,32], index: 9, kind: input, shape index: {}]   ;;  %s670_s12 = inlined_call_operand.vmem [shape: f32[16,32], index: 12, kind: output, shape index: {}]  }
   0x1   :  { %434 = vmatprep.subr.bf16.mxu1 %v493_v0  ;;  %v472_v1 = vld [vmem:[%s660_s2] sm:$0xff]   ;;  %438 = vmatprep.mubr.msk.bf16.mxu1 %vm494_vm1, %v493_v0  ;;  %174 = vst.msk [vmem:[#allocation4] sm:$0xff] %vm76_vm0, %v493_v0  ;;  %175 = vst.msk [vmem:[#allocation4 + $0x8] sm:$0xff] %vm76_vm0, %v493_v0  ;;  %v473_v2 = vld [vmem:[%s660_s2 + $0x8] sm:$0xff]  }
   0x2   :  { %450 = vmatprep.subr.bf16.mxu0 %v493_v0  ;;  %466 = vmatprep.mubr.msk.bf16.mxu0 %vm494_vm1, %v493_v0  ;;  %v474_v3 = vld [vmem:[%s661_s1] sm:$0xff]   ;;  %v122_v10 = vld [vmem:[%s663_s0 + $0x8] sm:$0xff]  ;;  %v479_v49 = vld [vmem:[%s667_s8 + $0x10] sm:$0xff]  }
   0x3   :  { %435 = vmatpush3.bf16.msra.mxu1 %v472_v1  ;;  %v399_v4 = vld [vmem:[%s662_s3] ss:$0 sm:$0xff]  ;;  %v476_v28 = vld [vmem:[%s664_s6 + $0x8] sm:$0xff]   ;;  %v480_v50 = vld [vmem:[%s667_s8 + $0x18] sm:$0xff]  }
   0x4   :  { %436 = vmatprep.subr.bf16.mxu1 %v493_v0  ;;  %v121_v6 = vld [vmem:[%s663_s0] sm:$0xff]  ;;  %v478_v48 = vld [vmem:[%s667_s8 + $0x8] sm:$0xff]   ;;  %v483_v53 = vld [vmem:[%s667_s8 + $0x30] sm:$0xff]  }
   0x5   :  { %v475_v27 = vld [vmem:[%s664_s6] sm:$0xff]   ;;  %v482_v52 = vld [vmem:[%s667_s8 + $0x28] sm:$0xff]   ;;  %v484_v54 = vld [vmem:[%s667_s8 + $0x38] sm:$0xff]  }
   0x6   :  { %v404_v37 = vld [vmem:[%s665_s4] ss:$0 sm:$0xff] }
   0x7   :  { %437 = vmatpush3.bf16.msra.mxu1 %v473_v2  ;;  %v405_v41 = vld [vmem:[%s666_s5] ss:$0 sm:$0xff] }
   0x8   :  { %442 = vmatprep.subr.bf16.mxu1 %v493_v0  ;;  %v477_v47 = vld [vmem:[%s667_s8] sm:$0xff]  }
   0x9   :  { %451 = vmatpush3.bf16.msra.mxu0 %v477_v47  ;;  %v481_v51 = vld [vmem:[%s667_s8 + $0x20] sm:$0xff]  }
   0xa   :  { %439 = vmatmul.mubr.msk.bf16.vlgmr.msra.gmra.mrb[0].mxu1 %vm76_vm0, %v474_v3  ;;  %452 = vmatprep.subr.bf16.mxu0 %v493_v0  ;;  %v406_v55 = vld [vmem:[%s668_s7] ss:$0 sm:$0xff] }
   0xb   :  { %446 = vmatprep.mubr.msk.bf16.mxu1 %vm494_vm1, %v493_v0  ;;  %443 = vmatpush3.bf16.msra.mxu1 %v475_v27  ;;  %v418_v27 = vld [vmem:[%s669_s9] ss:$0 sm:$0xff] }
   0xc   :  { %444 = vmatprep.subr.bf16.mxu1 %v493_v0 }
   0xd   :  { %453 = vmatpush3.bf16.msra.mxu0 %v478_v48 }
   0xe   :  { %454 = vmatprep.subr.bf16.mxu0 %v493_v0 }
   0xf   :  { %445 = vmatpush3.bf16.msra.mxu1 %v476_v28 }
  0x11   :  { %455 = vmatpush3.bf16.msra.mxu0 %v479_v49 }
  0x12   :  { %456 = vmatprep.subr.bf16.mxu0 %v493_v0 }
  0x15   :  { %457 = vmatpush3.bf16.msra.mxu0 %v480_v50 }
  0x16   :  { %458 = vmatprep.subr.bf16.mxu0 %v493_v0 }
  0x19   :  { %459 = vmatpush3.bf16.msra.mxu0 %v481_v51 }
  0x1a   :  { %460 = vmatprep.subr.bf16.mxu0 %v493_v0 }
  0x1d   :  { %461 = vmatpush3.bf16.msra.mxu0 %v482_v52 }
  0x1e   :  { %462 = vmatprep.subr.bf16.mxu0 %v493_v0 }
  0x21   :  { %463 = vmatpush3.bf16.msra.mxu0 %v483_v53 }
  0x22   :  { %464 = vmatprep.subr.bf16.mxu0 %v493_v0 }
  0x25   :  { %465 = vmatpush3.bf16.msra.mxu0 %v484_v54 }
  0xdd   :  { %v114_v5 = vpop.f32.mrb[0].mxu1 }
  0xde   :  { %v115_v7 = vadd.f32 %v399_v4, %v114_v5  ;;  %v440_v8 = vpop.f32.mrb[1].mxu1 }
  0xdf   :  { %v117_v9 = vpop.f32.mrb[2].mxu1 }
  0xe0   :  { %v123_v11 = vadd.f32 %v121_v6, %v115_v7  ;;  %v118_v12 = vadd.f32 %v399_v4, %v117_v9  ;;  %v441_v13 = vpop.f32.mrb[3].mxu1 }
  0xe2   :  { %125 = vst.msk [vmem:[#allocation2] sm:$0xff] %vm76_vm0, %v123_v11  ;;  %v124_v14 = vadd.f32 %v122_v10, %v118_v12  ;;  %v129_v15 = vsel %vm76_vm0, %v123_v11, 0.0 }
  0xe3   :  { %130 = vadd.xlane.f32.xlu0 %v129_v15 }
  0xe4   :  { %126 = vst.msk [vmem:[#allocation2 + $0x8] sm:$0xff] %vm76_vm0, %v124_v14  ;;  %v132_v16 = vsel %vm76_vm0, %v124_v14, 0.0 }
  0xe7   :  { %133 = vadd.xlane.f32.xlu0 %v132_v16 }
 0x170   :  { %v131_v17 = vpop.xlane.xlu0 %130 }
 0x171   :  { %v136_v18 = vmul.f32 0.03125, %v131_v17  ;;  %v263_v17 = vld [vmem:[#allocation4] sm:$0xff] }
 0x173   :  { %v138_v19 = vsub.f32 %v123_v11, %v136_v18 }
 0x174   :  { %v134_v20 = vpop.xlane.xlu0 %133 }
 0x175   :  { %v137_v21 = vmul.f32 0.03125, %v134_v20  ;;  %v140_v22 = vmul.f32 %v138_v19, %v138_v19 }
 0x177   :  { %v139_v23 = vsub.f32 %v124_v14, %v137_v21  ;;  %v142_v24 = vsel %vm76_vm0, %v140_v22, 0.0 }
 0x178   :  { %143 = vadd.xlane.f32.xlu1 %v142_v24 }
 0x179   :  { %v141_v25 = vmul.f32 %v139_v23, %v139_v23 }
 0x17b   :  { %v145_v26 = vsel %vm76_vm0, %v141_v25, 0.0  ;;  %v378_v25 = vld [vmem:[#allocation2] sm:$0xff] }
 0x17c   :  { %146 = vadd.xlane.f32.xlu1 %v145_v26 }
 0x205   :  { %v144_v29 = vpop.xlane.xlu1 %143 }
 0x206   :  { %v148_v30 = vmul.f32 0.03125, %v144_v29  ;;  %v379_v29 = vld [vmem:[#allocation2 + $0x8] sm:$0xff] }
 0x208   :  { %v150_v31 = vadd.f32 1e-08, %v148_v30 }
 0x209   :  { %v147_v32 = vpop.xlane.xlu1 %146 }
 0x20a   :  { %485 = vrsqrt.f32 %v150_v31  ;;  %v149_v33 = vmul.f32 0.03125, %v147_v32 }
 0x20c   :  { %v151_v34 = vadd.f32 1e-08, %v149_v33 }
 0x20e   :  { %487 = vrsqrt.f32 %v151_v34 }
 0x214   :  { %v486_v35 = vpop.eup %485 }
 0x215   :  { %v154_v36 = vmul.f32 %v486_v35, %v138_v19  ;;  %v264_v19 = vld [vmem:[#allocation4 + $0x8] sm:$0xff] }
 0x217   :  { %v162_v39 = vmul.f32 %v404_v37, %v154_v36 }
 0x218   :  { %v488_v38 = vpop.eup %487 }
 0x219   :  { %v155_v40 = vmul.f32 %v488_v38, %v139_v23  ;;  %v170_v43 = vadd.f32 %v405_v41, %v162_v39 }
 0x21b   :  { %v163_v42 = vmul.f32 %v404_v37, %v155_v40 }
 0x21d   :  { %v171_v44 = vadd.f32 %v405_v41, %v163_v42 }
 0x21f   :  { %v172_v45 = vpack.c.bf16 %v171_v44, %v170_v43 }
 0x221   :  { %173 = vst.msk [vmem:[#allocation3] sm:$0xff] %vm76_vm0, %v172_v45 }
 0x228   :  { %v176_v46 = vld [vmem:[#allocation3] sm:$0xff] }
 0x229   :  { %447 = vmatmul.mubr.msk.bf16.vlgmr.msra.gmra.mrb[4].mxu1 %vm76_vm0, %v176_v46 }
 0x2fc   :  { %v238_v56 = vpop.f32.mrb[4].mxu1 }
 0x2fd   :  { %v239_v57 = vadd.f32 %v406_v55, %v238_v56  ;;  %v448_v58 = vpop.f32.mrb[5].mxu1 }
 0x2fe   :  { %v241_v59 = vpop.f32.mrb[6].mxu1 }
 0x2ff   :  { %v247_v60 = vmul.f32 0.044715, %v239_v57  ;;  %v242_v61 = vadd.f32 %v406_v55, %v241_v59  ;;  %v449_v62 = vpop.f32.mrb[7].mxu1  ;;  %v245_v11 = vmul.f32 0.5, %v239_v57 }
 0x301   :  { %v249_v63 = vmul.f32 %v247_v60, %v239_v57  ;;  %v248_v1 = vmul.f32 0.044715, %v242_v61  ;;  %v246_v12 = vmul.f32 0.5, %v242_v61 }
 0x303   :  { %v251_v2 = vmul.f32 %v249_v63, %v239_v57  ;;  %v250_v3 = vmul.f32 %v248_v1, %v242_v61 }
 0x305   :  { %v252_v4 = vmul.f32 %v250_v3, %v242_v61  ;;  %v253_v5 = vadd.f32 %v251_v2, %v239_v57 }
 0x307   :  { %v254_v6 = vadd.f32 %v252_v4, %v242_v61  ;;  %v255_v0 = vmul.f32 0.7978846, %v253_v5 }
 0x309   :  { %v256_v7 = vmul.f32 0.7978846, %v254_v6  ;;  %489 = vtanh.f32 %v255_v0 }
 0x30b   :  { %491 = vtanh.f32 %v256_v7 }
 0x313   :  { %v490_v8 = vpop.eup %489 }
 0x314   :  { %v259_v9 = vadd.f32 1.0, %v490_v8 }
 0x315   :  { %v492_v10 = vpop.eup %491 }
 0x316   :  { %v260_v13 = vadd.f32 1.0, %v492_v10  ;;  %v261_v14 = vmul.f32 %v259_v9, %v245_v11 }
 0x318   :  { %v262_v15 = vmul.f32 %v260_v13, %v246_v12 }
 0x31a   :  { %v265_v16 = vpack.c.bf16 %v262_v15, %v261_v14 }
 0x31c   :  { %467 = vmatmul.mubr.bf16.vlgmr.msra.gmra.mrb[0].mxu0 %v265_v16 }
 0x3ef   :  { %v364_v18 = vpop.f32.mrb[0].mxu0 }
 0x3f0   :  { %v371_v20 = vadd.f32 %v364_v18, %v263_v17  ;;  %v468_v21 = vpop.f32.mrb[1].mxu0 }
 0x3f1   :  { %v367_v22 = vpop.f32.mrb[2].mxu0 }
 0x3f2   :  { %373 = vst.msk [vmem:[#allocation4] sm:$0xff] %vm76_vm0, %v371_v20  ;;  %v372_v23 = vadd.f32 %v367_v22, %v264_v19  ;;  %v469_v24 = vpop.f32.mrb[3].mxu0 }
 0x3f4   :  { %374 = vst.msk [vmem:[#allocation4 + $0x8] sm:$0xff] %vm76_vm0, %v372_v23 }
 0x3f9   :  { %v380_v26 = vld [vmem:[#allocation4] sm:$0xff] }
 0x3fa   :  { %v382_v28 = vadd.f32 %v380_v26, %v378_v25 }
 0x3fb   :  { %v381_v30 = vld [vmem:[#allocation4 + $0x8] sm:$0xff] }
 0x3fc   :  { %v391_v31 = vadd.f32 %v418_v27, %v382_v28  ;;  %v383_v32 = vadd.f32 %v381_v30, %v379_v29 }
 0x3fe   :  { %393 = vst.msk [vmem:[%s670_s12] sm:$0xff] %vm76_vm0, %v391_v31  ;;  %v392_v33 = vadd.f32 %v418_v27, %v383_v32 }
 0x400   :  { %394 = vst.msk [vmem:[%s670_s12 + $0x8] sm:$0xff] %vm76_vm0, %v392_v33 }

// kernel: gpt2_forward.11
= control target key start
LH: loop header
LB: loop body
LE: loop exit
PB: predicated region body
PF: predicated region fallthrough
CT: control target
= control target key end

     0   :  { %v584_v1 = vmov 0.0   ;;  %vm585_vm0 = vmmov 0   ;;  %vm77_vm1 = vcmask 261120   ;;  %s768_s0 = inlined_call_operand.vmem [shape: f32[16,32], index: 0, kind: input, shape index: {}]   ;;  %s769_s1 = inlined_call_operand.vmem [shape: bf16[16,32], index: 1, kind: input, shape index: {}]   ;;  %s770_s2 = inlined_call_operand.vmem [shape: bf16[32,32], index: 2, kind: input, shape index: {}]   ;;  %s771_s3 = inlined_call_operand.vmem [shape: f32[1,32], index: 3, kind: input, shape index: {}]   ;;  %s772_s4 = inlined_call_operand.vmem [shape: f32[1,32], index: 4, kind: input, shape index: {}]   ;;  %s773_s5 = inlined_call_operand.vmem [shape: f32[1,32], index: 5, kind: input, shape index: {}]   ;;  %s774_s6 = inlined_call_operand.vmem [shape: bf16[32,128], index: 6, kind: input, shape index: {}]   ;;  %s775_s7 = inlined_call_operand.vmem [shape: f32[1,128], index: 7, kind: input, shape index: {}]   ;;  %s776_s8 = inlined_call_operand.vmem [shape: bf16[128,32], index: 8, kind: input, shape index: {}]   ;;  %s777_s9 = inlined_call_operand.vmem [shape: f32[1,32], index: 9, kind: input, shape index: {}]   ;;  %s778_s10 = inlined_call_operand.vmem [shape: f32[1,32], index: 10, kind: input, shape index: {}]   ;;  %s779_s11 = inlined_call_operand.vmem [shape: f32[1,32], index: 11, kind: input, shape index: {}]   ;;  %s780_s12 = inlined_call_operand.hbm [shape: f32[16,32], index: 12, kind: output, shape index: {}]  }
   0x1   :  { %v535_v0 = vld [vmem:[%s770_s2] sm:$0xff]   ;;  %494 = vmatprep.subr.bf16.mxu1 %v584_v1  ;;  %510 = vmatprep.subr.bf16.mxu0 %v584_v1  ;;  %v536_v2 = vld [vmem:[%s770_s2 + $0x8] sm:$0xff]   ;;  %175 = vst.msk [vmem:[#allocation4] sm:$0xff] %vm77_vm1, %v584_v1  ;;  %176 = vst.msk [vmem:[#allocation4 + $0x8] sm:$0xff] %vm77_vm1, %v584_v1 }
   0x2   :  { %495 = vmatpush3.bf16.msra.mxu1 %v535_v0  ;;  %498 = vmatprep.mubr.msk.bf16.mxu1 %vm585_vm0, %v584_v1  ;;  %v537_v3 = vld [vmem:[%s769_s1] sm:$0xff]  }
   0x3   :  { %496 = vmatprep.subr.bf16.mxu1 %v584_v1  ;;  %526 = vmatprep.mubr.msk.bf16.mxu0 %vm585_vm0, %v584_v1 }
   0x6   :  { %497 = vmatpush3.bf16.msra.mxu1 %v536_v2 }
   0x7   :  { %502 = vmatprep.subr.bf16.mxu1 %v584_v1 }
   0x9   :  { %499 = vmatmul.mubr.msk.bf16.vlgmr.msra.gmra.mrb[0].mxu1 %vm77_vm1, %v537_v3 }
   0xa   :  { %506 = vmatprep.mubr.msk.bf16.mxu1 %vm585_vm0, %v584_v1 }
   0xb   :  { %17 = vsyncpa [#allocation6], 0  ;;  %v457_v4 = vld [vmem:[%s771_s3] ss:$0 sm:$0xff]  ;;  %v123_v10 = vld [vmem:[%s768_s0 + $0x8] sm:$0xff]  ;;  %s586_s15 = smov [#allocation5]  }
   0xc   :  { %v122_v6 = vld [vmem:[%s768_s0] sm:$0xff]  ;;  %v539_v28 = vld [vmem:[%s774_s6 + $0x8] sm:$0xff]   ;;  %v542_v49 = vld [vmem:[%s776_s8 + $0x10] sm:$0xff]   ;;  %s446_s16 = sshll.u32 %s586_s15, 4  ;;  %s447_s16 = int_to_ptr.vmem [resolvable:$true] %s446_s16 }
   0xd   :  { %v538_v27 = vld [vmem:[%s774_s6] sm:$0xff]   ;;  %v541_v48 = vld [vmem:[%s776_s8 + $0x8] sm:$0xff]   ;;  %v543_v50 = vld [vmem:[%s776_s8 + $0x18] sm:$0xff]   ;;  %s560_s6 = scalar_lea.vmem %s447_s16, 256  ;;  %p565_p1 = scmp.lt.s32.totalorder %s447_s16, %s447_s16 }
   0xe   :  { %503 = vmatpush3.bf16.msra.mxu1 %v538_v27  ;;  %v462_v37 = vld [vmem:[%s772_s4] ss:$0 sm:$0xff]  ;;  %v545_v52 = vld [vmem:[%s776_s8 + $0x28] sm:$0xff]   ;;  %v546_v53 = vld [vmem:[%s776_s8 + $0x30] sm:$0xff]   ;;  %p561_p0 = scmp.ne.s32.totalorder %s447_s16, %s560_s6  ;;  %p566_p2 = scmp.lt.s32.totalorder %s560_s6, %s560_s6 }
   0xf   :  { %504 = vmatprep.subr.bf16.mxu1 %v584_v1  ;;  %v463_v41 = vld [vmem:[%s773_s5] ss:$0 sm:$0xff]  ;;  %v547_v54 = vld [vmem:[%s776_s8 + $0x38] sm:$0xff]  }
  0x10   :  { %v540_v47 = vld [vmem:[%s776_s8] sm:$0xff]   ;;  %p567_p3 = por %p566_p2, %p565_p1 }
  0x11   :  { %511 = vmatpush3.bf16.msra.mxu0 %v540_v47  ;;  %v544_v51 = vld [vmem:[%s776_s8 + $0x20] sm:$0xff]  }
  0x12   :  { %505 = vmatpush3.bf16.msra.mxu1 %v539_v28  ;;  %512 = vmatprep.subr.bf16.mxu0 %v584_v1  ;;  %v464_v55 = vld [vmem:[%s775_s7] ss:$0 sm:$0xff]  ;;  %p568_p4 = pnand %p567_p3, %p561_p0 }
  0x13   :  { %v476_v27 = vld [vmem:[%s777_s9] ss:$0 sm:$0xff] }
  0x15   :  { %513 = vmatpush3.bf16.msra.mxu0 %v541_v48 }
  0x16   :  { %514 = vmatprep.subr.bf16.mxu0 %v584_v1 }
  0x19   :  { %515 = vmatpush3.bf16.msra.mxu0 %v542_v49 }
  0x1a   :  { %516 = vmatprep.subr.bf16.mxu0 %v584_v1 }
  0x1d   :  { %517 = vmatpush3.bf16.msra.mxu0 %v543_v50 }
  0x1e   :  { %518 = vmatprep.subr.bf16.mxu0 %v584_v1 }
  0x21   :  { %519 = vmatpush3.bf16.msra.mxu0 %v544_v51 }
  0x22   :  { %520 = vmatprep.subr.bf16.mxu0 %v584_v1 }
  0x25   :  { %521 = vmatpush3.bf16.msra.mxu0 %v545_v52 }
  0x26   :  { %522 = vmatprep.subr.bf16.mxu0 %v584_v1 }
  0x29   :  { %523 = vmatpush3.bf16.msra.mxu0 %v546_v53  ;;  %v477_v53 = vld [vmem:[%s778_s10] ss:$0 sm:$0xff] }
  0x2a   :  { %524 = vmatprep.subr.bf16.mxu0 %v584_v1 }
  0x2d   :  { %525 = vmatpush3.bf16.msra.mxu0 %v547_v54 }
  0xdc   :  { %v115_v5 = vpop.f32.mrb[0].mxu1 }
  0xdd   :  { %v116_v7 = vadd.f32 %v457_v4, %v115_v5  ;;  %v500_v8 = vpop.f32.mrb[1].mxu1 }
  0xde   :  { %v118_v9 = vpop.f32.mrb[2].mxu1 }
  0xdf   :  { %v124_v11 = vadd.f32 %v122_v6, %v116_v7  ;;  %v119_v12 = vadd.f32 %v457_v4, %v118_v9  ;;  %v501_v13 = vpop.f32.mrb[3].mxu1 }
  0xe1   :  { %126 = vst.msk [vmem:[#allocation2] sm:$0xff] %vm77_vm1, %v124_v11  ;;  %v125_v14 = vadd.f32 %v123_v10, %v119_v12  ;;  %v130_v15 = vsel %vm77_vm1, %v124_v11, 0.0 }
  0xe2   :  { %131 = vadd.xlane.f32.xlu0 %v130_v15 }
  0xe3   :  { %127 = vst.msk [vmem:[#allocation2 + $0x8] sm:$0xff] %vm77_vm1, %v125_v14  ;;  %v133_v16 = vsel %vm77_vm1, %v125_v14, 0.0 }
  0xe6   :  { %134 = vadd.xlane.f32.xlu0 %v133_v16 }
 0x16f   :  { %v132_v17 = vpop.xlane.xlu0 %131 }
 0x170   :  { %v137_v18 = vmul.f32 0.03125, %v132_v17  ;;  %v264_v17 = vld [vmem:[#allocation4] sm:$0xff] }
 0x172   :  { %v139_v19 = vsub.f32 %v124_v11, %v137_v18 }
 0x173   :  { %v135_v20 = vpop.xlane.xlu0 %134 }
 0x174   :  { %v138_v21 = vmul.f32 0.03125, %v135_v20  ;;  %v141_v22 = vmul.f32 %v139_v19, %v139_v19 }
 0x176   :  { %v140_v23 = vsub.f32 %v125_v14, %v138_v21  ;;  %v143_v24 = vsel %vm77_vm1, %v141_v22, 0.0 }
 0x177   :  { %144 = vadd.xlane.f32.xlu1 %v143_v24 }
 0x178   :  { %v142_v25 = vmul.f32 %v140_v23, %v140_v23 }
 0x17a   :  { %v146_v26 = vsel %vm77_vm1, %v142_v25, 0.0  ;;  %v379_v25 = vld [vmem:[#allocation2] sm:$0xff] }
 0x17b   :  { %147 = vadd.xlane.f32.xlu1 %v146_v26 }
 0x204   :  { %v145_v29 = vpop.xlane.xlu1 %144 }
 0x205   :  { %v149_v30 = vmul.f32 0.03125, %v145_v29  ;;  %v380_v29 = vld [vmem:[#allocation2 + $0x8] sm:$0xff] }
 0x207   :  { %v151_v31 = vadd.f32 1e-08, %v149_v30 }
 0x208   :  { %v148_v32 = vpop.xlane.xlu1 %147 }
 0x209   :  { %548 = vrsqrt.f32 %v151_v31  ;;  %v150_v33 = vmul.f32 0.03125, %v148_v32 }
 0x20b   :  { %v152_v34 = vadd.f32 1e-08, %v150_v33 }
 0x20d   :  { %550 = vrsqrt.f32 %v152_v34 }
 0x213   :  { %v549_v35 = vpop.eup %548 }
 0x214   :  { %v155_v36 = vmul.f32 %v549_v35, %v139_v19  ;;  %v265_v19 = vld [vmem:[#allocation4 + $0x8] sm:$0xff] }
 0x216   :  { %v163_v39 = vmul.f32 %v462_v37, %v155_v36 }
 0x217   :  { %v551_v38 = vpop.eup %550 }
 0x218   :  { %v156_v40 = vmul.f32 %v551_v38, %v140_v23  ;;  %v171_v43 = vadd.f32 %v463_v41, %v163_v39 }
 0x21a   :  { %v164_v42 = vmul.f32 %v462_v37, %v156_v40 }
 0x21c   :  { %v172_v44 = vadd.f32 %v463_v41, %v164_v42 }
 0x21e   :  { %v173_v45 = vpack.c.bf16 %v172_v44, %v171_v43 }
 0x220   :  { %174 = vst.msk [vmem:[#allocation3] sm:$0xff] %vm77_vm1, %v173_v45 }
 0x227   :  { %v177_v46 = vld [vmem:[#allocation3] sm:$0xff] }
 0x228   :  { %507 = vmatmul.mubr.msk.bf16.vlgmr.msra.gmra.mrb[4].mxu1 %vm77_vm1, %v177_v46 }
 0x2fb   :  { %v239_v56 = vpop.f32.mrb[4].mxu1 }
 0x2fc   :  { %v240_v57 = vadd.f32 %v464_v55, %v239_v56  ;;  %v508_v58 = vpop.f32.mrb[5].mxu1  ;;  %v478_v56 = vld [vmem:[%s779_s11] ss:$0 sm:$0xff] }
 0x2fd   :  { %v242_v59 = vpop.f32.mrb[6].mxu1 }
 0x2fe   :  { %v248_v60 = vmul.f32 0.044715, %v240_v57  ;;  %v243_v61 = vadd.f32 %v464_v55, %v242_v59  ;;  %v509_v62 = vpop.f32.mrb[7].mxu1  ;;  %v246_v11 = vmul.f32 0.5, %v240_v57 }
 0x300   :  { %v250_v63 = vmul.f32 %v248_v60, %v240_v57  ;;  %v249_v0 = vmul.f32 0.044715, %v243_v61  ;;  %v247_v12 = vmul.f32 0.5, %v243_v61 }
 0x302   :  { %v252_v2 = vmul.f32 %v250_v63, %v240_v57  ;;  %v251_v3 = vmul.f32 %v249_v0, %v243_v61 }
 0x304   :  { %v253_v4 = vmul.f32 %v251_v3, %v243_v61  ;;  %v254_v5 = vadd.f32 %v252_v2, %v240_v57 }
 0x306   :  { %v255_v6 = vadd.f32 %v253_v4, %v243_v61  ;;  %v256_v1 = vmul.f32 0.7978846, %v254_v5 }
 0x308   :  { %v257_v7 = vmul.f32 0.7978846, %v255_v6  ;;  %552 = vtanh.f32 %v256_v1 }
 0x30a   :  { %554 = vtanh.f32 %v257_v7 }
 0x312   :  { %v553_v8 = vpop.eup %552 }
 0x313   :  { %v260_v9 = vadd.f32 1.0, %v553_v8 }
 0x314   :  { %v555_v10 = vpop.eup %554 }
 0x315   :  { %v261_v13 = vadd.f32 1.0, %v555_v10  ;;  %v262_v14 = vmul.f32 %v260_v9, %v246_v11 }
 0x317   :  { %v263_v15 = vmul.f32 %v261_v13, %v247_v12 }
 0x319   :  { %v266_v16 = vpack.c.bf16 %v263_v15, %v262_v14 }
 0x31b   :  { %527 = vmatmul.mubr.bf16.vlgmr.msra.gmra.mrb[0].mxu0 %v266_v16 }
 0x3ee   :  { %v365_v18 = vpop.f32.mrb[0].mxu0 }
 0x3ef   :  { %v372_v20 = vadd.f32 %v365_v18, %v264_v17  ;;  %v528_v21 = vpop.f32.mrb[1].mxu0 }
 0x3f0   :  { %v368_v22 = vpop.f32.mrb[2].mxu0 }
 0x3f1   :  { %374 = vst.msk [vmem:[#allocation4] sm:$0xff] %vm77_vm1, %v372_v20  ;;  %v373_v23 = vadd.f32 %v368_v22, %v265_v19  ;;  %v529_v24 = vpop.f32.mrb[3].mxu0 }
 0x3f3   :  { %375 = vst.msk [vmem:[#allocation4 + $0x8] sm:$0xff] %vm77_vm1, %v373_v23 }
 0x3f8   :  { %v381_v26 = vld [vmem:[#allocation4] sm:$0xff] }
 0x3f9   :  { %v383_v28 = vadd.f32 %v381_v26, %v379_v25 }
 0x3fa   :  { %v382_v30 = vld [vmem:[#allocation4 + $0x8] sm:$0xff] }
 0x3fb   :  { %v392_v31 = vadd.f32 %v476_v27, %v383_v28  ;;  %v384_v32 = vadd.f32 %v382_v30, %v380_v29 }
 0x3fd   :  { %v396_v33 = vsel %vm77_vm1, %v392_v31, 0.0  ;;  %v393_v34 = vadd.f32 %v476_v27, %v384_v32 }
 0x3fe   :  { %397 = vadd.xlane.f32.xlu0 %v396_v33 }
 0x3ff   :  { %v399_v35 = vsel %vm77_vm1, %v393_v34, 0.0 }
 0x400   :  { %400 = vadd.xlane.f32.xlu1 %v399_v35 }
 0x48b   :  { %v398_v36 = vpop.xlane.xlu0 %397 }
 0x48c   :  { %v403_v37 = vmul.f32 0.03125, %v398_v36 }
 0x48d   :  { %v401_v38 = vpop.xlane.xlu1 %400 }
 0x48e   :  { %v405_v39 = vsub.f32 %v392_v31, %v403_v37  ;;  %v404_v40 = vmul.f32 0.03125, %v401_v38 }
 0x490   :  { %v406_v41 = vsub.f32 %v393_v34, %v404_v40  ;;  %v407_v42 = vmul.f32 %v405_v39, %v405_v39 }
 0x492   :  { %v409_v43 = vsel %vm77_vm1, %v407_v42, 0.0  ;;  %v408_v44 = vmul.f32 %v406_v41, %v406_v41 }
 0x493   :  { %410 = vadd.xlane.f32.xlu0 %v409_v43 }
 0x494   :  { %v412_v45 = vsel %vm77_vm1, %v408_v44, 0.0 }
 0x495   :  { %413 = vadd.xlane.f32.xlu1 %v412_v45 }
 0x520   :  { %v411_v46 = vpop.xlane.xlu0 %410 }
 0x521   :  { %v415_v47 = vmul.f32 0.03125, %v411_v46 }
 0x522   :  { %v414_v48 = vpop.xlane.xlu1 %413 }
 0x523   :  { %v417_v49 = vadd.f32 1e-08, %v415_v47  ;;  %v416_v50 = vmul.f32 0.03125, %v414_v48 }
 0x525   :  { %556 = vrsqrt.f32 %v417_v49  ;;  %v418_v51 = vadd.f32 1e-08, %v416_v50 }
 0x527   :  { %558 = vrsqrt.f32 %v418_v51 }
 0x52f   :  { %v557_v52 = vpop.eup %556 }
 0x530   :  { %v421_v54 = vmul.f32 %v557_v52, %v405_v39 }
 0x531   :  { %v559_v55 = vpop.eup %558 }
 0x532   :  { %v422_v57 = vmul.f32 %v559_v55, %v406_v41  ;;  %v429_v58 = vmul.f32 %v477_v53, %v421_v54 }
 0x534   :  { %v430_v59 = vmul.f32 %v477_v53, %v422_v57  ;;  %v437_v60 = vadd.f32 %v478_v56, %v429_v58 }
 0x536   :  { %v438_v61 = vadd.f32 %v478_v56, %v430_v59  ;;  %439 = vst.msk [vmem:[#allocation5] sm:$0xff] %vm77_vm1, %v437_v60 }
 0x538   :  { %440 = vst.msk [vmem:[#allocation5 + $0x8] sm:$0xff] %vm77_vm1, %v438_v61 }
 0x539   :  { %571 = shalt.err (!%p568_p4)
}
 0x53a   :  { %s572_s17 = scalar_lea.hbm %s780_s12, 256 }
 0x53b   :  { %p573_p5 = scmp.ne.s32.totalorder %s780_s12, %s572_s17  ;;  %p576_p6 = scmp.lt.u32.totalorder %s572_s17, %s780_s12 }
 0x53d   :  { %p578_p7 = pnand %p576_p6, %p573_p5 }
 0x53f   :  { %581 = shalt.err (!%p578_p7)
}
 0x540   :  { %s587_s5 = smov 128   ;;  %s588_s21 = smov 8  }
 0x541   :  { %452 = dma.vmem_to_hbm [thread:$0]  %s447_s16, 256, %s780_s12, [#allocation6], %s587_s5, %s587_s5, %s588_s21  }
 0x542   :  { %582 = dma.done.wait [#allocation6], 256  }
 0x543   :  { %583 = vsyncadd [#allocation6], 4294967040 }
 0x544   :  { %456 = vsyncpa [#allocation6], 1 }

// kernel: gpt2_forward.7
= control target key start
LH: loop header
LB: loop body
LE: loop exit
PB: predicated region body
PF: predicated region fallthrough
CT: control target
= control target key end

     0   :  { %s1799_s12 = smov 0   ;;  %s1801_s13 = smov 0   ;;  %s2009_s0 = inlined_call_operand.vmem [shape: bf16[2,8,32], index: 0, kind: input, shape index: {}]   ;;  %s2010_s1 = inlined_call_operand.vmem [shape: bf16[2,8,32], index: 1, kind: input, shape index: {}]   ;;  %s2011_s2 = inlined_call_operand.vmem [shape: bf16[2,8,32], index: 2, kind: input, shape index: {}]   ;;  %s2012_s3 = inlined_call_operand.vmem [shape: bf16[2,8,32], index: 3, kind: output, shape index: {}]  }
   0x1   :  { %s1803_s14 = smov 0  }
   0x2 LB: > { %s32_s15 = sadd.s32 1, %s1760_s13  ;;  %p1581_p0 = scmp.ge.s32.totalorder %s1764_s14, 1  ;;  %s1764_s14 = sphi %s1803_s14, %s13_s14   ;;  %s1760_s13 = sphi %s1801_s13, %s2014_s13   ;;  %s1756_s12 = sphi %s1799_s12, %s2013_s12  }
   0x3   : > { %p34_p1 = scmp.ge.s32.totalorder %s32_s15, 2  ;;  %p206_p2 = scmp.lt.s32.totalorder %s1764_s14, 3 }
   0x5   : > { %s2016_s15 = smov (%p34_p1, %s32_s15), 0  ;;  %p207_p3 = pnand %p1581_p0, %p206_p2 }
   0x6   : > { %p252_p4 = scmp.lt.s32.totalorder (!%p207_p3), %s1756_s12, 1  ;;  %v1766_v0 = vmov (!%p207_p3), 0.0   ;;  %vm1767_vm0 = vmmov (!%p207_p3), 0   ;;  %vm879_vm1 = vcmask (!%p207_p3), 64512   ;;  %vm293_vm2 = vcmask (!%p207_p3), 31744   ;;  %s1770_s23 = smov (!%p207_p3), 120  }
   0x7   : > { %210 = sbr.rel (%p207_p3) target bundleno = 1422 (0x58e), region = 32  ;;  %1624 = vmatprep.subr.bf16.mxu0 (!%p207_p3), %v1766_v0  ;;  %1626 = vmatprep.mubr.msk.bf16.mxu0 (!%p207_p3), %vm1767_vm0, %v1766_v0  ;;  %v1768_v7 = vmov (!%p207_p3), -1e+30   ;;  %295 = vst.msk [vmem:[#allocation3] sm:$0xff] (!%p207_p3), %vm293_vm2, %v1766_v0  ;;  %v869_v8 = vlaneseq (!%p207_p3)  ;;  %v1769_v17 = vmov (!%p207_p3), 0   ;;  %s1771_s24 = smov (!%p207_p3), 112  }
   0x8   : > { %1630 = vmatprep.subr.bf16.mxu1 (!%p207_p3), %v1766_v0  ;;  %1632 = vmatprep.mubr.msk.bf16.mxu1 (!%p207_p3), %vm1767_vm0, %v1766_v0  ;;  %294 = vst.msk [vmem:[#allocation2] sm:$0xff] (!%p207_p3), %vm293_vm2, %v1768_v7  ;;  %s1772_s25 = smov (!%p207_p3), 104   ;;  %vm949_vm4 = vcmask (!%p207_p3), 7168   ;;  %vm955_vm5 = vcmask (!%p207_p3), 1043456   ;;  %v1773_v60 = vmov (!%p207_p3), 1   ;;  %v1774_v62 = vmov (!%p207_p3), 2  }
   0x9   : > { %v1839_v9 = vshrl.u32 (!%p207_p3), %v869_v8, 7  ;;  %v1841_v10 = vand.u32 (!%p207_p3), 127, %v869_v8  ;;  %1709 = vset.pattern.permute.xlu0 (!%p207_p3), %v1769_v17  ;;  %1710 = vset.pattern.permute.xlu1 (!%p207_p3), %v1773_v60  ;;  %vm1086_vm6 = vcmask (!%p207_p3), 15368   ;;  %vm296_vm7 = vcmask (!%p207_p3), 261120   ;;  %s1776_s29 = smov (!%p207_p3), 8   ;;  %s1777_s30 = smov (!%p207_p3), 16  }
   0xa   : > { %vm1228_vm8 = vcmask (!%p207_p3), 23568   ;;  %297 = vst.msk [vmem:[#allocation4] sm:$0xff] (!%p207_p3), %vm296_vm7, %v1766_v0  ;;  %vm1367_vm9 = vcmask (!%p207_p3), 31768   ;;  %s1778_s4 = smov (!%p207_p3), 24   ;;  %vm1152_vm10 = vcmask (!%p207_p3), 130112   ;;  %vm1291_vm11 = vcmask (!%p207_p3), 195712  }
   0xb   : > { %vm878_vm3 = vcmp.ge.s32.totalorder (!%p207_p3), %v1839_v9, %v1841_v10  ;;  %vm1430_vm12 = vcmask (!%p207_p3), 261312   ;;  %vm1463_vm13 = vcmask (!%p207_p3), 130048   ;;  %vm1465_vm14 = vcmask (!%p207_p3), 195584  }
   0xc   : > { %vm1468_vm15 = vcmask (!%p207_p3), 257024  }
   0xe   : > { %s2018_s12 = smov (!%p252_p4, %s1756_s12), 1 }
   0xf   : > { %s1823_s16 = sshll.u32 %s2018_s12, 2  ;;  %v1856_v19 = vld [vmem:[#allocation2] sm:$0xff] }
  0x10   : > { %s267_s19 = scalar_lea.vmem %s2010_s1, %s1823_s16  ;;  %s258_s22 = scalar_lea.vmem %s2009_s0, %s1823_s16 }
  0x11   : > { %v866_v1 = vld [vmem:[%s267_s19] sm:$0xf]  ;;  %s278_s28 = scalar_lea.vmem %s2011_s2, %s1823_s16  ;;  %s287_s7 = scalar_lea.vmem %s2012_s3, %s1823_s16 }
  0x12   : > { %v884_v2 = vsel %vm879_vm1, %v866_v1, 0  ;;  %v862_v3 = vld [vmem:[%s258_s22] sm:$0xf]  ;;  %v1598_v18 = vcombine.low %v866_v1, %v866_v1 }
  0x13   : > { %1625 = vmatpush3.bf16.xpose.msra.mxu0 %v884_v2  ;;  %v863_v4 = vunpack.c.l.bf16 %v862_v3  ;;  %v1870_v23 = vld [vmem:[%s278_s28] sm:$0xf] }
  0x14   : > { %1642 = vmatprep.subr.bf16.mxu0 %v1766_v0  ;;  %1015 = vrot.lane.b32.xlu1 %v1598_v18, %s1770_s23  ;;  %v957_v24 = vsel %vm955_vm5, %v1870_v23, 0 }
  0x15   : > { %v864_v5 = vmul.f32 0.35355338, %v863_v4  ;;  %1631 = vmatpush3.bf16.msra.mxu1 %v957_v24  ;;  %v1600_v4 = vcombine.low %v1870_v23, %v1870_v23 }
  0x16   : > { %1636 = vmatprep.subr.bf16.mxu1 %v1766_v0 }
  0x17   : > { %v865_v6 = vpack.c.bf16 %v864_v5, %v864_v5 }
  0x19   : > { %1010 = vrot.lane.b32.xlu1 %v865_v6, %s1770_s23 }
  0x1a   : > { %1627 = vmatmul.mubr.msk.bf16.vlgmr.msra.gmra.mrb[0].mxu0 %vm879_vm1, %v865_v6 }
  0x1b   : > { %1644 = vmatprep.mubr.msk.bf16.mxu0 %vm1767_vm0, %v1766_v0 }
  0x1d   : > { %1157 = vrot.lane.b32.xlu1 %v1598_v18, %s1771_s24 }
  0x21   : > { %1155 = vrot.lane.b32.xlu1 %v865_v6, %s1771_s24 }
  0x25   : > { %1296 = vrot.lane.b32.xlu1 %v1598_v18, %s1772_s25 }
  0x29   : > { %1294 = vrot.lane.b32.xlu1 %v865_v6, %s1772_s25  ;;  %v1775_v6 = vmov 3  }
  0x86   : > { %v1016_v28 = vpop.permute.xlu1 %1015 }
  0x87   : > { %v1021_v31 = vsel %vm879_vm1, %v1016_v28, 0 }
  0x8b   : > { %v1011_v29 = vpop.permute.xlu1 %1010 }
  0x8f   : > { %v1158_v33 = vpop.permute.xlu1 %1157 }
  0x90   : > { %v1163_v35 = vsel %vm879_vm1, %v1158_v33, 0 }
  0x93   : > { %v1156_v34 = vpop.permute.xlu1 %1155 }
  0x97   : > { %v1297_v36 = vpop.permute.xlu1 %1296 }
  0x98   : > { %v1302_v37 = vsel %vm879_vm1, %v1297_v36, 0 }
  0x9b   : > { %v1295_v38 = vpop.permute.xlu1 %1294 }
  0xed   : > { %v920_v11 = vpop.f32.mrb[0].mxu0 }
  0xee   : > { %v926_v12 = vsel %vm878_vm3, %v920_v11, -1e+30  ;;  %v1628_v13 = vpop.f32.mrb[1].mxu0 }
  0xef   : > { %v923_v14 = vpop.f32.mrb[2].mxu0  ;;  %v928_v15 = vsel %vm879_vm1, %v926_v12, -inf }
  0xf0   : > { %929 = vmax.xlane.f32.xlu0 %v928_v15  ;;  %v1629_v16 = vpop.f32.mrb[3].mxu0 }
 0x17d   : > { %v930_v20 = vpop.xlane.xlu0 %929 }
 0x17e   : > { %v1859_v21 = vmax.f32 %v1856_v19, %v930_v20 }
 0x180   : > { %v932_v22 = vsub.f32 %v1856_v19, %v1859_v21  ;;  %1008 = vst.msk [vmem:[#allocation2] sm:$0xff] %vm949_vm4, %v1859_v21  ;;  %937 = vperm.xlu0 %1709, %v1859_v21  }
 0x182   : > { %v933_v3 = vmul.f32 1.442695, %v932_v22 }
 0x184   : > { %1711 = vset.pattern.permute.xlu0 %v1774_v62 }
 0x187   : > { %v1919_v1 = vld [vmem:[#allocation2] sm:$0xff] }
 0x1ff   : > { %v938_v25 = vpop.permute.xlu0 %937 }
 0x200   : > { %v940_v26 = vsub.f32 %v926_v12, %v938_v25 }
 0x202   : > { %v941_v27 = vmul.f32 1.442695, %v940_v26  ;;  %v999_v26 = vld [vmem:[#allocation4] sm:$0xff] }
 0x204   : > { %1724 = vpow2.f32 %v941_v27 }
 0x205   : > { %1726 = vpow2.f32 %v933_v3 }
 0x20e   : > { %v1875_v30 = vpop.eup %1724 }
 0x20f   : > { %v951_v32 = vpack.c.bf16 %v1875_v30, %v1875_v30  ;;  %v1938_v11 = vpop.eup %1726  ;;  %v945_v16 = vsel %vm879_vm1, %v1875_v30, 0.0 }
 0x211   : > { %1633 = vmatmul.mubr.msk.bf16.vlgmr.msra.gmra.mrb[0].mxu1 %vm879_vm1, %v951_v32 }
 0x212   : > { %1637 = vmatpush3.bf16.xpose.msra.mxu1 %v1021_v31  ;;  %1638 = vmatprep.mubr.msk.bf16.mxu1 %vm1767_vm0, %v1766_v0 }
 0x213   : > { %1648 = vmatprep.subr.bf16.mxu1 %v1766_v0 }
 0x219   : > { %1639 = vmatmul.mubr.msk.bf16.vlgmr.msra.gmra.mrb[4].mxu1 %vm879_vm1, %v1011_v29 }
 0x21a   : > { %1649 = vmatpush3.bf16.xpose.msra.mxu1 %v1163_v35  ;;  %1650 = vmatprep.mubr.msk.bf16.mxu1 %vm1767_vm0, %v1766_v0 }
 0x21b   : > { %1660 = vmatprep.subr.bf16.mxu1 %v1766_v0 }
 0x221   : > { %1651 = vmatmul.mubr.msk.bf16.vlgmr.msra.gmra.mrb[8].mxu1 %vm879_vm1, %v1156_v34 }
 0x222   : > { %1661 = vmatpush3.bf16.xpose.msra.mxu1 %v1302_v37  ;;  %1662 = vmatprep.mubr.msk.bf16.mxu1 %vm1767_vm0, %v1766_v0 }
 0x229   : > { %1663 = vmatmul.mubr.msk.bf16.vlgmr.msra.gmra.mrb[12].mxu1 %vm879_vm1, %v1295_v38 }
 0x2e4   : > { %v1894_v39 = vpop.f32.mrb[0].mxu1 }
 0x2e5   : > { %v1634_v40 = vpop.f32.mrb[1].mxu1 }
 0x2e6   : > { %v996_v41 = vpop.f32.mrb[2].mxu1 }
 0x2e7   : > { %v1635_v42 = vpop.f32.mrb[3].mxu1 }
 0x2ec   : > { %v1057_v43 = vpop.f32.mrb[4].mxu1 }
 0x2ed   : > { %v1899_v44 = vsel %vm878_vm3, %v1057_v43, -1e+30  ;;  %v1640_v45 = vpop.f32.mrb[5].mxu1 }
 0x2ee   : > { %v1060_v46 = vpop.f32.mrb[6].mxu1  ;;  %v1065_v47 = vsel %vm879_vm1, %v1899_v44, -inf }
 0x2ef   : > { %1066 = vmax.xlane.f32.xlu1 %v1065_v47  ;;  %v1641_v48 = vpop.f32.mrb[7].mxu1 }
 0x2f4   : > { %v1199_v49 = vpop.f32.mrb[8].mxu1 }
 0x2f5   : > { %v1906_v50 = vsel %vm878_vm3, %v1199_v49, -1e+30  ;;  %v1652_v51 = vpop.f32.mrb[9].mxu1 }
 0x2f6   : > { %v1202_v52 = vpop.f32.mrb[10].mxu1  ;;  %v1207_v53 = vsel %vm879_vm1, %v1906_v50, -inf }
 0x2f7   : > { %1208 = vmax.xlane.f32.xlu0 %v1207_v53  ;;  %v1653_v54 = vpop.f32.mrb[11].mxu1 }
 0x2fc   : > { %v1338_v55 = vpop.f32.mrb[12].mxu1 }
 0x2fd   : > { %v1913_v56 = vsel %vm878_vm3, %v1338_v55, -1e+30  ;;  %v1664_v57 = vpop.f32.mrb[13].mxu1 }
 0x2fe   : > { %v1341_v58 = vpop.f32.mrb[14].mxu1  ;;  %v1346_v59 = vsel %vm879_vm1, %v1913_v56, -inf }
 0x2ff   : > { %v1665_v61 = vpop.f32.mrb[15].mxu1  ;;  %1347 = vmax.xlane.f32.xlu1 %v1346_v59 }
 0x37c   : > { %v1067_v63 = vpop.xlane.xlu1 %1066 }
 0x37d   : > { %v1922_v2 = vmax.f32 %v1919_v1, %v1067_v63 }
 0x37f   : > { %v1069_v5 = vsub.f32 %v1919_v1, %v1922_v2  ;;  %1154 = vst.msk [vmem:[#allocation2] sm:$0xff] %vm1086_vm6, %v1922_v2  ;;  %1074 = vperm.xlu1 %1710, %v1922_v2  }
 0x381   : > { %v1070_v48 = vmul.f32 1.442695, %v1069_v5 }
 0x383   : > { %1092 = vrot.lane.b32.xlu1 %v1600_v4, %s1770_s23 }
 0x384   : > { %1712 = vset.pattern.permute.xlu1 %v1775_v6  ;;  %v1209_v7 = vpop.xlane.xlu0 %1208 }
 0x386   : > { %v1206_v8 = vld [vmem:[#allocation2] sm:$0xff] }
 0x387   : > { %v1210_v9 = vmax.f32 %v1206_v8, %v1209_v7 }
 0x389   : > { %v1211_v10 = vsub.f32 %v1206_v8, %v1210_v9  ;;  %1293 = vst.msk [vmem:[#allocation2] sm:$0xff] %vm1228_vm8, %v1210_v9  ;;  %1216 = vperm.xlu0 %1711, %v1210_v9  }
 0x38b   : > { %v1212_v36 = vmul.f32 1.442695, %v1211_v10 }
 0x38c   : > { %v1348_v12 = vpop.xlane.xlu1 %1347 }
 0x38d   : > { %1713 = vset.pattern.permute.xlu0 %v1769_v17 }
 0x38e   : > { %1002 = vperm.xlu0 %1713, %v1938_v11  }
 0x390   : > { %v1942_v13 = vld [vmem:[#allocation2] sm:$0xff] }
 0x391   : > { %v1945_v14 = vmax.f32 %v1942_v13, %v1348_v12 }
 0x392   : > { %1715 = vset.pattern.permute.xlu0 %v1774_v62 }
 0x393   : > { %v1350_v15 = vsub.f32 %v1942_v13, %v1945_v14  ;;  %1432 = vst.msk [vmem:[#allocation2] sm:$0xff] %vm1367_vm9, %v1945_v14  ;;  %1355 = vperm.xlu1 %1712, %v1945_v14  }
 0x395   : > { %v1351_v57 = vmul.f32 1.442695, %v1350_v15 }
 0x397   : > { %1231 = vrot.lane.b32.xlu1 %v1600_v4, %s1771_s24 }
 0x398   : > { %1714 = vset.pattern.permute.xlu1 %v1773_v60 }
 0x39b   : > { %1370 = vrot.lane.b32.xlu1 %v1600_v4, %s1772_s25 }
 0x3bf   : > { %946 = vadd.xlane.f32.xlu1 %v945_v16 }
 0x3fe   : > { %v1075_v18 = vpop.permute.xlu1 %1074 }
 0x3ff   : > { %v1077_v19 = vsub.f32 %v1899_v44, %v1075_v18 }
 0x401   : > { %v1078_v20 = vmul.f32 1.442695, %v1077_v19 }
 0x402   : > { %v1093_v21 = vpop.permute.xlu1 %1092 }
 0x403   : > { %1728 = vpow2.f32 %v1078_v20  ;;  %v1098_v22 = vsel %vm955_vm5, %v1093_v21, 0 }
 0x404   : > { %1643 = vmatpush3.bf16.msra.mxu0 %v1098_v22 }
 0x405   : > { %1654 = vmatprep.subr.bf16.mxu0 %v1766_v0 }
 0x408   : > { %v1217_v23 = vpop.permute.xlu0 %1216 }
 0x409   : > { %v1219_v24 = vsub.f32 %v1906_v50, %v1217_v23 }
 0x40b   : > { %v1220_v25 = vmul.f32 1.442695, %v1219_v24 }
 0x40d   : > { %v1729_v27 = vpop.eup %1728  ;;  %1730 = vpow2.f32 %v1220_v25  ;;  %v1003_v28 = vpop.permute.xlu0 %1002 }
 0x40e   : > { %v1005_v29 = vmul.f32 %v1003_v28, %v999_v26  ;;  %v1082_v30 = vsel %vm879_vm1, %v1729_v27, 0.0  ;;  %v1088_v31 = vpack.c.bf16 %v1729_v27, %v1729_v27 }
 0x40f   : > { %1083 = vadd.xlane.f32.xlu0 %v1082_v30 }
 0x410   : > { %v1006_v32 = vadd.f32 %v1005_v29, %v1894_v39  ;;  %1645 = vmatmul.mubr.msk.bf16.vlgmr.msra.gmra.mrb[4].mxu0 %vm879_vm1, %v1088_v31 }
 0x411   : > { %1656 = vmatprep.mubr.msk.bf16.mxu0 %vm1767_vm0, %v1766_v0 }
 0x412   : > { %1007 = vst.msk [vmem:[#allocation4] sm:$0xff] %vm879_vm1, %v1006_v32  ;;  %v1356_v33 = vpop.permute.xlu1 %1355 }
 0x413   : > { %v1358_v34 = vsub.f32 %v1913_v56, %v1356_v33 }
 0x415   : > { %v1359_v35 = vmul.f32 1.442695, %v1358_v34 }
 0x416   : > { %v1232_v37 = vpop.permute.xlu1 %1231 }
 0x417   : > { %v1731_v38 = vpop.eup %1730  ;;  %1732 = vpow2.f32 %v1359_v35  ;;  %v1237_v40 = vsel %vm955_vm5, %v1232_v37, 0 }
 0x418   : > { %1655 = vmatpush3.bf16.msra.mxu0 %v1237_v40  ;;  %v1224_v39 = vsel %vm879_vm1, %v1731_v38, 0.0  ;;  %v1230_v41 = vpack.c.bf16 %v1731_v38, %v1731_v38  ;;  %1734 = vpow2.f32 %v1212_v36 }
 0x419   : > { %1225 = vadd.xlane.f32.xlu1 %v1224_v39  ;;  %1666 = vmatprep.subr.bf16.mxu0 %v1766_v0  ;;  %1736 = vpow2.f32 %v1070_v48  ;;  %v1140_v22 = vld [vmem:[#allocation4] sm:$0xff] }
 0x41a   : > { %v1371_v42 = vpop.permute.xlu1 %1370  ;;  %1738 = vpow2.f32 %v1351_v57 }
 0x41b   : > { %1657 = vmatmul.mubr.msk.bf16.vlgmr.msra.gmra.mrb[8].mxu0 %vm879_vm1, %v1230_v41  ;;  %v1376_v43 = vsel %vm955_vm5, %v1371_v42, 0 }
 0x41c   : > { %1667 = vmatpush3.bf16.msra.mxu0 %v1376_v43  ;;  %1668 = vmatprep.mubr.msk.bf16.mxu0 %vm1767_vm0, %v1766_v0  ;;  %v943_v0 = vld [vmem:[#allocation3] sm:$0xff] }
 0x41d   : > { %v944_v50 = vmul.f32 %v1938_v11, %v943_v0 }
 0x421   : > { %v1733_v44 = vpop.eup %1732 }
 0x422   : > { %v1363_v45 = vsel %vm879_vm1, %v1733_v44, 0.0  ;;  %v1369_v46 = vpack.c.bf16 %v1733_v44, %v1733_v44  ;;  %v1735_v47 = vpop.eup %1734 }
 0x423   : > { %1364 = vadd.xlane.f32.xlu1 %v1363_v45  ;;  %v1737_v49 = vpop.eup %1736 }
 0x424   : > { %1669 = vmatmul.mubr.msk.bf16.vlgmr.msra.gmra.mrb[12].mxu0 %vm879_vm1, %v1369_v46  ;;  %v1739_v1 = vpop.eup %1738 }
 0x425   : > { %1282 = vperm.xlu0 %1715, %v1735_v47  }
 0x429   : > { %1721 = vset.pattern.permute.xlu0 %v1775_v6 }
 0x434   : > { %1143 = vperm.xlu1 %1714, %v1737_v49  }
 0x438   : > { %1716 = vset.pattern.permute.xlu1 %v1775_v6 }
 0x44c   : > { %v947_v51 = vpop.xlane.xlu1 %946 }
 0x44d   : > { %v948_v52 = vadd.f32 %v947_v51, %v944_v50 }
 0x44f   : > { %950 = vst.msk [vmem:[#allocation3] sm:$0xff] %vm949_vm4, %v948_v52 }
 0x456   : > { %v1080_v53 = vld [vmem:[#allocation3] sm:$0xff] }
 0x457   : > { %v1081_v54 = vmul.f32 %v1737_v49, %v1080_v53 }
 0x49c   : > { %v1084_v55 = vpop.xlane.xlu0 %1083 }
 0x49d   : > { %v1085_v56 = vadd.f32 %v1084_v55, %v1081_v54 }
 0x49f   : > { %1087 = vst.msk [vmem:[#allocation3] sm:$0xff] %vm1086_vm6, %v1085_v56 }
 0x4a4   : > { %v1283_v27 = vpop.permute.xlu0 %1282 }
 0x4a6   : > { %v1222_v58 = vld [vmem:[#allocation3] sm:$0xff]  ;;  %v1226_v61 = vpop.xlane.xlu1 %1225 }
 0x4a7   : > { %v1223_v59 = vmul.f32 %v1735_v47, %v1222_v58 }
 0x4a9   : > { %v1227_v63 = vadd.f32 %v1226_v61, %v1223_v59 }
 0x4ab   : > { %1229 = vst.msk [vmem:[#allocation3] sm:$0xff] %vm1228_vm8, %v1227_v63 }
 0x4b0   : > { %v1365_v4 = vpop.xlane.xlu1 %1364 }
 0x4b2   : > { %v1361_v2 = vld [vmem:[#allocation3] sm:$0xff] }
 0x4b3   : > { %v1362_v3 = vmul.f32 %v1739_v1, %v1361_v2 }
 0x4b5   : > { %v1366_v5 = vadd.f32 %v1365_v4, %v1362_v3 }
 0x4b7   : > { %1368 = vst.msk [vmem:[#allocation3] sm:$0xff] %vm1367_vm9, %v1366_v5 }
 0x4be   : > { %v1436_v9 = vld [vmem:[#allocation3] sm:$0xff] }
 0x4bf   : > { %1740 = vrcp.f32 %v1436_v9 }
 0x4c9   : > { %v1741_v16 = vpop.eup %1740 }
 0x4e3   : > { %v1134_v7 = vpop.f32.mrb[4].mxu0 }
 0x4e4   : > { %1148 = vrot.lane.b32.xlu1 %v1134_v7, %s1776_s29  ;;  %v1646_v8 = vpop.f32.mrb[5].mxu0 }
 0x4e5   : > { %v1137_v10 = vpop.f32.mrb[6].mxu0 }
 0x4e6   : > { %v1647_v11 = vpop.f32.mrb[7].mxu0 }
 0x4e8   : > { %1421 = vperm.xlu1 %1716, %v1739_v1  }
 0x4ec   : > { %1717 = vset.pattern.permute.xlu1 %v1769_v17  ;;  %v1144_v17 = vpop.permute.xlu1 %1143 }
 0x4ed   : > { %v1146_v23 = vmul.f32 %v1144_v17, %v1140_v22 }
 0x4ee   : > { %v1273_v12 = vpop.f32.mrb[8].mxu0 }
 0x4ef   : > { %1287 = vrot.lane.b32.xlu1 %v1273_v12, %s1777_s30  ;;  %v1658_v13 = vpop.f32.mrb[9].mxu0 }
 0x4f0   : > { %v1276_v14 = vpop.f32.mrb[10].mxu0 }
 0x4f1   : > { %v1659_v15 = vpop.f32.mrb[11].mxu0 }
 0x4f3   : > { %1442 = vperm.xlu1 %1717, %v1741_v16  }
 0x4f7   : > { %1718 = vset.pattern.permute.xlu1 %v1773_v60  ;;  %v1412_v18 = vpop.f32.mrb[12].mxu0 }
 0x4f8   : > { %1447 = vperm.xlu1 %1718, %v1741_v16   ;;  %v1670_v19 = vpop.f32.mrb[13].mxu0 }
 0x4f9   : > { %v1415_v20 = vpop.f32.mrb[14].mxu0 }
 0x4fa   : > { %v1671_v21 = vpop.f32.mrb[15].mxu0 }
 0x4fc   : > { %1426 = vrot.lane.b32.xlu1 %v1412_v18, %s1778_s4 }
 0x4fd   : > { %1719 = vset.pattern.permute.xlu1 %v1774_v62 }
 0x500   : > { %1452 = vperm.xlu1 %1719, %v1741_v16  }
 0x504   : > { %1720 = vset.pattern.permute.xlu1 %v1775_v6 }
 0x505   : > { %1457 = vperm.xlu1 %1720, %v1741_v16  }
 0x556   : > { %v1149_v24 = vpop.permute.xlu1 %1148 }
 0x557   : > { %v1151_v25 = vadd.f32 %v1149_v24, %v1146_v23 }
 0x559   : > { %1153 = vst.msk [vmem:[#allocation4] sm:$0xff] %vm1152_vm10, %v1151_v25 }
 0x560   : > { %v1279_v26 = vld [vmem:[#allocation4] sm:$0xff] }
 0x561   : > { %v1285_v28 = vmul.f32 %v1283_v27, %v1279_v26 }
 0x567   : > { %v1422_v60 = vpop.permute.xlu1 %1421 }
 0x56b   : > { %v1288_v29 = vpop.permute.xlu1 %1287 }
 0x56c   : > { %v1290_v30 = vadd.f32 %v1288_v29, %v1285_v28 }
 0x56e   : > { %1292 = vst.msk [vmem:[#allocation4] sm:$0xff] %vm1291_vm11, %v1290_v30 }
 0x572   : > { %v1443_v62 = vpop.permute.xlu1 %1442 }
 0x575   : > { %v1418_v32 = vld [vmem:[#allocation4] sm:$0xff] }
 0x576   : > { %v1424_v6 = vmul.f32 %v1422_v60, %v1418_v32 }
 0x577   : > { %v1448_v31 = vpop.permute.xlu1 %1447 }
 0x57b   : > { %v1427_v33 = vpop.permute.xlu1 %1426 }
 0x57c   : > { %v1429_v34 = vadd.f32 %v1427_v33, %v1424_v6 }
 0x57e   : > { %1431 = vst.msk [vmem:[#allocation4] sm:$0xff] %vm1430_vm12, %v1429_v34 }
 0x57f   : > { %v1453_v35 = vpop.permute.xlu1 %1452 }
 0x584   : > { %v1458_v37 = vpop.permute.xlu1 %1457 }
 0x585   : > { %v1439_v36 = vld [vmem:[#allocation4] sm:$0xff] }
 0x586   : > { %v1445_v38 = vmul.f32 %v1443_v62, %v1439_v36  ;;  %v1450_v40 = vmul.f32 %v1448_v31, %v1439_v36  ;;  %v1455_v39 = vmul.f32 %v1453_v35, %v1439_v36  ;;  %v1460_v42 = vmul.f32 %v1458_v37, %v1439_v36 }
 0x588   : > { %v1462_v41 = vsel %vm879_vm1, %v1445_v38, %v1450_v40 }
 0x589   : > { %v1464_v43 = vsel %vm1463_vm13, %v1462_v41, %v1455_v39 }
 0x58a   : > { %v1466_v44 = vsel %vm1465_vm14, %v1464_v43, %v1460_v42 }
 0x58b   : > { %v1467_v45 = vpack.c.bf16 %v1466_v44, %v1466_v44 }
 0x58d   : > { %1469 = vst.msk [vmem:[%s287_s7] sm:$0xf] %vm1468_vm15, %v1467_v45 }
 0x58e PF: > { %s13_s14 = sadd.s32 1, %s1764_s14   ;;  %s2013_s12 = smov %s1760_s13 }
 0x58f   : > { %p10_p5 = scmp.ge.s32.totalorder %s13_s14, 4   ;;  %s2014_s13 = smov %s2016_s15 }
 0x591   :  { %12 = sbr.rel (!%p10_p5) target bundleno = 2 (0x2), region = 84 }

</bundles_post_ra>
